<compile_context>
chip_gen: v7x
topology: tpu7x:2x2x1
jax: 0.10.0
libtpu: 0.0.40
codegen_flags: <defaults>
</compile_context>

<pallas_src>
import jax
import jax.numpy as jnp
from jax.experimental import pallas as pl
from jax.experimental.pallas import tpu as pltpu


# ---------------------------------------------------------------------------
# Pallas kernels
# ---------------------------------------------------------------------------
def _conv1_kernel(p_ref, w_ref, b_ref, o_ref):
    """Fused conv1 (one matmul) + bias + ReLU + 2x2 max-pool for one image.

    p_ref: (1, 4*MP, 128) bf16 im2col rows, the 4 pool offsets concatenated
           along M (MP = 224 = 14*16 rows each, 8-aligned).
    w_ref: (128, 128) bf16 (75 valid K rows).   b_ref: (1, 128) f32.
    o_ref: (1, MP, 128) bf16 pooled+ReLU'd activations (6 valid lanes).
    pool(relu(conv + b)) == relu(max_offsets(conv) + b)  (monotone epilogue).
    """
    mp = o_ref.shape[1]
    d = jnp.dot(p_ref[0], w_ref[...], preferred_element_type=jnp.float32)
    m = jnp.maximum(jnp.maximum(d[0:mp], d[mp:2 * mp]),
                    jnp.maximum(d[2 * mp:3 * mp], d[3 * mp:4 * mp]))
    o_ref[0] = jnp.maximum(m + b_ref[...], 0.0).astype(o_ref.dtype)


def _conv2_fc_kernel(p_ref, w2_ref, b2_ref, w1_ref, b1_ref,
                     wf2_ref, bf2_ref, wf3_ref, bf3_ref, o_ref):
    """Fused conv2 (+bias+ReLU+pool) -> fc1+ReLU -> fc2+ReLU -> fc3, one image.

    p_ref : (1, 4*SP, 3200) bf16 conv2 im2col rows; the 128-lane conv1 output
            is folded into K = 25 taps * 128 lanes, 4 pool offsets along M
            (SP = 32 rows each, 25 valid).
    w2_ref: (3200, 128) bf16.   b2_ref/b1/bf2/bf3: (1, 128) f32.
    w1_ref: (25, 128, 128) bf16 per-position fc1 weight blocks (s, lane, out).
    wf2_ref/wf3_ref: (128, 128) bf16.
    o_ref : (1, 1, 128) f32 logits (10 valid lanes).
    """
    sp = p_ref.shape[1] // 4
    d = jnp.dot(p_ref[0], w2_ref[...], preferred_element_type=jnp.float32)
    m = jnp.maximum(jnp.maximum(d[0:sp], d[sp:2 * sp]),
                    jnp.maximum(d[2 * sp:3 * sp], d[3 * sp:4 * sp]))
    act = jnp.maximum(m + b2_ref[...], 0.0)                       # (SP,128) f32

    # fc1 contracts (spatial position s, channel lane c).  25 rank-128 MXU
    # updates cost the same cycles as one (1,3200)@(3200,128) dot at M=1 and
    # avoid a sublane->lane flatten relayout.
    h = b1_ref[...]
    for s in range(w1_ref.shape[0]):
        h = h + jnp.dot(act[s:s + 1, :].astype(jnp.bfloat16), w1_ref[s],
                        preferred_element_type=jnp.float32)
    h = jnp.maximum(h, 0.0)
    h = jnp.dot(h.astype(jnp.bfloat16), wf2_ref[...],
                preferred_element_type=jnp.float32)
    h = jnp.maximum(h + bf2_ref[...], 0.0)
    h = jnp.dot(h.astype(jnp.bfloat16), wf3_ref[...],
                preferred_element_type=jnp.float32)
    o_ref[0] = h + bf3_ref[...]


# ---------------------------------------------------------------------------
# Layer wrappers (im2col glue + pallas_call)
# ---------------------------------------------------------------------------
def conv1_pool_relu(x_nchw, w1p, b1p):
    """conv1 + bias + ReLU + 2x2 maxpool.  Returns (n, 14, 16, 128) bf16
    (spatial width padded 14->16, channels lane-padded 6->128)."""
    n = x_nchw.shape[0]
    x = jnp.transpose(x_nchw, (0, 2, 3, 1)).astype(jnp.bfloat16)   # NHWC bf16
    x = jnp.pad(x, ((0, 0), (0, 0), (0, 4), (0, 0)))               # W 32 -> 36
    # im2col: 25 tap slices over the full 28x32 conv-output grid (feature
    # order (ki, kj, c)), then the 4 pool-offset sub-grids concatenated into M.
    taps = [x[:, ki:ki + 28, kj:kj + 32, :]
            for ki in range(5) for kj in range(5)]
    t = jnp.concatenate(taps, axis=-1)                             # (n,28,32,75)
    offs = [t[:, dy::2, dx::2, :] for dy in (0, 1) for dx in (0, 1)]
    p = jnp.stack(offs, axis=1).reshape(n, 4 * 224, 75)
    # Small K pad 75->128 kept so the MXU contraction dim is tile-aligned
    # (conv2's K = 3200 needs no pad at all).
    p = jnp.pad(p, ((0, 0), (0, 0), (0, 128 - 75)))
    m1 = 4 * 224
    out = pl.pallas_call(
        _conv1_kernel,
        out_shape=jax.ShapeDtypeStruct((n, 224, 128), jnp.bfloat16),
        grid=(n,),
        in_specs=[
            pl.BlockSpec((1, m1, 128), lambda b: (b, 0, 0)),
            pl.BlockSpec((128, 128), lambda b: (0, 0)),
            pl.BlockSpec((1, 128), lambda b: (0, 0)),
        ],
        out_specs=pl.BlockSpec((1, 224, 128), lambda b: (b, 0, 0)),
        compiler_params=pltpu.CompilerParams(dimension_semantics=("parallel",)),
        cost_estimate=pl.CostEstimate(
            flops=2 * n * m1 * 128 * 128, transcendentals=0,
            bytes_accessed=n * m1 * 128 * 2 + 128 * 128 * 2 + 128 * 4
                           + n * 224 * 128 * 2),
    )(p, w1p, b1p)
    return out.reshape(n, 14, 16, 128)


def conv2_fc_head(o1_sp, prep):
    """Fused conv2+bias+ReLU+pool -> fc1 -> fc2 -> fc3.  o1_sp: (n,14,16,128)."""
    n = o1_sp.shape[0]
    # conv2 im2col over the lane-padded conv1 output (no channel slice, no
    # K pad): feature index = (ki*5+kj)*128 + lane, K = 3200 exactly.
    taps = [o1_sp[:, ki:ki + 10, kj:kj + 10, :]
            for ki in range(5) for kj in range(5)]
    t = jnp.concatenate(taps, axis=-1)                             # (n,10,10,3200)
    offs = [t[:, dy::2, dx::2, :] for dy in (0, 1) for dx in (0, 1)]
    p = jnp.stack(offs, axis=1).reshape(n, 4, 25, 3200)
    p = jnp.pad(p, ((0, 0), (0, 0), (0, 7), (0, 0)))               # rows 25 -> 32
    p = p.reshape(n, 128, 3200)
    out = pl.pallas_call(
        _conv2_fc_kernel,
        out_shape=jax.ShapeDtypeStruct((n, 1, 128), jnp.float32),
        grid=(n,),
        in_specs=[
            pl.BlockSpec((1, 128, 3200), lambda b: (b, 0, 0)),
            pl.BlockSpec((3200, 128), lambda b: (0, 0)),
            pl.BlockSpec((1, 128), lambda b: (0, 0)),
            pl.BlockSpec((25, 128, 128), lambda b: (0, 0, 0)),
            pl.BlockSpec((1, 128), lambda b: (0, 0)),
            pl.BlockSpec((128, 128), lambda b: (0, 0)),
            pl.BlockSpec((1, 128), lambda b: (0, 0)),
            pl.BlockSpec((128, 128), lambda b: (0, 0)),
            pl.BlockSpec((1, 128), lambda b: (0, 0)),
        ],
        out_specs=pl.BlockSpec((1, 1, 128), lambda b: (b, 0, 0)),
        compiler_params=pltpu.CompilerParams(dimension_semantics=("parallel",)),
        cost_estimate=pl.CostEstimate(
            flops=2 * n * (128 * 3200 * 128 + 25 * 128 * 128 + 2 * 128 * 128),
            transcendentals=0,
            bytes_accessed=n * 128 * 3200 * 2 + 3200 * 128 * 2
                           + 25 * 128 * 128 * 2 + 2 * 128 * 128 * 2
                           + 4 * 128 * 4 + n * 128 * 4),
    )(p, prep["c2_w"], prep["c2_b"], prep["f1_w"], prep["f1_b"],
      prep["f2_w"], prep["f2_b"], prep["f3_w"], prep["f3_b"])
    return out[:, 0, :10]


# ---------------------------------------------------------------------------
# Parameter init (PyTorch-default-style uniform) and one-time kernel prep
# ---------------------------------------------------------------------------
def _uniform(key, shape, fan_in):
    bound = 1.0 / jnp.sqrt(jnp.asarray(fan_in, jnp.float32))
    return jax.random.uniform(key, shape, jnp.float32, -bound, bound)


def init_params(key):
    ks = jax.random.split(key, 10)
    return {
        "conv1_w": _uniform(ks[0], (6, 3, 5, 5), 75),
        "conv1_b": _uniform(ks[1], (6,), 75),
        "conv2_w": _uniform(ks[2], (16, 6, 5, 5), 150),
        "conv2_b": _uniform(ks[3], (16,), 150),
        "fc1_w": _uniform(ks[4], (120, 400), 400),   # PyTorch (out, in)
        "fc1_b": _uniform(ks[5], (120,), 400),
        "fc2_w": _uniform(ks[6], (84, 120), 120),
        "fc2_b": _uniform(ks[7], (84,), 120),
        "fc3_w": _uniform(ks[8], (10, 84), 84),
        "fc3_b": _uniform(ks[9], (10,), 84),
    }


def prepare_params(p):
    """One-time: permute / pad weights into kernel-ready, lane-dense layouts."""
    f32, bf16 = jnp.float32, jnp.bfloat16
    prep = {}

    def pad_bias(b):
        return jnp.zeros((1, 128), f32).at[0, :b.shape[0]].set(b)

    # conv1: (out,c,kh,kw) -> (kh,kw,c,out) -> (75,6) -> (128,128), zero pad.
    w1 = p["conv1_w"].transpose(2, 3, 1, 0).reshape(75, 6)
    prep["c1_w"] = jnp.zeros((128, 128), f32).at[:75, :6].set(w1).astype(bf16)
    prep["c1_b"] = pad_bias(p["conv1_b"])

    # conv2: feature index = (ki*5+kj)*128 + lane; the conv1 output keeps all
    # 128 lanes, channel selection is folded into zero rows of this weight.
    w2 = p["conv2_w"].transpose(2, 3, 1, 0)                     # (5,5,6,16)
    w2p = jnp.zeros((25, 128, 128), f32).at[:, :6, :16].set(w2.reshape(25, 6, 16))
    prep["c2_w"] = w2p.reshape(3200, 128).astype(bf16)
    prep["c2_b"] = pad_bias(p["conv2_b"])

    # fc1: PyTorch flatten order is NCHW -> feature = c*25 + s (s = py*5+px).
    # Kernel activation is (s, lane=c); store per-position (lane, out) blocks.
    w1fc = p["fc1_w"].reshape(120, 16, 25).transpose(2, 1, 0)   # (s, c, out)
    prep["f1_w"] = (jnp.zeros((25, 128, 128), f32)
                    .at[:, :16, :120].set(w1fc).astype(bf16))
    prep["f1_b"] = pad_bias(p["fc1_b"])

    prep["f2_w"] = (jnp.zeros((128, 128), f32)
                    .at[:120, :84].set(p["fc2_w"].T).astype(bf16))
    prep["f2_b"] = pad_bias(p["fc2_b"])
    prep["f3_w"] = (jnp.zeros((128, 128), f32)
                    .at[:84, :10].set(p["fc3_w"].T).astype(bf16))
    prep["f3_b"] = pad_bias(p["fc3_b"])
    return prep


# ---------------------------------------------------------------------------
# Full forward pass (matches Net.forward semantics) and a pure-JAX reference
# ---------------------------------------------------------------------------
def lenet5_forward(prep, x_nchw):
    o1 = conv1_pool_relu(x_nchw, prep["c1_w"], prep["c1_b"])   # (n,14,16,128)
    return conv2_fc_head(o1, prep)                             # (n,10) f32


def reference_forward(p, x):
    dn = ("NCHW", "OIHW", "NCHW")
    y = jax.lax.conv_general_dilated(x, p["conv1_w"], (1, 1), "VALID",
                                     dimension_numbers=dn)
    y = jax.nn.relu(y + p["conv1_b"][None, :, None, None])
    y = jax.lax.reduce_window(y, -jnp.inf, jax.lax.max,
                              (1, 1, 2, 2), (1, 1, 2, 2), "VALID")
    y = jax.lax.conv_general_dilated(y, p["conv2_w"], (1, 1), "VALID",
                                     dimension_numbers=dn)
    y = jax.nn.relu(y + p["conv2_b"][None, :, None, None])
    y = jax.lax.reduce_window(y, -jnp.inf, jax.lax.max,
                              (1, 1, 2, 2), (1, 1, 2, 2), "VALID")
    y = y.reshape(y.shape[0], 400)
    y = jax.nn.relu(y @ p["fc1_w"].T + p["fc1_b"])
    y = jax.nn.relu(y @ p["fc2_w"].T + p["fc2_b"])
    return y @ p["fc3_w"].T + p["fc3_b"]


if __name__ == "__main__":
    key = jax.random.PRNGKey(0)
    k_param, k_input = jax.random.split(key)
    params = init_params(k_param)
    prep = prepare_params(params)
    # LeNet-5 (CIFAR variant) needs 3x32x32 input to hit 16*5*5 = 400 features.
    x = jax.random.normal(k_input, (2, 3, 32, 32), jnp.float32)

    out = jax.jit(lenet5_forward)(prep, x)
    out = jax.block_until_ready(out)
    assert out.shape == (2, 10) and out.dtype == jnp.float32

    ref = reference_forward(params, x)
    err = float(jnp.max(jnp.abs(out - ref)))
    assert bool(jnp.all(jnp.isfinite(out))), "non-finite output"
    assert err < 5e-2, f"mismatch vs f32 reference: max abs err = {err}"
    print("KERNEL_OK")
</pallas_src>

<mosaic_0001>
module attributes {stable_mosaic.version = 11 : i64} {
  func.func @_conv1_kernel(%arg0: i32, %arg1: memref<1x896x128xbf16, #tpu.memory_space<vmem>>, %arg2: memref<128x128xbf16, #tpu.memory_space<vmem>>, %arg3: memref<1x128xf32, #tpu.memory_space<vmem>>, %arg4: memref<1x224x128xbf16, #tpu.memory_space<vmem>>) attributes {dimension_semantics = [#tpu.dimension_semantics<parallel>], iteration_bounds = array<i64: 2>, scalar_prefetch = 0 : i64, scratch_operands = 0 : i64, tpu.core_type = #tpu.core_type<tc>, window_params = [{transform_indices = @transform_0, window_bounds = array<i64: 1, 896, 128>}, {pipeline_mode = #tpu.pipeline_mode<synchronous>, transform_indices = @transform_1, window_bounds = array<i64: 128, 128>}, {pipeline_mode = #tpu.pipeline_mode<synchronous>, transform_indices = @transform_2, window_bounds = array<i64: 1, 128>}, {transform_indices = @transform_3, window_bounds = array<i64: 1, 224, 128>}]} {
    %c0 = arith.constant 0 : index
    %c0_0 = arith.constant 0 : index
    %c0_1 = arith.constant 0 : index
    %0 = vector.load %arg1[%c0, %c0_0, %c0_1] : memref<1x896x128xbf16, #tpu.memory_space<vmem>>, vector<1x896x128xbf16>
    %1 = vector.shape_cast %0 : vector<1x896x128xbf16> to vector<896x128xbf16>
    %c0_2 = arith.constant 0 : index
    %c0_3 = arith.constant 0 : index
    %2 = vector.load %arg2[%c0_2, %c0_3] : memref<128x128xbf16, #tpu.memory_space<vmem>>, vector<128x128xbf16>
    %cst = arith.constant dense<0.000000e+00> : vector<896x128xf32>
    %3 = tpu.matmul %1, %2, %cst {dimension_numbers = #tpu.dot_dimension_numbers<[1], [0], [0], [1], [0, 0, 1, 1], [], []>} : vector<896x128xbf16>, vector<128x128xbf16>, vector<896x128xf32> -> vector<896x128xf32>
    %4 = vector.extract_strided_slice %3 {offsets = [0, 0], sizes = [224, 128], strides = [1, 1]} : vector<896x128xf32> to vector<224x128xf32>
    %5 = vector.extract_strided_slice %3 {offsets = [224, 0], sizes = [224, 128], strides = [1, 1]} : vector<896x128xf32> to vector<224x128xf32>
    %6 = arith.maximumf %4, %5 : vector<224x128xf32>
    %7 = vector.extract_strided_slice %3 {offsets = [448, 0], sizes = [224, 128], strides = [1, 1]} : vector<896x128xf32> to vector<224x128xf32>
    %8 = vector.extract_strided_slice %3 {offsets = [672, 0], sizes = [224, 128], strides = [1, 1]} : vector<896x128xf32> to vector<224x128xf32>
    %9 = arith.maximumf %7, %8 : vector<224x128xf32>
    %10 = arith.maximumf %6, %9 : vector<224x128xf32>
    %c0_4 = arith.constant 0 : index
    %c0_5 = arith.constant 0 : index
    %11 = vector.load %arg3[%c0_4, %c0_5] : memref<1x128xf32, #tpu.memory_space<vmem>>, vector<1x128xf32>
    %12 = vector.broadcast %11 : vector<1x128xf32> to vector<224x128xf32>
    %13 = arith.addf %10, %12 : vector<224x128xf32>
    %cst_6 = arith.constant 0.000000e+00 : f32
    %14 = vector.broadcast %cst_6 : f32 to vector<224x128xf32>
    %15 = arith.maximumf %13, %14 : vector<224x128xf32>
    %16 = arith.truncf %15 : vector<224x128xf32> to vector<224x128xbf16>
    %c0_7 = arith.constant 0 : index
    %c0_8 = arith.constant 0 : index
    %c0_9 = arith.constant 0 : index
    %17 = vector.load %arg4[%c0_7, %c0_8, %c0_9] : memref<1x224x128xbf16, #tpu.memory_space<vmem>>, vector<1x224x128xbf16>
    %18 = vector.shape_cast %17 : vector<1x224x128xbf16> to vector<224x128xbf16>
    %19 = vector.shape_cast %16 : vector<224x128xbf16> to vector<1x224x128xbf16>
    tpu.vector_store %arg4[%c0_7, %c0_8, %c0_9], %19 {strides = array<i32>} : memref<1x224x128xbf16, #tpu.memory_space<vmem>>, vector<1x224x128xbf16>,
    return
  }
  func.func @transform_0(%arg0: i32) -> (i32, i32, i32) {
    %c0_i32 = arith.constant 0 : i32
    %c0_i32_0 = arith.constant 0 : i32
    %c0_i32_1 = arith.constant 0 : i32
    return %arg0, %c0_i32, %c0_i32_0 : i32, i32, i32
  }
  func.func @transform_1(%arg0: i32) -> (i32, i32) {
    %c0_i32 = arith.constant 0 : i32
    %c0_i32_0 = arith.constant 0 : i32
    %c0_i32_1 = arith.constant 0 : i32
    return %c0_i32, %c0_i32_0 : i32, i32
  }
  func.func @transform_2(%arg0: i32) -> (i32, i32) {
    %c0_i32 = arith.constant 0 : i32
    %c0_i32_0 = arith.constant 0 : i32
    %c0_i32_1 = arith.constant 0 : i32
    return %c0_i32, %c0_i32_0 : i32, i32
  }
  func.func @transform_3(%arg0: i32) -> (i32, i32, i32) {
    %c0_i32 = arith.constant 0 : i32
    %c0_i32_0 = arith.constant 0 : i32
    %c0_i32_1 = arith.constant 0 : i32
    return %arg0, %c0_i32, %c0_i32_0 : i32, i32, i32
  }
}

module attributes {stable_mosaic.version = 11 : i64} {
  func.func @_conv2_fc_kernel(%arg0: i32, %arg1: memref<1x128x3200xbf16, #tpu.memory_space<vmem>>, %arg2: memref<3200x128xbf16, #tpu.memory_space<vmem>>, %arg3: memref<1x128xf32, #tpu.memory_space<vmem>>, %arg4: memref<25x128x128xbf16, #tpu.memory_space<vmem>>, %arg5: memref<1x128xf32, #tpu.memory_space<vmem>>, %arg6: memref<128x128xbf16, #tpu.memory_space<vmem>>, %arg7: memref<1x128xf32, #tpu.memory_space<vmem>>, %arg8: memref<128x128xbf16, #tpu.memory_space<vmem>>, %arg9: memref<1x128xf32, #tpu.memory_space<vmem>>, %arg10: memref<1x1x128xf32, #tpu.memory_space<vmem>>) attributes {dimension_semantics = [#tpu.dimension_semantics<parallel>], iteration_bounds = array<i64: 2>, scalar_prefetch = 0 : i64, scratch_operands = 0 : i64, tpu.core_type = #tpu.core_type<tc>, window_params = [{transform_indices = @transform_0, window_bounds = array<i64: 1, 128, 3200>}, {pipeline_mode = #tpu.pipeline_mode<synchronous>, transform_indices = @transform_1, window_bounds = array<i64: 3200, 128>}, {pipeline_mode = #tpu.pipeline_mode<synchronous>, transform_indices = @transform_2, window_bounds = array<i64: 1, 128>}, {pipeline_mode = #tpu.pipeline_mode<synchronous>, transform_indices = @transform_3, window_bounds = array<i64: 25, 128, 128>}, {pipeline_mode = #tpu.pipeline_mode<synchronous>, transform_indices = @transform_4, window_bounds = array<i64: 1, 128>}, {pipeline_mode = #tpu.pipeline_mode<synchronous>, transform_indices = @transform_5, window_bounds = array<i64: 128, 128>}, {pipeline_mode = #tpu.pipeline_mode<synchronous>, transform_indices = @transform_6, window_bounds = array<i64: 1, 128>}, {pipeline_mode = #tpu.pipeline_mode<synchronous>, transform_indices = @transform_7, window_bounds = array<i64: 128, 128>}, {pipeline_mode = #tpu.pipeline_mode<synchronous>, transform_indices = @transform_8, window_bounds = array<i64: 1, 128>}, {transform_indices = @transform_9, window_bounds = array<i64: 1, 1, 128>}]} {
    %c0 = arith.constant 0 : index
    %c0_0 = arith.constant 0 : index
    %c0_1 = arith.constant 0 : index
    %0 = vector.load %arg1[%c0, %c0_0, %c0_1] : memref<1x128x3200xbf16, #tpu.memory_space<vmem>>, vector<1x128x3200xbf16>
    %1 = vector.shape_cast %0 : vector<1x128x3200xbf16> to vector<128x3200xbf16>
    %c0_2 = arith.constant 0 : index
    %c0_3 = arith.constant 0 : index
    %2 = vector.load %arg2[%c0_2, %c0_3] : memref<3200x128xbf16, #tpu.memory_space<vmem>>, vector<3200x128xbf16>
    %cst = arith.constant dense<0.000000e+00> : vector<128x128xf32>
    %3 = tpu.matmul %1, %2, %cst {dimension_numbers = #tpu.dot_dimension_numbers<[1], [0], [0], [1], [0, 0, 1, 1], [], []>} : vector<128x3200xbf16>, vector<3200x128xbf16>, vector<128x128xf32> -> vector<128x128xf32>
    %4 = vector.extract_strided_slice %3 {offsets = [0, 0], sizes = [32, 128], strides = [1, 1]} : vector<128x128xf32> to vector<32x128xf32>
    %5 = vector.extract_strided_slice %3 {offsets = [32, 0], sizes = [32, 128], strides = [1, 1]} : vector<128x128xf32> to vector<32x128xf32>
    %6 = arith.maximumf %4, %5 : vector<32x128xf32>
    %7 = vector.extract_strided_slice %3 {offsets = [64, 0], sizes = [32, 128], strides = [1, 1]} : vector<128x128xf32> to vector<32x128xf32>
    %8 = vector.extract_strided_slice %3 {offsets = [96, 0], sizes = [32, 128], strides = [1, 1]} : vector<128x128xf32> to vector<32x128xf32>
    %9 = arith.maximumf %7, %8 : vector<32x128xf32>
    %10 = arith.maximumf %6, %9 : vector<32x128xf32>
    %c0_4 = arith.constant 0 : index
    %c0_5 = arith.constant 0 : index
    %11 = vector.load %arg3[%c0_4, %c0_5] : memref<1x128xf32, #tpu.memory_space<vmem>>, vector<1x128xf32>
    %12 = vector.broadcast %11 : vector<1x128xf32> to vector<32x128xf32>
    %13 = arith.addf %10, %12 : vector<32x128xf32>
    %cst_6 = arith.constant 0.000000e+00 : f32
    %14 = vector.broadcast %cst_6 : f32 to vector<32x128xf32>
    %15 = arith.maximumf %13, %14 : vector<32x128xf32>
    %c0_7 = arith.constant 0 : index
    %c0_8 = arith.constant 0 : index
    %16 = vector.load %arg5[%c0_7, %c0_8] : memref<1x128xf32, #tpu.memory_space<vmem>>, vector<1x128xf32>
    %17 = vector.extract_strided_slice %15 {offsets = [0, 0], sizes = [1, 128], strides = [1, 1]} : vector<32x128xf32> to vector<1x128xf32>
    %18 = arith.truncf %17 : vector<1x128xf32> to vector<1x128xbf16>
    %c0_9 = arith.constant 0 : index
    %c0_10 = arith.constant 0 : index
    %c0_11 = arith.constant 0 : index
    %19 = vector.load %arg4[%c0_9, %c0_10, %c0_11] : memref<25x128x128xbf16, #tpu.memory_space<vmem>>, vector<1x128x128xbf16>
    %20 = vector.shape_cast %19 : vector<1x128x128xbf16> to vector<128x128xbf16>
    %cst_12 = arith.constant dense<0.000000e+00> : vector<1x128xf32>
    %21 = tpu.matmul %18, %20, %cst_12 {dimension_numbers = #tpu.dot_dimension_numbers<[1], [0], [0], [1], [0, 0, 1, 1], [], []>} : vector<1x128xbf16>, vector<128x128xbf16>, vector<1x128xf32> -> vector<1x128xf32>
    %22 = arith.addf %16, %21 : vector<1x128xf32>
    %23 = vector.extract_strided_slice %15 {offsets = [1, 0], sizes = [1, 128], strides = [1, 1]} : vector<32x128xf32> to vector<1x128xf32>
    %24 = arith.truncf %23 : vector<1x128xf32> to vector<1x128xbf16>
    %c1 = arith.constant 1 : index
    %c0_13 = arith.constant 0 : index
    %c0_14 = arith.constant 0 : index
    %25 = vector.load %arg4[%c1, %c0_13, %c0_14] : memref<25x128x128xbf16, #tpu.memory_space<vmem>>, vector<1x128x128xbf16>
    %26 = vector.shape_cast %25 : vector<1x128x128xbf16> to vector<128x128xbf16>
    %cst_15 = arith.constant dense<0.000000e+00> : vector<1x128xf32>
    %27 = tpu.matmul %24, %26, %cst_15 {dimension_numbers = #tpu.dot_dimension_numbers<[1], [0], [0], [1], [0, 0, 1, 1], [], []>} : vector<1x128xbf16>, vector<128x128xbf16>, vector<1x128xf32> -> vector<1x128xf32>
    %28 = arith.addf %22, %27 : vector<1x128xf32>
    %29 = vector.extract_strided_slice %15 {offsets = [2, 0], sizes = [1, 128], strides = [1, 1]} : vector<32x128xf32> to vector<1x128xf32>
    %30 = arith.truncf %29 : vector<1x128xf32> to vector<1x128xbf16>
    %c2 = arith.constant 2 : index
    %c0_16 = arith.constant 0 : index
    %c0_17 = arith.constant 0 : index
    %31 = vector.load %arg4[%c2, %c0_16, %c0_17] : memref<25x128x128xbf16, #tpu.memory_space<vmem>>, vector<1x128x128xbf16>
    %32 = vector.shape_cast %31 : vector<1x128x128xbf16> to vector<128x128xbf16>
    %cst_18 = arith.constant dense<0.000000e+00> : vector<1x128xf32>
    %33 = tpu.matmul %30, %32, %cst_18 {dimension_numbers = #tpu.dot_dimension_numbers<[1], [0], [0], [1], [0, 0, 1, 1], [], []>} : vector<1x128xbf16>, vector<128x128xbf16>, vector<1x128xf32> -> vector<1x128xf32>
    %34 = arith.addf %28, %33 : vector<1x128xf32>
    %35 = vector.extract_strided_slice %15 {offsets = [3, 0], sizes = [1, 128], strides = [1, 1]} : vector<32x128xf32> to vector<1x128xf32>
    %36 = arith.truncf %35 : vector<1x128xf32> to vector<1x128xbf16>
    %c3 = arith.constant 3 : index
    %c0_19 = arith.constant 0 : index
    %c0_20 = arith.constant 0 : index
    %37 = vector.load %arg4[%c3, %c0_19, %c0_20] : memref<25x128x128xbf16, #tpu.memory_space<vmem>>, vector<1x128x128xbf16>
    %38 = vector.shape_cast %37 : vector<1x128x128xbf16> to vector<128x128xbf16>
    %cst_21 = arith.constant dense<0.000000e+00> : vector<1x128xf32>
    %39 = tpu.matmul %36, %38, %cst_21 {dimension_numbers = #tpu.dot_dimension_numbers<[1], [0], [0], [1], [0, 0, 1, 1], [], []>} : vector<1x128xbf16>, vector<128x128xbf16>, vector<1x128xf32> -> vector<1x128xf32>
    %40 = arith.addf %34, %39 : vector<1x128xf32>
    %41 = vector.extract_strided_slice %15 {offsets = [4, 0], sizes = [1, 128], strides = [1, 1]} : vector<32x128xf32> to vector<1x128xf32>
    %42 = arith.truncf %41 : vector<1x128xf32> to vector<1x128xbf16>
    %c4 = arith.constant 4 : index
    %c0_22 = arith.constant 0 : index
    %c0_23 = arith.constant 0 : index
    %43 = vector.load %arg4[%c4, %c0_22, %c0_23] : memref<25x128x128xbf16, #tpu.memory_space<vmem>>, vector<1x128x128xbf16>
    %44 = vector.shape_cast %43 : vector<1x128x128xbf16> to vector<128x128xbf16>
    %cst_24 = arith.constant dense<0.000000e+00> : vector<1x128xf32>
    %45 = tpu.matmul %42, %44, %cst_24 {dimension_numbers = #tpu.dot_dimension_numbers<[1], [0], [0], [1], [0, 0, 1, 1], [], []>} : vector<1x128xbf16>, vector<128x128xbf16>, vector<1x128xf32> -> vector<1x128xf32>
    %46 = arith.addf %40, %45 : vector<1x128xf32>
    %47 = vector.extract_strided_slice %15 {offsets = [5, 0], sizes = [1, 128], strides = [1, 1]} : vector<32x128xf32> to vector<1x128xf32>
    %48 = arith.truncf %47 : vector<1x128xf32> to vector<1x128xbf16>
    %c5 = arith.constant 5 : index
    %c0_25 = arith.constant 0 : index
    %c0_26 = arith.constant 0 : index
    %49 = vector.load %arg4[%c5, %c0_25, %c0_26] : memref<25x128x128xbf16, #tpu.memory_space<vmem>>, vector<1x128x128xbf16>
    %50 = vector.shape_cast %49 : vector<1x128x128xbf16> to vector<128x128xbf16>
    %cst_27 = arith.constant dense<0.000000e+00> : vector<1x128xf32>
    %51 = tpu.matmul %48, %50, %cst_27 {dimension_numbers = #tpu.dot_dimension_numbers<[1], [0], [0], [1], [0, 0, 1, 1], [], []>} : vector<1x128xbf16>, vector<128x128xbf16>, vector<1x128xf32> -> vector<1x128xf32>
    %52 = arith.addf %46, %51 : vector<1x128xf32>
    %53 = vector.extract_strided_slice %15 {offsets = [6, 0], sizes = [1, 128], strides = [1, 1]} : vector<32x128xf32> to vector<1x128xf32>
    %54 = arith.truncf %53 : vector<1x128xf32> to vector<1x128xbf16>
    %c6 = arith.constant 6 : index
    %c0_28 = arith.constant 0 : index
    %c0_29 = arith.constant 0 : index
    %55 = vector.load %arg4[%c6, %c0_28, %c0_29] : memref<25x128x128xbf16, #tpu.memory_space<vmem>>, vector<1x128x128xbf16>
    %56 = vector.shape_cast %55 : vector<1x128x128xbf16> to vector<128x128xbf16>
    %cst_30 = arith.constant dense<0.000000e+00> : vector<1x128xf32>
    %57 = tpu.matmul %54, %56, %cst_30 {dimension_numbers = #tpu.dot_dimension_numbers<[1], [0], [0], [1], [0, 0, 1, 1], [], []>} : vector<1x128xbf16>, vector<128x128xbf16>, vector<1x128xf32> -> vector<1x128xf32>
    %58 = arith.addf %52, %57 : vector<1x128xf32>
    %59 = vector.extract_strided_slice %15 {offsets = [7, 0], sizes = [1, 128], strides = [1, 1]} : vector<32x128xf32> to vector<1x128xf32>
    %60 = arith.truncf %59 : vector<1x128xf32> to vector<1x128xbf16>
    %c7 = arith.constant 7 : index
    %c0_31 = arith.constant 0 : index
    %c0_32 = arith.constant 0 : index
    %61 = vector.load %arg4[%c7, %c0_31, %c0_32] : memref<25x128x128xbf16, #tpu.memory_space<vmem>>, vector<1x128x128xbf16>
    %62 = vector.shape_cast %61 : vector<1x128x128xbf16> to vector<128x128xbf16>
    %cst_33 = arith.constant dense<0.000000e+00> : vector<1x128xf32>
    %63 = tpu.matmul %60, %62, %cst_33 {dimension_numbers = #tpu.dot_dimension_numbers<[1], [0], [0], [1], [0, 0, 1, 1], [], []>} : vector<1x128xbf16>, vector<128x128xbf16>, vector<1x128xf32> -> vector<1x128xf32>
    %64 = arith.addf %58, %63 : vector<1x128xf32>
    %65 = vector.extract_strided_slice %15 {offsets = [8, 0], sizes = [1, 128], strides = [1, 1]} : vector<32x128xf32> to vector<1x128xf32>
    %66 = arith.truncf %65 : vector<1x128xf32> to vector<1x128xbf16>
    %c8 = arith.constant 8 : index
    %c0_34 = arith.constant 0 : index
    %c0_35 = arith.constant 0 : index
    %67 = vector.load %arg4[%c8, %c0_34, %c0_35] : memref<25x128x128xbf16, #tpu.memory_space<vmem>>, vector<1x128x128xbf16>
    %68 = vector.shape_cast %67 : vector<1x128x128xbf16> to vector<128x128xbf16>
    %cst_36 = arith.constant dense<0.000000e+00> : vector<1x128xf32>
    %69 = tpu.matmul %66, %68, %cst_36 {dimension_numbers = #tpu.dot_dimension_numbers<[1], [0], [0], [1], [0, 0, 1, 1], [], []>} : vector<1x128xbf16>, vector<128x128xbf16>, vector<1x128xf32> -> vector<1x128xf32>
    %70 = arith.addf %64, %69 : vector<1x128xf32>
    %71 = vector.extract_strided_slice %15 {offsets = [9, 0], sizes = [1, 128], strides = [1, 1]} : vector<32x128xf32> to vector<1x128xf32>
    %72 = arith.truncf %71 : vector<1x128xf32> to vector<1x128xbf16>
    %c9 = arith.constant 9 : index
    %c0_37 = arith.constant 0 : index
    %c0_38 = arith.constant 0 : index
    %73 = vector.load %arg4[%c9, %c0_37, %c0_38] : memref<25x128x128xbf16, #tpu.memory_space<vmem>>, vector<1x128x128xbf16>
    %74 = vector.shape_cast %73 : vector<1x128x128xbf16> to vector<128x128xbf16>
    %cst_39 = arith.constant dense<0.000000e+00> : vector<1x128xf32>
    %75 = tpu.matmul %72, %74, %cst_39 {dimension_numbers = #tpu.dot_dimension_numbers<[1], [0], [0], [1], [0, 0, 1, 1], [], []>} : vector<1x128xbf16>, vector<128x128xbf16>, vector<1x128xf32> -> vector<1x128xf32>
    %76 = arith.addf %70, %75 : vector<1x128xf32>
    %77 = vector.extract_strided_slice %15 {offsets = [10, 0], sizes = [1, 128], strides = [1, 1]} : vector<32x128xf32> to vector<1x128xf32>
    %78 = arith.truncf %77 : vector<1x128xf32> to vector<1x128xbf16>
    %c10 = arith.constant 10 : index
    %c0_40 = arith.constant 0 : index
    %c0_41 = arith.constant 0 : index
    %79 = vector.load %arg4[%c10, %c0_40, %c0_41] : memref<25x128x128xbf16, #tpu.memory_space<vmem>>, vector<1x128x128xbf16>
    %80 = vector.shape_cast %79 : vector<1x128x128xbf16> to vector<128x128xbf16>
    %cst_42 = arith.constant dense<0.000000e+00> : vector<1x128xf32>
    %81 = tpu.matmul %78, %80, %cst_42 {dimension_numbers = #tpu.dot_dimension_numbers<[1], [0], [0], [1], [0, 0, 1, 1], [], []>} : vector<1x128xbf16>, vector<128x128xbf16>, vector<1x128xf32> -> vector<1x128xf32>
    %82 = arith.addf %76, %81 : vector<1x128xf32>
    %83 = vector.extract_strided_slice %15 {offsets = [11, 0], sizes = [1, 128], strides = [1, 1]} : vector<32x128xf32> to vector<1x128xf32>
    %84 = arith.truncf %83 : vector<1x128xf32> to vector<1x128xbf16>
    %c11 = arith.constant 11 : index
    %c0_43 = arith.constant 0 : index
    %c0_44 = arith.constant 0 : index
    %85 = vector.load %arg4[%c11, %c0_43, %c0_44] : memref<25x128x128xbf16, #tpu.memory_space<vmem>>, vector<1x128x128xbf16>
    %86 = vector.shape_cast %85 : vector<1x128x128xbf16> to vector<128x128xbf16>
    %cst_45 = arith.constant dense<0.000000e+00> : vector<1x128xf32>
    %87 = tpu.matmul %84, %86, %cst_45 {dimension_numbers = #tpu.dot_dimension_numbers<[1], [0], [0], [1], [0, 0, 1, 1], [], []>} : vector<1x128xbf16>, vector<128x128xbf16>, vector<1x128xf32> -> vector<1x128xf32>
    %88 = arith.addf %82, %87 : vector<1x128xf32>
    %89 = vector.extract_strided_slice %15 {offsets = [12, 0], sizes = [1, 128], strides = [1, 1]} : vector<32x128xf32> to vector<1x128xf32>
    %90 = arith.truncf %89 : vector<1x128xf32> to vector<1x128xbf16>
    %c12 = arith.constant 12 : index
    %c0_46 = arith.constant 0 : index
    %c0_47 = arith.constant 0 : index
    %91 = vector.load %arg4[%c12, %c0_46, %c0_47] : memref<25x128x128xbf16, #tpu.memory_space<vmem>>, vector<1x128x128xbf16>
    %92 = vector.shape_cast %91 : vector<1x128x128xbf16> to vector<128x128xbf16>
    %cst_48 = arith.constant dense<0.000000e+00> : vector<1x128xf32>
    %93 = tpu.matmul %90, %92, %cst_48 {dimension_numbers = #tpu.dot_dimension_numbers<[1], [0], [0], [1], [0, 0, 1, 1], [], []>} : vector<1x128xbf16>, vector<128x128xbf16>, vector<1x128xf32> -> vector<1x128xf32>
    %94 = arith.addf %88, %93 : vector<1x128xf32>
    %95 = vector.extract_strided_slice %15 {offsets = [13, 0], sizes = [1, 128], strides = [1, 1]} : vector<32x128xf32> to vector<1x128xf32>
    %96 = arith.truncf %95 : vector<1x128xf32> to vector<1x128xbf16>
    %c13 = arith.constant 13 : index
    %c0_49 = arith.constant 0 : index
    %c0_50 = arith.constant 0 : index
    %97 = vector.load %arg4[%c13, %c0_49, %c0_50] : memref<25x128x128xbf16, #tpu.memory_space<vmem>>, vector<1x128x128xbf16>
    %98 = vector.shape_cast %97 : vector<1x128x128xbf16> to vector<128x128xbf16>
    %cst_51 = arith.constant dense<0.000000e+00> : vector<1x128xf32>
    %99 = tpu.matmul %96, %98, %cst_51 {dimension_numbers = #tpu.dot_dimension_numbers<[1], [0], [0], [1], [0, 0, 1, 1], [], []>} : vector<1x128xbf16>, vector<128x128xbf16>, vector<1x128xf32> -> vector<1x128xf32>
    %100 = arith.addf %94, %99 : vector<1x128xf32>
    %101 = vector.extract_strided_slice %15 {offsets = [14, 0], sizes = [1, 128], strides = [1, 1]} : vector<32x128xf32> to vector<1x128xf32>
    %102 = arith.truncf %101 : vector<1x128xf32> to vector<1x128xbf16>
    %c14 = arith.constant 14 : index
    %c0_52 = arith.constant 0 : index
    %c0_53 = arith.constant 0 : index
    %103 = vector.load %arg4[%c14, %c0_52, %c0_53] : memref<25x128x128xbf16, #tpu.memory_space<vmem>>, vector<1x128x128xbf16>
    %104 = vector.shape_cast %103 : vector<1x128x128xbf16> to vector<128x128xbf16>
    %cst_54 = arith.constant dense<0.000000e+00> : vector<1x128xf32>
    %105 = tpu.matmul %102, %104, %cst_54 {dimension_numbers = #tpu.dot_dimension_numbers<[1], [0], [0], [1], [0, 0, 1, 1], [], []>} : vector<1x128xbf16>, vector<128x128xbf16>, vector<1x128xf32> -> vector<1x128xf32>
    %106 = arith.addf %100, %105 : vector<1x128xf32>
    %107 = vector.extract_strided_slice %15 {offsets = [15, 0], sizes = [1, 128], strides = [1, 1]} : vector<32x128xf32> to vector<1x128xf32>
    %108 = arith.truncf %107 : vector<1x128xf32> to vector<1x128xbf16>
    %c15 = arith.constant 15 : index
    %c0_55 = arith.constant 0 : index
    %c0_56 = arith.constant 0 : index
    %109 = vector.load %arg4[%c15, %c0_55, %c0_56] : memref<25x128x128xbf16, #tpu.memory_space<vmem>>, vector<1x128x128xbf16>
    %110 = vector.shape_cast %109 : vector<1x128x128xbf16> to vector<128x128xbf16>
    %cst_57 = arith.constant dense<0.000000e+00> : vector<1x128xf32>
    %111 = tpu.matmul %108, %110, %cst_57 {dimension_numbers = #tpu.dot_dimension_numbers<[1], [0], [0], [1], [0, 0, 1, 1], [], []>} : vector<1x128xbf16>, vector<128x128xbf16>, vector<1x128xf32> -> vector<1x128xf32>
    %112 = arith.addf %106, %111 : vector<1x128xf32>
    %113 = vector.extract_strided_slice %15 {offsets = [16, 0], sizes = [1, 128], strides = [1, 1]} : vector<32x128xf32> to vector<1x128xf32>
    %114 = arith.truncf %113 : vector<1x128xf32> to vector<1x128xbf16>
    %c16 = arith.constant 16 : index
    %c0_58 = arith.constant 0 : index
    %c0_59 = arith.constant 0 : index
    %115 = vector.load %arg4[%c16, %c0_58, %c0_59] : memref<25x128x128xbf16, #tpu.memory_space<vmem>>, vector<1x128x128xbf16>
    %116 = vector.shape_cast %115 : vector<1x128x128xbf16> to vector<128x128xbf16>
    %cst_60 = arith.constant dense<0.000000e+00> : vector<1x128xf32>
    %117 = tpu.matmul %114, %116, %cst_60 {dimension_numbers = #tpu.dot_dimension_numbers<[1], [0], [0], [1], [0, 0, 1, 1], [], []>} : vector<1x128xbf16>, vector<128x128xbf16>, vector<1x128xf32> -> vector<1x128xf32>
    %118 = arith.addf %112, %117 : vector<1x128xf32>
    %119 = vector.extract_strided_slice %15 {offsets = [17, 0], sizes = [1, 128], strides = [1, 1]} : vector<32x128xf32> to vector<1x128xf32>
    %120 = arith.truncf %119 : vector<1x128xf32> to vector<1x128xbf16>
    %c17 = arith.constant 17 : index
    %c0_61 = arith.constant 0 : index
    %c0_62 = arith.constant 0 : index
    %121 = vector.load %arg4[%c17, %c0_61, %c0_62] : memref<25x128x128xbf16, #tpu.memory_space<vmem>>, vector<1x128x128xbf16>
    %122 = vector.shape_cast %121 : vector<1x128x128xbf16> to vector<128x128xbf16>
    %cst_63 = arith.constant dense<0.000000e+00> : vector<1x128xf32>
    %123 = tpu.matmul %120, %122, %cst_63 {dimension_numbers = #tpu.dot_dimension_numbers<[1], [0], [0], [1], [0, 0, 1, 1], [], []>} : vector<1x128xbf16>, vector<128x128xbf16>, vector<1x128xf32> -> vector<1x128xf32>
    %124 = arith.addf %118, %123 : vector<1x128xf32>
    %125 = vector.extract_strided_slice %15 {offsets = [18, 0], sizes = [1, 128], strides = [1, 1]} : vector<32x128xf32> to vector<1x128xf32>
    %126 = arith.truncf %125 : vector<1x128xf32> to vector<1x128xbf16>
    %c18 = arith.constant 18 : index
    %c0_64 = arith.constant 0 : index
    %c0_65 = arith.constant 0 : index
    %127 = vector.load %arg4[%c18, %c0_64, %c0_65] : memref<25x128x128xbf16, #tpu.memory_space<vmem>>, vector<1x128x128xbf16>
    %128 = vector.shape_cast %127 : vector<1x128x128xbf16> to vector<128x128xbf16>
    %cst_66 = arith.constant dense<0.000000e+00> : vector<1x128xf32>
    %129 = tpu.matmul %126, %128, %cst_66 {dimension_numbers = #tpu.dot_dimension_numbers<[1], [0], [0], [1], [0, 0, 1, 1], [], []>} : vector<1x128xbf16>, vector<128x128xbf16>, vector<1x128xf32> -> vector<1x128xf32>
    %130 = arith.addf %124, %129 : vector<1x128xf32>
    %131 = vector.extract_strided_slice %15 {offsets = [19, 0], sizes = [1, 128], strides = [1, 1]} : vector<32x128xf32> to vector<1x128xf32>
    %132 = arith.truncf %131 : vector<1x128xf32> to vector<1x128xbf16>
    %c19 = arith.constant 19 : index
    %c0_67 = arith.constant 0 : index
    %c0_68 = arith.constant 0 : index
    %133 = vector.load %arg4[%c19, %c0_67, %c0_68] : memref<25x128x128xbf16, #tpu.memory_space<vmem>>, vector<1x128x128xbf16>
    %134 = vector.shape_cast %133 : vector<1x128x128xbf16> to vector<128x128xbf16>
    %cst_69 = arith.constant dense<0.000000e+00> : vector<1x128xf32>
    %135 = tpu.matmul %132, %134, %cst_69 {dimension_numbers = #tpu.dot_dimension_numbers<[1], [0], [0], [1], [0, 0, 1, 1], [], []>} : vector<1x128xbf16>, vector<128x128xbf16>, vector<1x128xf32> -> vector<1x128xf32>
    %136 = arith.addf %130, %135 : vector<1x128xf32>
    %137 = vector.extract_strided_slice %15 {offsets = [20, 0], sizes = [1, 128], strides = [1, 1]} : vector<32x128xf32> to vector<1x128xf32>
    %138 = arith.truncf %137 : vector<1x128xf32> to vector<1x128xbf16>
    %c20 = arith.constant 20 : index
    %c0_70 = arith.constant 0 : index
    %c0_71 = arith.constant 0 : index
    %139 = vector.load %arg4[%c20, %c0_70, %c0_71] : memref<25x128x128xbf16, #tpu.memory_space<vmem>>, vector<1x128x128xbf16>
    %140 = vector.shape_cast %139 : vector<1x128x128xbf16> to vector<128x128xbf16>
    %cst_72 = arith.constant dense<0.000000e+00> : vector<1x128xf32>
    %141 = tpu.matmul %138, %140, %cst_72 {dimension_numbers = #tpu.dot_dimension_numbers<[1], [0], [0], [1], [0, 0, 1, 1], [], []>} : vector<1x128xbf16>, vector<128x128xbf16>, vector<1x128xf32> -> vector<1x128xf32>
    %142 = arith.addf %136, %141 : vector<1x128xf32>
    %143 = vector.extract_strided_slice %15 {offsets = [21, 0], sizes = [1, 128], strides = [1, 1]} : vector<32x128xf32> to vector<1x128xf32>
    %144 = arith.truncf %143 : vector<1x128xf32> to vector<1x128xbf16>
    %c21 = arith.constant 21 : index
    %c0_73 = arith.constant 0 : index
    %c0_74 = arith.constant 0 : index
    %145 = vector.load %arg4[%c21, %c0_73, %c0_74] : memref<25x128x128xbf16, #tpu.memory_space<vmem>>, vector<1x128x128xbf16>
    %146 = vector.shape_cast %145 : vector<1x128x128xbf16> to vector<128x128xbf16>
    %cst_75 = arith.constant dense<0.000000e+00> : vector<1x128xf32>
    %147 = tpu.matmul %144, %146, %cst_75 {dimension_numbers = #tpu.dot_dimension_numbers<[1], [0], [0], [1], [0, 0, 1, 1], [], []>} : vector<1x128xbf16>, vector<128x128xbf16>, vector<1x128xf32> -> vector<1x128xf32>
    %148 = arith.addf %142, %147 : vector<1x128xf32>
    %149 = vector.extract_strided_slice %15 {offsets = [22, 0], sizes = [1, 128], strides = [1, 1]} : vector<32x128xf32> to vector<1x128xf32>
    %150 = arith.truncf %149 : vector<1x128xf32> to vector<1x128xbf16>
    %c22 = arith.constant 22 : index
    %c0_76 = arith.constant 0 : index
    %c0_77 = arith.constant 0 : index
    %151 = vector.load %arg4[%c22, %c0_76, %c0_77] : memref<25x128x128xbf16, #tpu.memory_space<vmem>>, vector<1x128x128xbf16>
    %152 = vector.shape_cast %151 : vector<1x128x128xbf16> to vector<128x128xbf16>
    %cst_78 = arith.constant dense<0.000000e+00> : vector<1x128xf32>
    %153 = tpu.matmul %150, %152, %cst_78 {dimension_numbers = #tpu.dot_dimension_numbers<[1], [0], [0], [1], [0, 0, 1, 1], [], []>} : vector<1x128xbf16>, vector<128x128xbf16>, vector<1x128xf32> -> vector<1x128xf32>
    %154 = arith.addf %148, %153 : vector<1x128xf32>
    %155 = vector.extract_strided_slice %15 {offsets = [23, 0], sizes = [1, 128], strides = [1, 1]} : vector<32x128xf32> to vector<1x128xf32>
    %156 = arith.truncf %155 : vector<1x128xf32> to vector<1x128xbf16>
    %c23 = arith.constant 23 : index
    %c0_79 = arith.constant 0 : index
    %c0_80 = arith.constant 0 : index
    %157 = vector.load %arg4[%c23, %c0_79, %c0_80] : memref<25x128x128xbf16, #tpu.memory_space<vmem>>, vector<1x128x128xbf16>
    %158 = vector.shape_cast %157 : vector<1x128x128xbf16> to vector<128x128xbf16>
    %cst_81 = arith.constant dense<0.000000e+00> : vector<1x128xf32>
    %159 = tpu.matmul %156, %158, %cst_81 {dimension_numbers = #tpu.dot_dimension_numbers<[1], [0], [0], [1], [0, 0, 1, 1], [], []>} : vector<1x128xbf16>, vector<128x128xbf16>, vector<1x128xf32> -> vector<1x128xf32>
    %160 = arith.addf %154, %159 : vector<1x128xf32>
    %161 = vector.extract_strided_slice %15 {offsets = [24, 0], sizes = [1, 128], strides = [1, 1]} : vector<32x128xf32> to vector<1x128xf32>
    %162 = arith.truncf %161 : vector<1x128xf32> to vector<1x128xbf16>
    %c24 = arith.constant 24 : index
    %c0_82 = arith.constant 0 : index
    %c0_83 = arith.constant 0 : index
    %163 = vector.load %arg4[%c24, %c0_82, %c0_83] : memref<25x128x128xbf16, #tpu.memory_space<vmem>>, vector<1x128x128xbf16>
    %164 = vector.shape_cast %163 : vector<1x128x128xbf16> to vector<128x128xbf16>
    %cst_84 = arith.constant dense<0.000000e+00> : vector<1x128xf32>
    %165 = tpu.matmul %162, %164, %cst_84 {dimension_numbers = #tpu.dot_dimension_numbers<[1], [0], [0], [1], [0, 0, 1, 1], [], []>} : vector<1x128xbf16>, vector<128x128xbf16>, vector<1x128xf32> -> vector<1x128xf32>
    %166 = arith.addf %160, %165 : vector<1x128xf32>
    %cst_85 = arith.constant 0.000000e+00 : f32
    %167 = vector.broadcast %cst_85 : f32 to vector<1x128xf32>
    %168 = arith.maximumf %166, %167 : vector<1x128xf32>
    %169 = arith.truncf %168 : vector<1x128xf32> to vector<1x128xbf16>
    %c0_86 = arith.constant 0 : index
    %c0_87 = arith.constant 0 : index
    %170 = vector.load %arg6[%c0_86, %c0_87] : memref<128x128xbf16, #tpu.memory_space<vmem>>, vector<128x128xbf16>
    %cst_88 = arith.constant dense<0.000000e+00> : vector<1x128xf32>
    %171 = tpu.matmul %169, %170, %cst_88 {dimension_numbers = #tpu.dot_dimension_numbers<[1], [0], [0], [1], [0, 0, 1, 1], [], []>} : vector<1x128xbf16>, vector<128x128xbf16>, vector<1x128xf32> -> vector<1x128xf32>
    %c0_89 = arith.constant 0 : index
    %c0_90 = arith.constant 0 : index
    %172 = vector.load %arg7[%c0_89, %c0_90] : memref<1x128xf32, #tpu.memory_space<vmem>>, vector<1x128xf32>
    %173 = arith.addf %171, %172 : vector<1x128xf32>
    %cst_91 = arith.constant 0.000000e+00 : f32
    %174 = vector.broadcast %cst_91 : f32 to vector<1x128xf32>
    %175 = arith.maximumf %173, %174 : vector<1x128xf32>
    %176 = arith.truncf %175 : vector<1x128xf32> to vector<1x128xbf16>
    %c0_92 = arith.constant 0 : index
    %c0_93 = arith.constant 0 : index
    %177 = vector.load %arg8[%c0_92, %c0_93] : memref<128x128xbf16, #tpu.memory_space<vmem>>, vector<128x128xbf16>
    %cst_94 = arith.constant dense<0.000000e+00> : vector<1x128xf32>
    %178 = tpu.matmul %176, %177, %cst_94 {dimension_numbers = #tpu.dot_dimension_numbers<[1], [0], [0], [1], [0, 0, 1, 1], [], []>} : vector<1x128xbf16>, vector<128x128xbf16>, vector<1x128xf32> -> vector<1x128xf32>
    %c0_95 = arith.constant 0 : index
    %c0_96 = arith.constant 0 : index
    %179 = vector.load %arg9[%c0_95, %c0_96] : memref<1x128xf32, #tpu.memory_space<vmem>>, vector<1x128xf32>
    %180 = arith.addf %178, %179 : vector<1x128xf32>
    %c0_97 = arith.constant 0 : index
    %c0_98 = arith.constant 0 : index
    %c0_99 = arith.constant 0 : index
    %181 = vector.load %arg10[%c0_97, %c0_98, %c0_99] : memref<1x1x128xf32, #tpu.memory_space<vmem>>, vector<1x1x128xf32>
    %182 = vector.shape_cast %181 : vector<1x1x128xf32> to vector<1x128xf32>
    %183 = vector.shape_cast %180 : vector<1x128xf32> to vector<1x1x128xf32>
    tpu.vector_store %arg10[%c0_97, %c0_98, %c0_99], %183 {strides = array<i32>} : memref<1x1x128xf32, #tpu.memory_space<vmem>>, vector<1x1x128xf32>,
    return
  }
  func.func @transform_0(%arg0: i32) -> (i32, i32, i32) {
    %c0_i32 = arith.constant 0 : i32
    %c0_i32_0 = arith.constant 0 : i32
    %c0_i32_1 = arith.constant 0 : i32
    return %arg0, %c0_i32, %c0_i32_0 : i32, i32, i32
  }
  func.func @transform_1(%arg0: i32) -> (i32, i32) {
    %c0_i32 = arith.constant 0 : i32
    %c0_i32_0 = arith.constant 0 : i32
    %c0_i32_1 = arith.constant 0 : i32
    return %c0_i32, %c0_i32_0 : i32, i32
  }
  func.func @transform_2(%arg0: i32) -> (i32, i32) {
    %c0_i32 = arith.constant 0 : i32
    %c0_i32_0 = arith.constant 0 : i32
    %c0_i32_1 = arith.constant 0 : i32
    return %c0_i32, %c0_i32_0 : i32, i32
  }
  func.func @transform_3(%arg0: i32) -> (i32, i32, i32) {
    %c0_i32 = arith.constant 0 : i32
    %c0_i32_0 = arith.constant 0 : i32
    %c0_i32_1 = arith.constant 0 : i32
    %c0_i32_2 = arith.constant 0 : i32
    return %c0_i32, %c0_i32_0, %c0_i32_1 : i32, i32, i32
  }
  func.func @transform_4(%arg0: i32) -> (i32, i32) {
    %c0_i32 = arith.constant 0 : i32
    %c0_i32_0 = arith.constant 0 : i32
    %c0_i32_1 = arith.constant 0 : i32
    return %c0_i32, %c0_i32_0 : i32, i32
  }
  func.func @transform_5(%arg0: i32) -> (i32, i32) {
    %c0_i32 = arith.constant 0 : i32
    %c0_i32_0 = arith.constant 0 : i32
    %c0_i32_1 = arith.constant 0 : i32
    return %c0_i32, %c0_i32_0 : i32, i32
  }
  func.func @transform_6(%arg0: i32) -> (i32, i32) {
    %c0_i32 = arith.constant 0 : i32
    %c0_i32_0 = arith.constant 0 : i32
    %c0_i32_1 = arith.constant 0 : i32
    return %c0_i32, %c0_i32_0 : i32, i32
  }
  func.func @transform_7(%arg0: i32) -> (i32, i32) {
    %c0_i32 = arith.constant 0 : i32
    %c0_i32_0 = arith.constant 0 : i32
    %c0_i32_1 = arith.constant 0 : i32
    return %c0_i32, %c0_i32_0 : i32, i32
  }
  func.func @transform_8(%arg0: i32) -> (i32, i32) {
    %c0_i32 = arith.constant 0 : i32
    %c0_i32_0 = arith.constant 0 : i32
    %c0_i32_1 = arith.constant 0 : i32
    return %c0_i32, %c0_i32_0 : i32, i32
  }
  func.func @transform_9(%arg0: i32) -> (i32, i32, i32) {
    %c0_i32 = arith.constant 0 : i32
    %c0_i32_0 = arith.constant 0 : i32
    %c0_i32_1 = arith.constant 0 : i32
    return %arg0, %c0_i32, %c0_i32_0 : i32, i32, i32
  }
}

</mosaic_0001>

<bundles_post_ra>
// kernel: lenet5_forward.2
= control target key start
LH: loop header
LB: loop body
LE: loop exit
PB: predicated region body
PF: predicated region fallthrough
CT: control target
= control target key end

     0   :  { %s2030_s12 = smov 0   ;;  %s2350_s0 = inlined_call_operand.vmem [shape: bf16[2,896,128], index: 0, kind: input, shape index: {}]   ;;  %s2351_s1 = inlined_call_operand.vmem [shape: bf16[128,128], index: 1, kind: input, shape index: {}]   ;;  %s2352_s2 = inlined_call_operand.vmem [shape: f32[1,128], index: 2, kind: input, shape index: {}]   ;;  %s2353_s3 = inlined_call_operand.vmem [shape: bf16[2,224,128], index: 3, kind: output, shape index: {}]  }
   0x1 LB: > { %s1507_s13 = sadd.s32 4294967295, %s2008_s12   ;;  %p1511_p0 = scmp.ge.s32.totalorder %s2008_s12, 1  ;;  %s2008_s12 = sphi %s2030_s12, %s13_s12  }
   0x2   : > { %p137_p1 = scmp.lt.s32.totalorder %s2008_s12, 3 }
   0x4   : > { %p138_p2 = pnand %p1511_p0, %p137_p1 }
   0x6   : > { %141 = sbr.rel (%p138_p2) target bundleno = 376 (0x178), region = 32 }
   0xd   : > { %v1938_v0 = vld [vmem:[%s2351_s1] sm:$0xff]   ;;  %p161_p3 = scmp.lt.s32.totalorder %s1507_s13, 1  ;;  %v1939_v1 = vld [vmem:[%s2351_s1 + $0x8] sm:$0xff]   ;;  %v1940_v2 = vld [vmem:[%s2351_s1 + $0x10] sm:$0xff]  }
   0xe   : > { %1784 = vmatprep.subr.bf16.mxu0 %v1938_v0  ;;  %1912 = vmatprep.subr.bf16.mxu1 %v1938_v0  ;;  %v1941_v3 = vld [vmem:[%s2351_s1 + $0x18] sm:$0xff]   ;;  %v1942_v6 = vld [vmem:[%s2351_s1 + $0x20] sm:$0xff]   ;;  %v1943_v7 = vld [vmem:[%s2351_s1 + $0x28] sm:$0xff]  }
   0xf   : > { %s2373_s13 = smov (!%p161_p3, %s1507_s13), 1  ;;  %1785 = vmatpush3.bf16.msra.mxu0 %v1938_v0  ;;  %1920 = vmatpush3.bf16.msra.mxu1 %v1938_v0  ;;  %v1944_v8 = vld [vmem:[%s2351_s1 + $0x30] sm:$0xff]   ;;  %v1945_v9 = vld [vmem:[%s2351_s1 + $0x38] sm:$0xff]  }
  0x10   : > { %1786 = vmatprep.subr.bf16.mxu0 %v1939_v1  ;;  %1913 = vmatprep.subr.bf16.mxu1 %v1939_v1  ;;  %s1928_s20 = smul.u32 448, %s2373_s13 }
  0x11   : > { %s1929_s9 = smul.u32 112, %s2373_s13 }
  0x12   : > { %s2053_s23 = scalar_lea.vmem %s2350_s0, %s1928_s20 }
  0x13   : > { %1787 = vmatpush3.bf16.msra.mxu0 %v1939_v1  ;;  %1921 = vmatpush3.bf16.msra.mxu1 %v1939_v1  ;;  %v1946_v4 = vld [vmem:[%s2053_s23] sm:$0xff]   ;;  %v1948_v10 = vld [vmem:[%s2053_s23 + $0x8] sm:$0xff]   ;;  %v1950_v12 = vld [vmem:[%s2053_s23 + $0x10] sm:$0xff]   ;;  %s2261_s13 = scalar_lea.vmem %s2353_s3, %s1929_s9 }
  0x14   : > { %1788 = vmatprep.subr.bf16.mxu0 %v1940_v2  ;;  %1914 = vmatprep.subr.bf16.mxu1 %v1940_v2  ;;  %v1947_v5 = vld [vmem:[%s2053_s23 + $0xe0] sm:$0xff]   ;;  %v1949_v11 = vld [vmem:[%s2053_s23 + $0xe8] sm:$0xff]   ;;  %v1951_v13 = vld [vmem:[%s2053_s23 + $0xf0] sm:$0xff]  }
  0x15   : > { %1800 = vmatprep.mubr.bf16.mxu0 %v1946_v4  ;;  %1856 = vmatprep.mubr.bf16.mxu1 %v1947_v5  ;;  %v1952_v14 = vld [vmem:[%s2053_s23 + $0x18] sm:$0xff]   ;;  %v1954_v16 = vld [vmem:[%s2053_s23 + $0x20] sm:$0xff]   ;;  %v1956_v18 = vld [vmem:[%s2053_s23 + $0x28] sm:$0xff]  }
  0x16   : > { %v1953_v15 = vld [vmem:[%s2053_s23 + $0xf8] sm:$0xff]   ;;  %v1955_v17 = vld [vmem:[%s2053_s23 + $0x100] sm:$0xff]   ;;  %v1957_v19 = vld [vmem:[%s2053_s23 + $0x108] sm:$0xff]  }
  0x17   : > { %1789 = vmatpush3.bf16.msra.mxu0 %v1940_v2  ;;  %1922 = vmatpush3.bf16.msra.mxu1 %v1940_v2  ;;  %v1958_v20 = vld [vmem:[%s2053_s23 + $0x30] sm:$0xff]   ;;  %v1960_v22 = vld [vmem:[%s2053_s23 + $0x38] sm:$0xff]   ;;  %v1962_v24 = vld [vmem:[%s2053_s23 + $0x40] sm:$0xff]  }
  0x18   : > { %1790 = vmatprep.subr.bf16.mxu0 %v1941_v3  ;;  %1915 = vmatprep.subr.bf16.mxu1 %v1941_v3  ;;  %v1959_v21 = vld [vmem:[%s2053_s23 + $0x110] sm:$0xff]   ;;  %v1961_v23 = vld [vmem:[%s2053_s23 + $0x118] sm:$0xff]   ;;  %v1963_v25 = vld [vmem:[%s2053_s23 + $0x120] sm:$0xff]  }
  0x19   : > { %v1964_v26 = vld [vmem:[%s2053_s23 + $0x48] sm:$0xff]   ;;  %v1966_v28 = vld [vmem:[%s2053_s23 + $0x50] sm:$0xff]   ;;  %v1968_v30 = vld [vmem:[%s2053_s23 + $0x58] sm:$0xff]  }
  0x1a   : > { %v1965_v27 = vld [vmem:[%s2053_s23 + $0x128] sm:$0xff]   ;;  %v1967_v29 = vld [vmem:[%s2053_s23 + $0x130] sm:$0xff]   ;;  %v1969_v31 = vld [vmem:[%s2053_s23 + $0x138] sm:$0xff]  }
  0x1b   : > { %1791 = vmatpush3.bf16.msra.mxu0 %v1941_v3  ;;  %1923 = vmatpush3.bf16.msra.mxu1 %v1941_v3  ;;  %v1970_v32 = vld [vmem:[%s2053_s23 + $0x60] sm:$0xff]   ;;  %v1972_v34 = vld [vmem:[%s2053_s23 + $0x68] sm:$0xff]   ;;  %v1974_v36 = vld [vmem:[%s2053_s23 + $0x70] sm:$0xff]  }
  0x1c   : > { %1792 = vmatprep.subr.bf16.mxu0 %v1942_v6  ;;  %1916 = vmatprep.subr.bf16.mxu1 %v1942_v6  ;;  %v1971_v33 = vld [vmem:[%s2053_s23 + $0x140] sm:$0xff]   ;;  %v1973_v35 = vld [vmem:[%s2053_s23 + $0x148] sm:$0xff]   ;;  %v1975_v37 = vld [vmem:[%s2053_s23 + $0x150] sm:$0xff]  }
  0x1d   : > { %v1976_v38 = vld [vmem:[%s2053_s23 + $0x78] sm:$0xff]   ;;  %v1978_v40 = vld [vmem:[%s2053_s23 + $0x80] sm:$0xff]   ;;  %v1980_v42 = vld [vmem:[%s2053_s23 + $0x88] sm:$0xff]  }
  0x1e   : > { %v1977_v39 = vld [vmem:[%s2053_s23 + $0x158] sm:$0xff]   ;;  %v1979_v41 = vld [vmem:[%s2053_s23 + $0x160] sm:$0xff]   ;;  %v1981_v43 = vld [vmem:[%s2053_s23 + $0x168] sm:$0xff]  }
  0x1f   : > { %1793 = vmatpush3.bf16.msra.mxu0 %v1942_v6  ;;  %1924 = vmatpush3.bf16.msra.mxu1 %v1942_v6  ;;  %v1982_v44 = vld [vmem:[%s2053_s23 + $0x90] sm:$0xff]   ;;  %v1984_v46 = vld [vmem:[%s2053_s23 + $0x98] sm:$0xff]   ;;  %v1986_v48 = vld [vmem:[%s2053_s23 + $0xa0] sm:$0xff]  }
  0x20   : > { %1794 = vmatprep.subr.bf16.mxu0 %v1943_v7  ;;  %1917 = vmatprep.subr.bf16.mxu1 %v1943_v7  ;;  %v1983_v45 = vld [vmem:[%s2053_s23 + $0x170] sm:$0xff]   ;;  %v1985_v47 = vld [vmem:[%s2053_s23 + $0x178] sm:$0xff]   ;;  %v1987_v49 = vld [vmem:[%s2053_s23 + $0x180] sm:$0xff]  }
  0x21   : > { %v1988_v50 = vld [vmem:[%s2053_s23 + $0xa8] sm:$0xff]   ;;  %v1990_v52 = vld [vmem:[%s2053_s23 + $0xb0] sm:$0xff]   ;;  %v1992_v54 = vld [vmem:[%s2053_s23 + $0xb8] sm:$0xff]  }
  0x22   : > { %v1989_v51 = vld [vmem:[%s2053_s23 + $0x188] sm:$0xff]   ;;  %v1991_v53 = vld [vmem:[%s2053_s23 + $0x190] sm:$0xff]   ;;  %v1993_v55 = vld [vmem:[%s2053_s23 + $0x198] sm:$0xff]  }
  0x23   : > { %1795 = vmatpush3.bf16.msra.mxu0 %v1943_v7  ;;  %1925 = vmatpush3.bf16.msra.mxu1 %v1943_v7  ;;  %v1994_v56 = vld [vmem:[%s2053_s23 + $0xc0] sm:$0xff]   ;;  %v1996_v58 = vld [vmem:[%s2053_s23 + $0xc8] sm:$0xff]   ;;  %v1998_v60 = vld [vmem:[%s2053_s23 + $0xd0] sm:$0xff]  }
  0x24   : > { %1796 = vmatprep.subr.bf16.mxu0 %v1944_v8  ;;  %1918 = vmatprep.subr.bf16.mxu1 %v1944_v8  ;;  %v1995_v57 = vld [vmem:[%s2053_s23 + $0x1a0] sm:$0xff]   ;;  %v1997_v59 = vld [vmem:[%s2053_s23 + $0x1a8] sm:$0xff]   ;;  %v1999_v61 = vld [vmem:[%s2053_s23 + $0x1b0] sm:$0xff]  }
  0x25   : > { %v2000_v62 = vld [vmem:[%s2053_s23 + $0xd8] sm:$0xff]  }
  0x26   : > { %v2001_v63 = vld [vmem:[%s2053_s23 + $0x1b8] sm:$0xff]  }
  0x27   : > { %1797 = vmatpush3.bf16.msra.mxu0 %v1944_v8  ;;  %1926 = vmatpush3.bf16.msra.mxu1 %v1944_v8 }
  0x28   : > { %1798 = vmatprep.subr.bf16.mxu0 %v1945_v9  ;;  %1919 = vmatprep.subr.bf16.mxu1 %v1945_v9 }
  0x2b   : > { %1799 = vmatpush3.bf16.msra.mxu0 %v1945_v9  ;;  %1927 = vmatpush3.bf16.msra.mxu1 %v1945_v9 }
  0x2e   : > { %1801 = vmatmul.mubr.bf16.vlgmr.msra.gmra.mrb[0].mxu0 %v1948_v10  ;;  %1857 = vmatmul.mubr.bf16.vlgmr.msra.gmra.mrb[0].mxu1 %v1949_v11 }
  0x2f   : > { %1804 = vmatprep.mubr.bf16.mxu0 %v1950_v12  ;;  %1860 = vmatprep.mubr.bf16.mxu1 %v1951_v13 }
  0x36   : > { %1805 = vmatmul.mubr.bf16.gmra.mrb[4].mxu0 %v1952_v14  ;;  %1861 = vmatmul.mubr.bf16.gmra.mrb[4].mxu1 %v1953_v15 }
  0x37   : > { %1808 = vmatprep.mubr.bf16.mxu0 %v1954_v16  ;;  %1864 = vmatprep.mubr.bf16.mxu1 %v1955_v17 }
  0x3e   : > { %1809 = vmatmul.mubr.bf16.gmra.mrb[8].mxu0 %v1956_v18  ;;  %1865 = vmatmul.mubr.bf16.gmra.mrb[8].mxu1 %v1957_v19 }
  0x3f   : > { %1812 = vmatprep.mubr.bf16.mxu0 %v1958_v20  ;;  %1868 = vmatprep.mubr.bf16.mxu1 %v1959_v21 }
  0x46   : > { %1813 = vmatmul.mubr.bf16.gmra.mrb[12].mxu0 %v1960_v22  ;;  %1869 = vmatmul.mubr.bf16.gmra.mrb[12].mxu1 %v1961_v23 }
  0x47   : > { %1816 = vmatprep.mubr.bf16.mxu0 %v1962_v24  ;;  %1872 = vmatprep.mubr.bf16.mxu1 %v1963_v25 }
  0x4e   : > { %1817 = vmatmul.mubr.bf16.gmra.mrb[16].mxu0 %v1964_v26  ;;  %1873 = vmatmul.mubr.bf16.gmra.mrb[16].mxu1 %v1965_v27 }
  0x4f   : > { %1820 = vmatprep.mubr.bf16.mxu0 %v1966_v28  ;;  %1876 = vmatprep.mubr.bf16.mxu1 %v1967_v29 }
  0x56   : > { %1821 = vmatmul.mubr.bf16.gmra.mrb[20].mxu0 %v1968_v30  ;;  %1877 = vmatmul.mubr.bf16.gmra.mrb[20].mxu1 %v1969_v31 }
  0x57   : > { %1824 = vmatprep.mubr.bf16.mxu0 %v1970_v32  ;;  %1880 = vmatprep.mubr.bf16.mxu1 %v1971_v33 }
  0x5e   : > { %1825 = vmatmul.mubr.bf16.gmra.mrb[24].mxu0 %v1972_v34  ;;  %1881 = vmatmul.mubr.bf16.gmra.mrb[24].mxu1 %v1973_v35 }
  0x5f   : > { %1828 = vmatprep.mubr.bf16.mxu0 %v1974_v36  ;;  %1884 = vmatprep.mubr.bf16.mxu1 %v1975_v37 }
  0x66   : > { %1829 = vmatmul.mubr.bf16.gmra.mrb[28].mxu0 %v1976_v38  ;;  %1885 = vmatmul.mubr.bf16.gmra.mrb[28].mxu1 %v1977_v39 }
  0x67   : > { %1832 = vmatprep.mubr.bf16.mxu0 %v1978_v40  ;;  %1888 = vmatprep.mubr.bf16.mxu1 %v1979_v41 }
  0x6e   : > { %1833 = vmatmul.mubr.bf16.gmra.mrb[32].mxu0 %v1980_v42  ;;  %1889 = vmatmul.mubr.bf16.gmra.mrb[32].mxu1 %v1981_v43 }
  0x6f   : > { %1836 = vmatprep.mubr.bf16.mxu0 %v1982_v44  ;;  %1892 = vmatprep.mubr.bf16.mxu1 %v1983_v45 }
  0x76   : > { %1837 = vmatmul.mubr.bf16.gmra.mrb[36].mxu0 %v1984_v46  ;;  %1893 = vmatmul.mubr.bf16.gmra.mrb[36].mxu1 %v1985_v47 }
  0x77   : > { %1840 = vmatprep.mubr.bf16.mxu0 %v1986_v48  ;;  %1896 = vmatprep.mubr.bf16.mxu1 %v1987_v49 }
  0x7e   : > { %1841 = vmatmul.mubr.bf16.gmra.mrb[40].mxu0 %v1988_v50  ;;  %1897 = vmatmul.mubr.bf16.gmra.mrb[40].mxu1 %v1989_v51 }
  0x7f   : > { %1844 = vmatprep.mubr.bf16.mxu0 %v1990_v52  ;;  %1900 = vmatprep.mubr.bf16.mxu1 %v1991_v53 }
  0x86   : > { %1845 = vmatmul.mubr.bf16.gmra.mrb[44].mxu0 %v1992_v54  ;;  %1901 = vmatmul.mubr.bf16.gmra.mrb[44].mxu1 %v1993_v55 }
  0x87   : > { %1848 = vmatprep.mubr.bf16.mxu0 %v1994_v56  ;;  %1904 = vmatprep.mubr.bf16.mxu1 %v1995_v57 }
  0x8e   : > { %1849 = vmatmul.mubr.bf16.gmra.mrb[48].mxu0 %v1996_v58  ;;  %1905 = vmatmul.mubr.bf16.gmra.mrb[48].mxu1 %v1997_v59 }
  0x8f   : > { %1852 = vmatprep.mubr.bf16.mxu0 %v1998_v60  ;;  %1908 = vmatprep.mubr.bf16.mxu1 %v1999_v61 }
  0x96   : > { %1853 = vmatmul.mubr.bf16.gmra.mrb[52].mxu0 %v2000_v62  ;;  %1909 = vmatmul.mubr.bf16.gmra.mrb[52].mxu1 %v2001_v63  ;;  %v2243_v62 = vld [vmem:[%s2352_s2] ss:$0 sm:$0xff] }
 0x101   : > { %v2126_v0 = vpop.f32.mrb[0].mxu0  ;;  %v2128_v1 = vpop.f32.mrb[0].mxu1 }
 0x102   : > { %v2130_v2 = vpop.f32.mrb[1].mxu0  ;;  %v2132_v3 = vpop.f32.mrb[1].mxu1 }
 0x103   : > { %v2134_v4 = vpop.f32.mrb[2].mxu0  ;;  %v2136_v5 = vpop.f32.mrb[2].mxu1 }
 0x104   : > { %v2138_v6 = vpop.f32.mrb[3].mxu0  ;;  %v2140_v7 = vpop.f32.mrb[3].mxu1 }
 0x109   : > { %v2142_v8 = vpop.f32.mrb[4].mxu0  ;;  %v2144_v9 = vpop.f32.mrb[4].mxu1 }
 0x10a   : > { %v2146_v10 = vpop.f32.mrb[5].mxu0  ;;  %v2148_v11 = vpop.f32.mrb[5].mxu1 }
 0x10b   : > { %v2150_v12 = vpop.f32.mrb[6].mxu0  ;;  %v2152_v13 = vpop.f32.mrb[6].mxu1 }
 0x10c   : > { %v2154_v14 = vpop.f32.mrb[7].mxu0  ;;  %v2156_v15 = vpop.f32.mrb[7].mxu1 }
 0x111   : > { %v2158_v16 = vpop.f32.mrb[8].mxu0  ;;  %v2160_v17 = vpop.f32.mrb[8].mxu1 }
 0x112   : > { %v2162_v18 = vpop.f32.mrb[9].mxu0  ;;  %v2164_v19 = vpop.f32.mrb[9].mxu1 }
 0x113   : > { %v2166_v20 = vpop.f32.mrb[10].mxu0  ;;  %v2168_v21 = vpop.f32.mrb[10].mxu1 }
 0x114   : > { %v2170_v22 = vpop.f32.mrb[11].mxu0  ;;  %v2172_v23 = vpop.f32.mrb[11].mxu1 }
 0x119   : > { %v2174_v24 = vpop.f32.mrb[12].mxu0  ;;  %v2176_v25 = vpop.f32.mrb[12].mxu1 }
 0x11a   : > { %v2178_v26 = vpop.f32.mrb[13].mxu0  ;;  %v2180_v27 = vpop.f32.mrb[13].mxu1 }
 0x11b   : > { %v2182_v28 = vpop.f32.mrb[14].mxu0  ;;  %v2184_v29 = vpop.f32.mrb[14].mxu1 }
 0x11c   : > { %v2186_v30 = vpop.f32.mrb[15].mxu0  ;;  %v2188_v31 = vpop.f32.mrb[15].mxu1 }
 0x121   : > { %v2190_v32 = vpop.f32.mrb[16].mxu0  ;;  %v2192_v33 = vpop.f32.mrb[16].mxu1 }
 0x122   : > { %v2194_v34 = vpop.f32.mrb[17].mxu0  ;;  %v2196_v35 = vpop.f32.mrb[17].mxu1 }
 0x123   : > { %v2198_v36 = vpop.f32.mrb[18].mxu0  ;;  %v2200_v37 = vpop.f32.mrb[18].mxu1 }
 0x124   : > { %v2202_v38 = vpop.f32.mrb[19].mxu0  ;;  %v2204_v39 = vpop.f32.mrb[19].mxu1 }
 0x129   : > { %v2206_v40 = vpop.f32.mrb[20].mxu0  ;;  %v2208_v41 = vpop.f32.mrb[20].mxu1 }
 0x12a   : > { %v2210_v42 = vpop.f32.mrb[21].mxu0  ;;  %v2212_v43 = vpop.f32.mrb[21].mxu1 }
 0x12b   : > { %v2214_v44 = vpop.f32.mrb[22].mxu0  ;;  %v2216_v45 = vpop.f32.mrb[22].mxu1 }
 0x12c   : > { %v2218_v46 = vpop.f32.mrb[23].mxu0  ;;  %v2220_v47 = vpop.f32.mrb[23].mxu1 }
 0x12d   : > { %2354 = vst [vmem:[#allocation2_spill] sm:$0xff] %v2220_v47 }
 0x131   : > { %v2222_v48 = vpop.f32.mrb[24].mxu0  ;;  %v2224_v49 = vpop.f32.mrb[24].mxu1 }
 0x132   : > { %2355 = vst [vmem:[#allocation3_spill] sm:$0xff] %v2222_v48  ;;  %2356 = vst [vmem:[#allocation4_spill] sm:$0xff] %v2224_v49  ;;  %v2226_v50 = vpop.f32.mrb[25].mxu0  ;;  %v2228_v51 = vpop.f32.mrb[25].mxu1 }
 0x133   : > { %2357 = vst [vmem:[#allocation5_spill] sm:$0xff] %v2226_v50  ;;  %2358 = vst [vmem:[#allocation6_spill] sm:$0xff] %v2228_v51  ;;  %v2230_v52 = vpop.f32.mrb[26].mxu0  ;;  %v2232_v53 = vpop.f32.mrb[26].mxu1 }
 0x134   : > { %2359 = vst [vmem:[#allocation7_spill] sm:$0xff] %v2230_v52  ;;  %2360 = vst [vmem:[#allocation8_spill] sm:$0xff] %v2232_v53  ;;  %v2234_v54 = vpop.f32.mrb[27].mxu0  ;;  %v2236_v55 = vpop.f32.mrb[27].mxu1 }
 0x135   : > { %2361 = vst [vmem:[#allocation9_spill] sm:$0xff] %v2234_v54  ;;  %2362 = vst [vmem:[#allocation10_spill] sm:$0xff] %v2236_v55 }
 0x139   : > { %v1830_v56 = vpop.f32.mrb[28].mxu0  ;;  %v1886_v57 = vpop.f32.mrb[28].mxu1 }
 0x13a   : > { %v1167_v58 = vmax.f32 %v2126_v0, %v1830_v56  ;;  %v1195_v59 = vmax.f32 %v2128_v1, %v1886_v57  ;;  %v830_v60 = vpop.f32.mrb[29].mxu0  ;;  %v1054_v61 = vpop.f32.mrb[29].mxu1 }
 0x13b   : > { %v1165_v63 = vmax.f32 %v2130_v2, %v830_v60  ;;  %v1193_v54 = vmax.f32 %v2132_v3, %v1054_v61  ;;  %v1831_v53 = vpop.f32.mrb[30].mxu0  ;;  %v1887_v55 = vpop.f32.mrb[30].mxu1 }
 0x13c   : > { %v1223_v52 = vmax.f32 %v1167_v58, %v1195_v59  ;;  %v1168_v51 = vmax.f32 %v2134_v4, %v1831_v53  ;;  %v1196_v0 = vmax.f32 %v2136_v5, %v1887_v55  ;;  %v833_v1 = vpop.f32.mrb[31].mxu0  ;;  %v1057_v56 = vpop.f32.mrb[31].mxu1 }
 0x13d   : > { %v1221_v57 = vmax.f32 %v1165_v63, %v1193_v54  ;;  %v1166_v50 = vmax.f32 %v2138_v6, %v833_v1  ;;  %v1194_v49 = vmax.f32 %v2140_v7, %v1057_v56 }
 0x13e   : > { %v1258_v48 = vadd.f32 %v2243_v62, %v1223_v52  ;;  %v1224_v47 = vmax.f32 %v1168_v51, %v1196_v0 }
 0x13f   : > { %v1256_v2 = vadd.f32 %v2243_v62, %v1221_v57  ;;  %v1222_v3 = vmax.f32 %v1166_v50, %v1194_v49 }
 0x140   : > { %v1259_v58 = vadd.f32 %v2243_v62, %v1224_v47  ;;  %v1286_v55 = vmax.f32 %v1258_v48, 0.0 }
 0x141   : > { %v1257_v4 = vadd.f32 %v2243_v62, %v1222_v3  ;;  %v1834_v53 = vpop.f32.mrb[32].mxu0  ;;  %v1890_v5 = vpop.f32.mrb[32].mxu1  ;;  %v1284_v52 = vmax.f32 %v1256_v2, 0.0 }
 0x142   : > { %v1287_v59 = vmax.f32 %v1259_v58, 0.0  ;;  %v1171_v54 = vmax.f32 %v2142_v8, %v1834_v53  ;;  %v1199_v6 = vmax.f32 %v2144_v9, %v1890_v5  ;;  %v846_v7 = vpop.f32.mrb[33].mxu0  ;;  %v1070_v60 = vpop.f32.mrb[33].mxu1 }
 0x143   : > { %v1285_v47 = vmax.f32 %v1257_v4, 0.0  ;;  %v1169_v49 = vmax.f32 %v2146_v10, %v846_v7  ;;  %v1197_v50 = vmax.f32 %v2148_v11, %v1070_v60  ;;  %v1835_v48 = vpop.f32.mrb[34].mxu0  ;;  %v1891_v51 = vpop.f32.mrb[34].mxu1 }
 0x144   : > { %v1645_v8 = vpack.c.bf16 %v1287_v59, %v1286_v55  ;;  %v1227_v61 = vmax.f32 %v1171_v54, %v1199_v6  ;;  %v1172_v9 = vmax.f32 %v2150_v12, %v1835_v48  ;;  %v1200_v63 = vmax.f32 %v2152_v13, %v1891_v51  ;;  %v849_v0 = vpop.f32.mrb[35].mxu0  ;;  %v1073_v1 = vpop.f32.mrb[35].mxu1 }
 0x145   : > { %v1640_v56 = vpack.c.bf16 %v1285_v47, %v1284_v52  ;;  %v1225_v57 = vmax.f32 %v1169_v49, %v1197_v50  ;;  %v1170_v2 = vmax.f32 %v2154_v14, %v849_v0  ;;  %v1198_v3 = vmax.f32 %v2156_v15, %v1073_v1 }
 0x146   : > { %1707 = vst [vmem:[%s2261_s13 + $0x8] sm:$0xff] %v1645_v8   ;;  %v1262_v10 = vadd.f32 %v2243_v62, %v1227_v61  ;;  %v1228_v11 = vmax.f32 %v1172_v9, %v1200_v63 }
 0x147   : > { %1641 = vst [vmem:[%s2261_s13] sm:$0xff] %v1640_v56   ;;  %v1260_v58 = vadd.f32 %v2243_v62, %v1225_v57  ;;  %v1226_v4 = vmax.f32 %v1170_v2, %v1198_v3 }
 0x148   : > { %v1263_v12 = vadd.f32 %v2243_v62, %v1228_v11  ;;  %v1290_v55 = vmax.f32 %v1262_v10, 0.0 }
 0x149   : > { %v1261_v13 = vadd.f32 %v2243_v62, %v1226_v4  ;;  %v1838_v53 = vpop.f32.mrb[36].mxu0  ;;  %v1894_v5 = vpop.f32.mrb[36].mxu1  ;;  %v1288_v7 = vmax.f32 %v1260_v58, 0.0 }
 0x14a   : > { %v1291_v59 = vmax.f32 %v1263_v12, 0.0  ;;  %v1175_v14 = vmax.f32 %v2158_v16, %v1838_v53  ;;  %v1203_v15 = vmax.f32 %v2160_v17, %v1894_v5  ;;  %v862_v54 = vpop.f32.mrb[37].mxu0  ;;  %v1086_v6 = vpop.f32.mrb[37].mxu1 }
 0x14b   : > { %v1289_v60 = vmax.f32 %v1261_v13, 0.0  ;;  %v1173_v52 = vmax.f32 %v2162_v18, %v862_v54  ;;  %v1201_v47 = vmax.f32 %v2164_v19, %v1086_v6  ;;  %v1839_v49 = vpop.f32.mrb[38].mxu0  ;;  %v1895_v50 = vpop.f32.mrb[38].mxu1 }
 0x14c   : > { %v1655_v48 = vpack.c.bf16 %v1291_v59, %v1290_v55  ;;  %v1231_v51 = vmax.f32 %v1175_v14, %v1203_v15  ;;  %v1176_v8 = vmax.f32 %v2166_v20, %v1839_v49  ;;  %v1204_v16 = vmax.f32 %v2168_v21, %v1895_v50  ;;  %v865_v61 = vpop.f32.mrb[39].mxu0  ;;  %v1089_v17 = vpop.f32.mrb[39].mxu1 }
 0x14d   : > { %v1650_v9 = vpack.c.bf16 %v1289_v60, %v1288_v7  ;;  %v1229_v63 = vmax.f32 %v1173_v52, %v1201_v47  ;;  %v1174_v0 = vmax.f32 %v2170_v22, %v865_v61  ;;  %v1202_v1 = vmax.f32 %v2172_v23, %v1089_v17 }
 0x14e   : > { %1709 = vst [vmem:[%s2261_s13 + $0x18] sm:$0xff] %v1655_v48   ;;  %v1266_v18 = vadd.f32 %v2243_v62, %v1231_v51  ;;  %v1232_v19 = vmax.f32 %v1176_v8, %v1204_v16 }
 0x14f   : > { %1708 = vst [vmem:[%s2261_s13 + $0x10] sm:$0xff] %v1650_v9   ;;  %v1264_v56 = vadd.f32 %v2243_v62, %v1229_v63  ;;  %v1230_v57 = vmax.f32 %v1174_v0, %v1202_v1 }
 0x150   : > { %v1267_v20 = vadd.f32 %v2243_v62, %v1232_v19  ;;  %v1294_v10 = vmax.f32 %v1266_v18, 0.0 }
 0x151   : > { %v1265_v21 = vadd.f32 %v2243_v62, %v1230_v57  ;;  %v1842_v2 = vpop.f32.mrb[40].mxu0  ;;  %v1898_v3 = vpop.f32.mrb[40].mxu1  ;;  %v1292_v12 = vmax.f32 %v1264_v56, 0.0 }
 0x152   : > { %v1295_v11 = vmax.f32 %v1267_v20, 0.0  ;;  %v1179_v22 = vmax.f32 %v2174_v24, %v1842_v2  ;;  %v1207_v23 = vmax.f32 %v2176_v25, %v1898_v3  ;;  %v878_v58 = vpop.f32.mrb[41].mxu0  ;;  %v1102_v4 = vpop.f32.mrb[41].mxu1 }
 0x153   : > { %v1293_v13 = vmax.f32 %v1265_v21, 0.0  ;;  %v1177_v53 = vmax.f32 %v2178_v26, %v878_v58  ;;  %v1205_v5 = vmax.f32 %v2180_v27, %v1102_v4  ;;  %v1843_v55 = vpop.f32.mrb[42].mxu0  ;;  %v1899_v59 = vpop.f32.mrb[42].mxu1 }
 0x154   : > { %v1665_v14 = vpack.c.bf16 %v1295_v11, %v1294_v10  ;;  %v1235_v15 = vmax.f32 %v1179_v22, %v1207_v23  ;;  %v1180_v54 = vmax.f32 %v2182_v28, %v1843_v55  ;;  %v1208_v24 = vmax.f32 %v2184_v29, %v1899_v59  ;;  %v881_v6 = vpop.f32.mrb[43].mxu0  ;;  %v1105_v25 = vpop.f32.mrb[43].mxu1 }
 0x155   : > { %v1660_v7 = vpack.c.bf16 %v1293_v13, %v1292_v12  ;;  %v1233_v60 = vmax.f32 %v1177_v53, %v1205_v5  ;;  %v1178_v52 = vmax.f32 %v2186_v30, %v881_v6  ;;  %v1206_v47 = vmax.f32 %v2188_v31, %v1105_v25 }
 0x156   : > { %1711 = vst [vmem:[%s2261_s13 + $0x28] sm:$0xff] %v1665_v14   ;;  %v1270_v26 = vadd.f32 %v2243_v62, %v1235_v15  ;;  %v1236_v27 = vmax.f32 %v1180_v54, %v1208_v24 }
 0x157   : > { %1710 = vst [vmem:[%s2261_s13 + $0x20] sm:$0xff] %v1660_v7   ;;  %v1268_v49 = vadd.f32 %v2243_v62, %v1233_v60  ;;  %v1234_v50 = vmax.f32 %v1178_v52, %v1206_v47 }
 0x158   : > { %v1271_v28 = vadd.f32 %v2243_v62, %v1236_v27  ;;  %v1298_v8 = vmax.f32 %v1270_v26, 0.0  ;;  %v2363_v27 = vld [vmem:[#allocation2_spill] sm:$0xff] }
 0x159   : > { %v1269_v29 = vadd.f32 %v2243_v62, %v1234_v50  ;;  %v1846_v48 = vpop.f32.mrb[44].mxu0  ;;  %v1902_v51 = vpop.f32.mrb[44].mxu1  ;;  %v1296_v9 = vmax.f32 %v1268_v49, 0.0 }
 0x15a   : > { %v1299_v16 = vmax.f32 %v1271_v28, 0.0  ;;  %v1183_v30 = vmax.f32 %v2190_v32, %v1846_v48  ;;  %v1211_v31 = vmax.f32 %v2192_v33, %v1902_v51  ;;  %v894_v61 = vpop.f32.mrb[45].mxu0  ;;  %v1118_v17 = vpop.f32.mrb[45].mxu1 }
 0x15b   : > { %v1297_v63 = vmax.f32 %v1269_v29, 0.0  ;;  %v1181_v0 = vmax.f32 %v2194_v34, %v894_v61  ;;  %v1209_v1 = vmax.f32 %v2196_v35, %v1118_v17  ;;  %v1847_v18 = vpop.f32.mrb[46].mxu0  ;;  %v1903_v19 = vpop.f32.mrb[46].mxu1 }
 0x15c   : > { %v1675_v56 = vpack.c.bf16 %v1299_v16, %v1298_v8  ;;  %v1239_v57 = vmax.f32 %v1183_v30, %v1211_v31  ;;  %v1184_v20 = vmax.f32 %v2198_v36, %v1847_v18  ;;  %v1212_v32 = vmax.f32 %v2200_v37, %v1903_v19  ;;  %v897_v21 = vpop.f32.mrb[47].mxu0  ;;  %v1121_v33 = vpop.f32.mrb[47].mxu1  ;;  %v2364_v16 = vld [vmem:[#allocation3_spill] sm:$0xff]  ;;  %v2365_v30 = vld [vmem:[#allocation4_spill] sm:$0xff]  ;;  %v2367_v18 = vld [vmem:[#allocation6_spill] sm:$0xff] }
 0x15d   : > { %v1670_v2 = vpack.c.bf16 %v1297_v63, %v1296_v9  ;;  %v1237_v3 = vmax.f32 %v1181_v0, %v1209_v1  ;;  %v1182_v10 = vmax.f32 %v2202_v38, %v897_v21  ;;  %v1210_v11 = vmax.f32 %v2204_v39, %v1121_v33  ;;  %v2366_v0 = vld [vmem:[#allocation5_spill] sm:$0xff]  ;;  %v2368_v21 = vld [vmem:[#allocation7_spill] sm:$0xff] }
 0x15e   : > { %1713 = vst [vmem:[%s2261_s13 + $0x38] sm:$0xff] %v1675_v56   ;;  %v1274_v34 = vadd.f32 %v2243_v62, %v1239_v57  ;;  %v1240_v35 = vmax.f32 %v1184_v20, %v1212_v32 }
 0x15f   : > { %1712 = vst [vmem:[%s2261_s13 + $0x30] sm:$0xff] %v1670_v2   ;;  %v1272_v22 = vadd.f32 %v2243_v62, %v1237_v3  ;;  %v1238_v23 = vmax.f32 %v1182_v10, %v1210_v11  ;;  %v2369_v2 = vld [vmem:[#allocation8_spill] sm:$0xff] }
 0x160   : > { %v1275_v36 = vadd.f32 %v2243_v62, %v1240_v35  ;;  %v1302_v12 = vmax.f32 %v1274_v34, 0.0 }
 0x161   : > { %v1273_v37 = vadd.f32 %v2243_v62, %v1238_v23  ;;  %v1850_v58 = vpop.f32.mrb[48].mxu0  ;;  %v1906_v4 = vpop.f32.mrb[48].mxu1  ;;  %v1300_v55 = vmax.f32 %v1272_v22, 0.0  ;;  %v2370_v22 = vld [vmem:[#allocation9_spill] sm:$0xff] }
 0x162   : > { %v1303_v13 = vmax.f32 %v1275_v36, 0.0  ;;  %v1187_v38 = vmax.f32 %v2206_v40, %v1850_v58  ;;  %v1215_v39 = vmax.f32 %v2208_v41, %v1906_v4  ;;  %v910_v53 = vpop.f32.mrb[49].mxu0  ;;  %v1134_v5 = vpop.f32.mrb[49].mxu1  ;;  %v2371_v36 = vld [vmem:[#allocation10_spill] sm:$0xff] }
 0x163   : > { %v1301_v59 = vmax.f32 %v1273_v37, 0.0  ;;  %v1185_v14 = vmax.f32 %v2210_v42, %v910_v53  ;;  %v1213_v15 = vmax.f32 %v2212_v43, %v1134_v5  ;;  %v1851_v54 = vpop.f32.mrb[50].mxu0  ;;  %v1907_v24 = vpop.f32.mrb[50].mxu1 }
 0x164   : > { %v1685_v6 = vpack.c.bf16 %v1303_v13, %v1302_v12  ;;  %v1243_v25 = vmax.f32 %v1187_v38, %v1215_v39  ;;  %v1188_v7 = vmax.f32 %v2214_v44, %v1851_v54  ;;  %v1216_v40 = vmax.f32 %v2216_v45, %v1907_v24  ;;  %v913_v60 = vpop.f32.mrb[51].mxu0  ;;  %v1137_v41 = vpop.f32.mrb[51].mxu1 }
 0x165   : > { %v1680_v52 = vpack.c.bf16 %v1301_v59, %v1300_v55  ;;  %v1241_v47 = vmax.f32 %v1185_v14, %v1213_v15  ;;  %v1186_v26 = vmax.f32 %v2218_v46, %v913_v60  ;;  %v1214_v49 = vmax.f32 %v2363_v27, %v1137_v41 }
 0x166   : > { %1715 = vst [vmem:[%s2261_s13 + $0x48] sm:$0xff] %v1685_v6   ;;  %v1278_v42 = vadd.f32 %v2243_v62, %v1243_v25  ;;  %v1244_v43 = vmax.f32 %v1188_v7, %v1216_v40 }
 0x167   : > { %1714 = vst [vmem:[%s2261_s13 + $0x40] sm:$0xff] %v1680_v52   ;;  %v1276_v50 = vadd.f32 %v2243_v62, %v1241_v47  ;;  %v1242_v28 = vmax.f32 %v1186_v26, %v1214_v49 }
 0x168   : > { %v1279_v44 = vadd.f32 %v2243_v62, %v1244_v43  ;;  %v1306_v51 = vmax.f32 %v1278_v42, 0.0 }
 0x169   : > { %v1277_v45 = vadd.f32 %v2243_v62, %v1242_v28  ;;  %v1854_v29 = vpop.f32.mrb[52].mxu0  ;;  %v1910_v48 = vpop.f32.mrb[52].mxu1  ;;  %v1304_v9 = vmax.f32 %v1276_v50, 0.0 }
 0x16a   : > { %v1307_v8 = vmax.f32 %v1279_v44, 0.0  ;;  %v1191_v46 = vmax.f32 %v2364_v16, %v1854_v29  ;;  %v1219_v31 = vmax.f32 %v2365_v30, %v1910_v48  ;;  %v926_v61 = vpop.f32.mrb[53].mxu0  ;;  %v1150_v17 = vpop.f32.mrb[53].mxu1 }
 0x16b   : > { %v1305_v63 = vmax.f32 %v1277_v45, 0.0  ;;  %v1189_v1 = vmax.f32 %v2366_v0, %v926_v61  ;;  %v1217_v19 = vmax.f32 %v2367_v18, %v1150_v17  ;;  %v1855_v56 = vpop.f32.mrb[54].mxu0  ;;  %v1911_v57 = vpop.f32.mrb[54].mxu1 }
 0x16c   : > { %v1695_v20 = vpack.c.bf16 %v1307_v8, %v1306_v51  ;;  %v1247_v32 = vmax.f32 %v1191_v46, %v1219_v31  ;;  %v1192_v33 = vmax.f32 %v2368_v21, %v1855_v56  ;;  %v1220_v3 = vmax.f32 %v2369_v2, %v1911_v57  ;;  %v929_v10 = vpop.f32.mrb[55].mxu0  ;;  %v1153_v11 = vpop.f32.mrb[55].mxu1 }
 0x16d   : > { %v1690_v34 = vpack.c.bf16 %v1305_v63, %v1304_v9  ;;  %v1245_v35 = vmax.f32 %v1189_v1, %v1217_v19  ;;  %v1190_v23 = vmax.f32 %v2370_v22, %v929_v10  ;;  %v1218_v37 = vmax.f32 %v2371_v36, %v1153_v11 }
 0x16e   : > { %1717 = vst [vmem:[%s2261_s13 + $0x58] sm:$0xff] %v1695_v20   ;;  %v1282_v58 = vadd.f32 %v2243_v62, %v1247_v32  ;;  %v1248_v4 = vmax.f32 %v1192_v33, %v1220_v3 }
 0x16f   : > { %1716 = vst [vmem:[%s2261_s13 + $0x50] sm:$0xff] %v1690_v34   ;;  %v1280_v12 = vadd.f32 %v2243_v62, %v1245_v35  ;;  %v1246_v13 = vmax.f32 %v1190_v23, %v1218_v37 }
 0x170   : > { %v1283_v38 = vadd.f32 %v2243_v62, %v1248_v4  ;;  %v1310_v53 = vmax.f32 %v1282_v58, 0.0 }
 0x171   : > { %v1281_v39 = vadd.f32 %v2243_v62, %v1246_v13  ;;  %v1308_v55 = vmax.f32 %v1280_v12, 0.0 }
 0x172   : > { %v1311_v5 = vmax.f32 %v1283_v38, 0.0 }
 0x173   : > { %v1309_v59 = vmax.f32 %v1281_v39, 0.0 }
 0x174   : > { %v1705_v14 = vpack.c.bf16 %v1311_v5, %v1310_v53 }
 0x175   : > { %v1700_v15 = vpack.c.bf16 %v1309_v59, %v1308_v55 }
 0x176   : > { %1719 = vst [vmem:[%s2261_s13 + $0x68] sm:$0xff] %v1705_v14  }
 0x177   : > { %1718 = vst [vmem:[%s2261_s13 + $0x60] sm:$0xff] %v1700_v15  }
 0x178 PF: > { %s13_s12 = sadd.s32 1, %s2008_s12  }
 0x179   : > { %p10_p4 = scmp.ge.s32.totalorder %s13_s12, 4  }
 0x17b   :  { %12 = sbr.rel (!%p10_p4) target bundleno = 1 (0x1), region = 62 }

// kernel: lenet5_forward.3
= control target key start
LH: loop header
LB: loop body
LE: loop exit
PB: predicated region body
PF: predicated region fallthrough
CT: control target
= control target key end

     0   :  { %14 = vsyncpa [#allocation3], 0  ;;  %s13515_s0 = inlined_call_operand.vmem [shape: bf16[2,128,3200], index: 0, kind: input, shape index: {}]   ;;  %s13516_s1 = inlined_call_operand.vmem [shape: bf16[3200,128], index: 1, kind: input, shape index: {}]   ;;  %s13517_s2 = inlined_call_operand.vmem [shape: f32[1,128], index: 2, kind: input, shape index: {}]   ;;  %s13518_s3 = inlined_call_operand.vmem [shape: bf16[25,128,128], index: 3, kind: input, shape index: {}]   ;;  %s13519_s4 = inlined_call_operand.vmem [shape: f32[1,128], index: 4, kind: input, shape index: {}]   ;;  %s13520_s5 = inlined_call_operand.vmem [shape: bf16[128,128], index: 5, kind: input, shape index: {}]   ;;  %s13521_s6 = inlined_call_operand.vmem [shape: f32[1,128], index: 6, kind: input, shape index: {}]   ;;  %s13522_s7 = inlined_call_operand.vmem [shape: bf16[128,128], index: 7, kind: input, shape index: {}]   ;;  %s13523_s8 = inlined_call_operand.vmem [shape: f32[1,128], index: 8, kind: input, shape index: {}]   ;;  %s13524_s9 = inlined_call_operand.hbm [shape: f32[2,1,128], index: 9, kind: output, shape index: {}]  }
   0x1   :  { %16 = vsyncpa [#allocation3 + $0x1], 0  ;;  %s11015_s30 = smov 0   ;;  %s11017_s10 = smov 0  }
   0x2   :  { %s11019_s11 = smov 0   ;;  %s11021_s12 = smov 0  }
   0x3 LB: > { %s11036_s13 = sadd.s32 4294967295, %s10960_s12   ;;  %s7423_s14 = sadd.s32 4294967294, %s10960_s12   ;;  %s10960_s12 = sphi %s11021_s12, %s13530_s12   ;;  %s10956_s11 = sphi %s11019_s11, %s13529_s11   ;;  %s10952_s10 = sphi %s11017_s10, %s13528_s10   ;;  %s10948_s30 = sphi %s11015_s30, %s13527_s30  }
   0x4   : > { %s11040_s15 = sadd.s32 1, %s10960_s12   ;;  %s223_s16 = sadd.s32 1, %s10956_s11 }
   0x5   : > { %s220_s17 = ssub.s32 %s10960_s12, %s11040_s15  ;;  %p233_p0 = scmp.ne.s32.totalorder %s10956_s11, %s10952_s10 }
   0x6   : > { %p221_p1 = scmp.eq.s32.totalorder %s220_s17, 0  ;;  %p234_p2 = scmp.eq.s32.totalorder %s11036_s13, 1 }
   0x7   : > { %p239_p3 = scmp.ne.s32.totalorder %s10952_s10, %s10948_s30  ;;  %p240_p4 = scmp.eq.s32.totalorder %s7423_s14, 1 }
   0x8   : > { %s11051_s18 = scalar_select %p221_p1, %s10956_s11, %s223_s16  }
   0x9   : > { %p11053_p5 = por %p234_p2, %p233_p0  ;;  %p11057_p6 = por %p240_p4, %p239_p3 }
   0xa   : > { %p7426_p7 = scmp.ge.s32.totalorder %s10960_s12, 1  ;;  %p290_p8 = scmp.lt.s32.totalorder %s10960_s12, 3 }
   0xc   : > { %p291_p9 = pnand %p7426_p7, %p290_p8 }
   0xd   : > { %v10186_v0 = vld [vmem:[%s13516_s1 + $0x40] sm:$0xff] (!%p291_p9)   ;;  %v10188_v2 = vld [vmem:[%s13516_s1 + $0x48] sm:$0xff] (!%p291_p9)   ;;  %p325_p10 = scmp.lt.s32.totalorder (!%p291_p9), %s11036_s13, 1  ;;  %v10190_v4 = vld [vmem:[%s13516_s1 + $0x50] sm:$0xff] (!%p291_p9)   ;;  %vm10963_vm0 = vmmov (!%p291_p9), 0   ;;  %s8429_s26 = sshll.u32 (!%p291_p9), %s11036_s13, 4 }
   0xe   : > { %294 = sbr.rel (%p291_p9) target bundleno = 2463 (0x99f), region = 56  ;;  %v10187_v1 = vld [vmem:[%s13516_s1] sm:$0xff] (!%p291_p9)   ;;  %8432 = vmatprep.subr.bf16.mxu0 (!%p291_p9), %v10186_v0  ;;  %v10189_v3 = vld [vmem:[%s13516_s1 + $0x8] sm:$0xff] (!%p291_p9)   ;;  %v10191_v5 = vld [vmem:[%s13516_s1 + $0x10] sm:$0xff] (!%p291_p9)   ;;  %s13473_s29 = scalar_lea.hbm (!%p291_p9), %s13524_s9, %s8429_s26 }
   0xf   : > { %8433 = vmatpush3.bf16.msra.mxu0 (!%p291_p9), %v10187_v1  ;;  %v10192_v6 = vld [vmem:[%s13516_s1 + $0x58] sm:$0xff] (!%p291_p9)   ;;  %v10194_v8 = vld [vmem:[%s13516_s1 + $0x60] sm:$0xff] (!%p291_p9)   ;;  %v10196_v10 = vld [vmem:[%s13516_s1 + $0x68] sm:$0xff] (!%p291_p9)   ;;  %s10964_s21 = smov (!%p291_p9), [#allocation2]  }
  0x10   : > { %8434 = vmatprep.subr.bf16.mxu0 (!%p291_p9), %v10188_v2  ;;  %v10193_v7 = vld [vmem:[%s13516_s1 + $0x18] sm:$0xff] (!%p291_p9)   ;;  %v10195_v9 = vld [vmem:[%s13516_s1 + $0x20] sm:$0xff] (!%p291_p9)   ;;  %v10197_v12 = vld [vmem:[%s13516_s1 + $0x28] sm:$0xff] (!%p291_p9)   ;;  %s10902_s22 = sshll.u32 (!%p291_p9), %s10964_s21, 4  ;;  %s10903_s22 = int_to_ptr.vmem [resolvable:$false] %s10902_s22 }
  0x11   : > { %v10198_v13 = vld [vmem:[%s13516_s1 + $0x70] sm:$0xff] (!%p291_p9)   ;;  %v10200_v15 = vld [vmem:[%s13516_s1 + $0x78] sm:$0xff] (!%p291_p9)   ;;  %v10205_v17 = vld [vmem:[%s13516_s1 + $0xc0] sm:$0xff] (!%p291_p9)   ;;  %s10904_s23 = scalar_lea.vmem (!%p291_p9), %s10903_s22, 32 }
  0x12   : > { %v10199_v14 = vld [vmem:[%s13516_s1 + $0x30] sm:$0xff] (!%p291_p9)   ;;  %v10201_v16 = vld [vmem:[%s13516_s1 + $0x38] sm:$0xff] (!%p291_p9)   ;;  %v10206_v19 = vld [vmem:[%s13516_s1 + $0x80] sm:$0xff] (!%p291_p9)  }
  0x13   : > { %8435 = vmatpush3.bf16.msra.mxu0 (!%p291_p9), %v10189_v3  ;;  %v10210_v21 = vld [vmem:[%s13516_s1 + $0xc8] sm:$0xff] (!%p291_p9)   ;;  %v10215_v23 = vld [vmem:[%s13516_s1 + $0xd0] sm:$0xff] (!%p291_p9)   ;;  %v10220_v27 = vld [vmem:[%s13516_s1 + $0xd8] sm:$0xff] (!%p291_p9)  }
  0x14   : > { %8436 = vmatprep.subr.bf16.mxu0 (!%p291_p9), %v10190_v4  ;;  %v10211_v22 = vld [vmem:[%s13516_s1 + $0x88] sm:$0xff] (!%p291_p9)   ;;  %v10216_v26 = vld [vmem:[%s13516_s1 + $0x90] sm:$0xff] (!%p291_p9)   ;;  %v10221_v28 = vld [vmem:[%s13516_s1 + $0x98] sm:$0xff] (!%p291_p9)  }
  0x15   : > { %s326_s16 = scalar_select %p325_p10, %s11036_s13, 1  ;;  %v10225_v29 = vld [vmem:[%s13516_s1 + $0xe0] sm:$0xff]   ;;  %v10230_v33 = vld [vmem:[%s13516_s1 + $0xe8] sm:$0xff]   ;;  %v10235_v35 = vld [vmem:[%s13516_s1 + $0xf0] sm:$0xff]  }
  0x16   : > { %v10226_v32 = vld [vmem:[%s13516_s1 + $0xa0] sm:$0xff]   ;;  %v10231_v34 = vld [vmem:[%s13516_s1 + $0xa8] sm:$0xff]   ;;  %v10236_v38 = vld [vmem:[%s13516_s1 + $0xb0] sm:$0xff]  }
  0x17   : > { %s10144_s24 = smul.u32 1600, %s326_s16  ;;  %8437 = vmatpush3.bf16.msra.mxu0 %v10191_v5  ;;  %v10240_v39 = vld [vmem:[%s13516_s1 + $0xf8] sm:$0xff]   ;;  %v10245_v41 = vld [vmem:[%s13516_s1 + $0x140] sm:$0xff]   ;;  %v10250_v53 = vld [vmem:[%s13516_s1 + $0x148] sm:$0xff]   ;;  %s323_s16 = sand.u32 1, %s10952_s10  }
  0x18   : > { %8438 = vmatprep.subr.bf16.mxu0 %v10192_v6  ;;  %v10241_v40 = vld [vmem:[%s13516_s1 + $0xb8] sm:$0xff]   ;;  %v10246_v51 = vld [vmem:[%s13516_s1 + $0x100] sm:$0xff]   ;;  %v10251_v54 = vld [vmem:[%s13516_s1 + $0x108] sm:$0xff]   ;;  %s7356_s14 = scalar_lea.sflag [#allocation3], %s323_s16 }
  0x19   : > { %s11095_s17 = scalar_lea.vmem %s13515_s0, %s10144_s24  ;;  %v10255_v56 = vld [vmem:[%s13516_s1 + $0x150] sm:$0xff]   ;;  %v10260_v59 = vld [vmem:[%s13516_s1 + $0x158] sm:$0xff]   ;;  %v10265_v61 = vld [vmem:[%s13516_s1 + $0x160] sm:$0xff]   ;;  %s324_s24 = scalar_lea.vmem [#allocation2], %s323_s16 }
  0x1a   : > { %v10204_v11 = vld [vmem:[%s11095_s17 + $0x4] ss:$100 sps:$4 sm:$0xff]   ;;  %v10207_v20 = vld [vmem:[%s11095_s17 + $0xcc] ss:$100 sps:$4 sm:$0xff]   ;;  %v10212_v25 = vld [vmem:[%s11095_s17 + $0x194] ss:$100 sps:$4 sm:$0xff]  }
  0x1b   : > { %8439 = vmatpush3.bf16.msra.mxu0 %v10193_v7  ;;  %3179 = vmatprep.mubr.bf16.mxu0 %v10204_v11  ;;  %v10202_v18 = vld [vmem:[%s11095_s17] ss:$100 sps:$4 sm:$0xff]   ;;  %v10209_v24 = vld [vmem:[%s11095_s17 + $0xc8] ss:$100 sps:$4 sm:$0xff]   ;;  %v10214_v30 = vld [vmem:[%s11095_s17 + $0x190] ss:$100 sps:$4 sm:$0xff]  }
  0x1c   : > { %8440 = vmatprep.subr.bf16.mxu0 %v10194_v8  ;;  %v10217_v31 = vld [vmem:[%s11095_s17 + $0x25c] ss:$100 sps:$4 sm:$0xff]   ;;  %v10222_v37 = vld [vmem:[%s11095_s17 + $0x324] ss:$100 sps:$4 sm:$0xff]   ;;  %v10227_v43 = vld [vmem:[%s11095_s17 + $0x3ec] ss:$100 sps:$4 sm:$0xff]  }
  0x1d   : > { %v10219_v36 = vld [vmem:[%s11095_s17 + $0x258] ss:$100 sps:$4 sm:$0xff]   ;;  %v10224_v42 = vld [vmem:[%s11095_s17 + $0x320] ss:$100 sps:$4 sm:$0xff]   ;;  %v10229_v44 = vld [vmem:[%s11095_s17 + $0x3e8] ss:$100 sps:$4 sm:$0xff]  }
  0x1e   : > { %v10232_v45 = vld [vmem:[%s11095_s17 + $0x4b4] ss:$100 sps:$4 sm:$0xff]   ;;  %v10237_v47 = vld [vmem:[%s11095_s17 + $0x57c] ss:$100 sps:$4 sm:$0xff]   ;;  %v10244_v49 = vld [vmem:[%s11095_s17 + $0xc] ss:$100 sps:$4 sm:$0xff]  }
  0x1f   : > { %8441 = vmatpush3.bf16.msra.mxu0 %v10195_v9  ;;  %v10234_v46 = vld [vmem:[%s11095_s17 + $0x4b0] ss:$100 sps:$4 sm:$0xff]   ;;  %v10239_v48 = vld [vmem:[%s11095_s17 + $0x578] ss:$100 sps:$4 sm:$0xff]   ;;  %v10242_v50 = vld [vmem:[%s11095_s17 + $0x8] ss:$100 sps:$4 sm:$0xff]  }
  0x20   : > { %8442 = vmatprep.subr.bf16.mxu0 %v10196_v10  ;;  %v10247_v52 = vld [vmem:[%s11095_s17 + $0xd4] ss:$100 sps:$4 sm:$0xff]   ;;  %v10252_v57 = vld [vmem:[%s11095_s17 + $0x19c] ss:$100 sps:$4 sm:$0xff]   ;;  %v10257_v63 = vld [vmem:[%s11095_s17 + $0x264] ss:$100 sps:$4 sm:$0xff]  }
  0x21   : > { %v10249_v55 = vld [vmem:[%s11095_s17 + $0xd0] ss:$100 sps:$4 sm:$0xff]   ;;  %v10261_v60 = vld [vmem:[%s13516_s1 + $0x118] sm:$0xff]   ;;  %v10266_v0 = vld [vmem:[%s13516_s1 + $0x120] sm:$0xff]   ;;  %s7368_s27 = sshll.u32 %s324_s24, 4  ;;  %s13475_s27 = int_to_ptr.vmem [resolvable:$true] %s7368_s27 }
  0x22   : > { %v10256_v58 = vld [vmem:[%s13516_s1 + $0x110] sm:$0xff]   ;;  %v10254_v62 = vld [vmem:[%s11095_s17 + $0x198] ss:$100 sps:$4 sm:$0xff]   ;;  %v10270_v1 = vld [vmem:[%s13516_s1 + $0x168] sm:$0xff]   ;;  %s10898_s13 = scalar_lea.vmem %s13475_s27, 16  ;;  %p10905_p0 = scmp.lt.s32.totalorder %s13475_s27, %s10903_s22 }
  0x23   : > { %8443 = vmatpush3.bf16.msra.mxu0 %v10197_v12  ;;  %v10271_v2 = vld [vmem:[%s13516_s1 + $0x128] sm:$0xff]   ;;  %v10275_v3 = vld [vmem:[%s13516_s1 + $0x170] sm:$0xff]   ;;  %v10259_v4 = vld [vmem:[%s11095_s17 + $0x260] ss:$100 sps:$4 sm:$0xff]   ;;  %p10899_p11 = scmp.ne.s32.totalorder %s13475_s27, %s10898_s13  ;;  %p10906_p1 = scmp.lt.s32.totalorder %s10904_s23, %s10898_s13 }
  0x24   : > { %8444 = vmatprep.subr.bf16.mxu0 %v10198_v13  ;;  %v10262_v5 = vld [vmem:[%s11095_s17 + $0x32c] ss:$100 sps:$4 sm:$0xff]   ;;  %v10280_v7 = vld [vmem:[%s13516_s1 + $0x178] sm:$0xff]   ;;  %v10285_v9 = vld [vmem:[%s13516_s1 + $0x1c0] sm:$0xff]  }
  0x25   : > { %v10276_v6 = vld [vmem:[%s13516_s1 + $0x130] sm:$0xff]   ;;  %v10281_v8 = vld [vmem:[%s13516_s1 + $0x138] sm:$0xff]   ;;  %v10264_v10 = vld [vmem:[%s11095_s17 + $0x328] ss:$100 sps:$4 sm:$0xff]   ;;  %p10900_p12 = pnand %p10899_p11, %p11053_p5  ;;  %p10907_p2 = por %p10906_p1, %p10905_p0 }
  0x26   : > { %v10267_v11 = vld [vmem:[%s11095_s17 + $0x3f4] ss:$100 sps:$4 sm:$0xff]   ;;  %v10272_v13 = vld [vmem:[%s11095_s17 + $0x4bc] ss:$100 sps:$4 sm:$0xff]  }
  0x27   : > { %8445 = vmatpush3.bf16.msra.mxu0 %v10199_v14  ;;  %v10269_v12 = vld [vmem:[%s11095_s17 + $0x3f0] ss:$100 sps:$4 sm:$0xff]   ;;  %v10274_v14 = vld [vmem:[%s11095_s17 + $0x4b8] ss:$100 sps:$4 sm:$0xff]   ;;  %p10901_p13 = pneg %p10900_p12 }
  0x28   : > { %8446 = vmatprep.subr.bf16.mxu0 %v10200_v15  ;;  %v10277_v15 = vld [vmem:[%s11095_s17 + $0x584] ss:$100 sps:$4 sm:$0xff]  }
  0x29   : > { %p10908_p3 = pnand %p10907_p2, %p10901_p13 }
  0x2b   : > { %8447 = vmatpush3.bf16.msra.mxu0 %v10201_v16  ;;  %v10279_v16 = vld [vmem:[%s11095_s17 + $0x580] ss:$100 sps:$4 sm:$0xff]  }
  0x2c   : > { %8496 = vmatprep.subr.bf16.mxu0 %v10205_v17  ;;  %v10284_v17 = vld [vmem:[%s11095_s17 + $0x14] ss:$100 sps:$4 sm:$0xff]  }
  0x2e   : > { %3180 = vmatmul.mubr.bf16.vlgmr.msra.gmra.mrb[0].mxu0 %v10202_v18  ;;  %v10282_v18 = vld [vmem:[%s11095_s17 + $0x10] ss:$100 sps:$4 sm:$0xff]  }
  0x2f   : > { %8497 = vmatpush3.bf16.msra.mxu0 %v10206_v19  ;;  %3187 = vmatprep.mubr.bf16.mxu0 %v10207_v20  ;;  %v10286_v19 = vld [vmem:[%s13516_s1 + $0x180] sm:$0xff]  }
  0x30   : > { %8498 = vmatprep.subr.bf16.mxu0 %v10210_v21  ;;  %v10287_v20 = vld [vmem:[%s11095_s17 + $0xdc] ss:$100 sps:$4 sm:$0xff]   ;;  %v10290_v21 = vld [vmem:[%s13516_s1 + $0x1c8] sm:$0xff]  }
  0x33   : > { %8499 = vmatpush3.bf16.msra.mxu0 %v10211_v22  ;;  %v10291_v22 = vld [vmem:[%s13516_s1 + $0x188] sm:$0xff]  }
  0x34   : > { %8500 = vmatprep.subr.bf16.mxu0 %v10215_v23  ;;  %v10295_v23 = vld [vmem:[%s13516_s1 + $0x1d0] sm:$0xff]  }
  0x36   : > { %3188 = vmatmul.mubr.bf16.gmra.mrb[4].mxu0 %v10209_v24  ;;  %v10289_v24 = vld [vmem:[%s11095_s17 + $0xd8] ss:$100 sps:$4 sm:$0xff]  }
  0x37   : > { %3195 = vmatprep.mubr.bf16.mxu0 %v10212_v25  ;;  %8501 = vmatpush3.bf16.msra.mxu0 %v10216_v26  ;;  %v10292_v25 = vld [vmem:[%s11095_s17 + $0x1a4] ss:$100 sps:$4 sm:$0xff]   ;;  %v10296_v26 = vld [vmem:[%s13516_s1 + $0x190] sm:$0xff]  }
  0x38   : > { %8502 = vmatprep.subr.bf16.mxu0 %v10220_v27  ;;  %v10300_v27 = vld [vmem:[%s13516_s1 + $0x1d8] sm:$0xff]  }
  0x3b   : > { %8503 = vmatpush3.bf16.msra.mxu0 %v10221_v28  ;;  %v10301_v28 = vld [vmem:[%s13516_s1 + $0x198] sm:$0xff]  }
  0x3c   : > { %8504 = vmatprep.subr.bf16.mxu0 %v10225_v29  ;;  %v10305_v29 = vld [vmem:[%s13516_s1 + $0x1e0] sm:$0xff]  }
  0x3e   : > { %3196 = vmatmul.mubr.bf16.gmra.mrb[8].mxu0 %v10214_v30  ;;  %v10294_v30 = vld [vmem:[%s11095_s17 + $0x1a0] ss:$100 sps:$4 sm:$0xff]  }
  0x3f   : > { %3203 = vmatprep.mubr.bf16.mxu0 %v10217_v31  ;;  %8505 = vmatpush3.bf16.msra.mxu0 %v10226_v32  ;;  %v10297_v31 = vld [vmem:[%s11095_s17 + $0x26c] ss:$100 sps:$4 sm:$0xff]   ;;  %v10306_v32 = vld [vmem:[%s13516_s1 + $0x1a0] sm:$0xff]  }
  0x40   : > { %8506 = vmatprep.subr.bf16.mxu0 %v10230_v33  ;;  %v10310_v33 = vld [vmem:[%s13516_s1 + $0x1e8] sm:$0xff]  }
  0x43   : > { %8507 = vmatpush3.bf16.msra.mxu0 %v10231_v34  ;;  %v10311_v34 = vld [vmem:[%s13516_s1 + $0x1a8] sm:$0xff]  }
  0x44   : > { %8508 = vmatprep.subr.bf16.mxu0 %v10235_v35  ;;  %v10315_v35 = vld [vmem:[%s13516_s1 + $0x1f0] sm:$0xff]  }
  0x46   : > { %3204 = vmatmul.mubr.bf16.gmra.mrb[12].mxu0 %v10219_v36  ;;  %v10299_v36 = vld [vmem:[%s11095_s17 + $0x268] ss:$100 sps:$4 sm:$0xff]  }
  0x47   : > { %3211 = vmatprep.mubr.bf16.mxu0 %v10222_v37  ;;  %8509 = vmatpush3.bf16.msra.mxu0 %v10236_v38  ;;  %v10302_v37 = vld [vmem:[%s11095_s17 + $0x334] ss:$100 sps:$4 sm:$0xff]  }
  0x48   : > { %8510 = vmatprep.subr.bf16.mxu0 %v10240_v39  ;;  %v10316_v38 = vld [vmem:[%s13516_s1 + $0x1b0] sm:$0xff]   ;;  %v10320_v39 = vld [vmem:[%s13516_s1 + $0x1f8] sm:$0xff]  }
  0x4b   : > { %8511 = vmatpush3.bf16.msra.mxu0 %v10241_v40  ;;  %v10321_v40 = vld [vmem:[%s13516_s1 + $0x1b8] sm:$0xff]  }
  0x4c   : > { %8560 = vmatprep.subr.bf16.mxu0 %v10245_v41  ;;  %v10325_v41 = vld [vmem:[%s13516_s1 + $0x240] sm:$0xff]  }
  0x4e   : > { %3212 = vmatmul.mubr.bf16.gmra.mrb[16].mxu0 %v10224_v42  ;;  %v10304_v42 = vld [vmem:[%s11095_s17 + $0x330] ss:$100 sps:$4 sm:$0xff]  }
  0x4f   : > { %3219 = vmatprep.mubr.bf16.mxu0 %v10227_v43  ;;  %v10307_v43 = vld [vmem:[%s11095_s17 + $0x3fc] ss:$100 sps:$4 sm:$0xff]  }
  0x56   : > { %3220 = vmatmul.mubr.bf16.gmra.mrb[20].mxu0 %v10229_v44  ;;  %v10309_v44 = vld [vmem:[%s11095_s17 + $0x3f8] ss:$100 sps:$4 sm:$0xff]  }
  0x57   : > { %3227 = vmatprep.mubr.bf16.mxu0 %v10232_v45  ;;  %v10312_v45 = vld [vmem:[%s11095_s17 + $0x4c4] ss:$100 sps:$4 sm:$0xff]  }
  0x5e   : > { %3228 = vmatmul.mubr.bf16.gmra.mrb[24].mxu0 %v10234_v46  ;;  %v10314_v46 = vld [vmem:[%s11095_s17 + $0x4c0] ss:$100 sps:$4 sm:$0xff]  }
  0x5f   : > { %3235 = vmatprep.mubr.bf16.mxu0 %v10237_v47  ;;  %v10317_v47 = vld [vmem:[%s11095_s17 + $0x58c] ss:$100 sps:$4 sm:$0xff]  }
  0x66   : > { %3236 = vmatmul.mubr.bf16.gmra.mrb[28].mxu0 %v10239_v48  ;;  %v10319_v48 = vld [vmem:[%s11095_s17 + $0x588] ss:$100 sps:$4 sm:$0xff]  }
  0x67   : > { %3276 = vmatprep.mubr.bf16.mxu0 %v10244_v49  ;;  %v10324_v49 = vld [vmem:[%s11095_s17 + $0x1c] ss:$100 sps:$4 sm:$0xff]  }
  0x6e   : > { %3277 = vmatmul.mubr.bf16.vlgmr.msra.gmra.mrb[32].mxu0 %v10242_v50  ;;  %v10322_v50 = vld [vmem:[%s11095_s17 + $0x18] ss:$100 sps:$4 sm:$0xff]  }
  0x6f   : > { %8561 = vmatpush3.bf16.msra.mxu0 %v10246_v51  ;;  %3284 = vmatprep.mubr.bf16.mxu0 %v10247_v52  ;;  %v10326_v51 = vld [vmem:[%s13516_s1 + $0x200] sm:$0xff]  }
  0x70   : > { %8562 = vmatprep.subr.bf16.mxu0 %v10250_v53  ;;  %v10327_v52 = vld [vmem:[%s11095_s17 + $0xe4] ss:$100 sps:$4 sm:$0xff]  }
  0x71   : > { %v10330_v53 = vld [vmem:[%s13516_s1 + $0x248] sm:$0xff]  }
  0x73   : > { %8563 = vmatpush3.bf16.msra.mxu0 %v10251_v54  ;;  %v10331_v54 = vld [vmem:[%s13516_s1 + $0x208] sm:$0xff]  }
  0x74   : > { %8564 = vmatprep.subr.bf16.mxu0 %v10255_v56  ;;  %v10329_v56 = vld [vmem:[%s11095_s17 + $0xe0] ss:$100 sps:$4 sm:$0xff]  }
  0x76   : > { %3285 = vmatmul.mubr.bf16.gmra.mrb[36].mxu0 %v10249_v55  ;;  %v10335_v55 = vld [vmem:[%s13516_s1 + $0x250] sm:$0xff]  }
  0x77   : > { %3292 = vmatprep.mubr.bf16.mxu0 %v10252_v57  ;;  %8565 = vmatpush3.bf16.msra.mxu0 %v10256_v58  ;;  %v10332_v57 = vld [vmem:[%s11095_s17 + $0x1ac] ss:$100 sps:$4 sm:$0xff]  }
  0x78   : > { %8566 = vmatprep.subr.bf16.mxu0 %v10260_v59  ;;  %v10336_v58 = vld [vmem:[%s13516_s1 + $0x210] sm:$0xff]   ;;  %v10340_v59 = vld [vmem:[%s13516_s1 + $0x258] sm:$0xff]  }
  0x7b   : > { %8567 = vmatpush3.bf16.msra.mxu0 %v10261_v60  ;;  %v10341_v60 = vld [vmem:[%s13516_s1 + $0x218] sm:$0xff]  }
  0x7c   : > { %8568 = vmatprep.subr.bf16.mxu0 %v10265_v61  ;;  %v10345_v61 = vld [vmem:[%s13516_s1 + $0x260] sm:$0xff]  }
  0x7e   : > { %3293 = vmatmul.mubr.bf16.gmra.mrb[40].mxu0 %v10254_v62  ;;  %v10334_v62 = vld [vmem:[%s11095_s17 + $0x1a8] ss:$100 sps:$4 sm:$0xff]  }
  0x7f   : > { %3300 = vmatprep.mubr.bf16.mxu0 %v10257_v63  ;;  %8569 = vmatpush3.bf16.msra.mxu0 %v10266_v0  ;;  %v10337_v63 = vld [vmem:[%s11095_s17 + $0x274] ss:$100 sps:$4 sm:$0xff]   ;;  %v10346_v0 = vld [vmem:[%s13516_s1 + $0x220] sm:$0xff]  }
  0x80   : > { %8570 = vmatprep.subr.bf16.mxu0 %v10270_v1  ;;  %v10350_v1 = vld [vmem:[%s13516_s1 + $0x268] sm:$0xff]  }
  0x83   : > { %8571 = vmatpush3.bf16.msra.mxu0 %v10271_v2  ;;  %v10351_v2 = vld [vmem:[%s13516_s1 + $0x228] sm:$0xff]  }
  0x84   : > { %8572 = vmatprep.subr.bf16.mxu0 %v10275_v3  ;;  %v10355_v3 = vld [vmem:[%s13516_s1 + $0x270] sm:$0xff]  }
  0x86   : > { %3301 = vmatmul.mubr.bf16.gmra.mrb[44].mxu0 %v10259_v4  ;;  %v10339_v4 = vld [vmem:[%s11095_s17 + $0x270] ss:$100 sps:$4 sm:$0xff]  }
  0x87   : > { %3308 = vmatprep.mubr.bf16.mxu0 %v10262_v5  ;;  %8573 = vmatpush3.bf16.msra.mxu0 %v10276_v6  ;;  %v10342_v6 = vld [vmem:[%s11095_s17 + $0x33c] ss:$100 sps:$4 sm:$0xff]  }
  0x88   : > { %8574 = vmatprep.subr.bf16.mxu0 %v10280_v7 }
  0x8b   : > { %8575 = vmatpush3.bf16.msra.mxu0 %v10281_v8 }
  0x8c   : > { %8624 = vmatprep.subr.bf16.mxu0 %v10285_v9 }
  0x8e   : > { %3309 = vmatmul.mubr.bf16.gmra.mrb[48].mxu0 %v10264_v10  ;;  %v10356_v10 = vld [vmem:[%s13516_s1 + $0x230] sm:$0xff]  }
  0x8f   : > { %3316 = vmatprep.mubr.bf16.mxu0 %v10267_v11 }
  0x96   : > { %3317 = vmatmul.mubr.bf16.gmra.mrb[52].mxu0 %v10269_v12  ;;  %v10360_v12 = vld [vmem:[%s13516_s1 + $0x278] sm:$0xff]  }
  0x97   : > { %3324 = vmatprep.mubr.bf16.mxu0 %v10272_v13 }
  0x9e   : > { %3325 = vmatmul.mubr.bf16.gmra.mrb[56].mxu0 %v10274_v14  ;;  %v10361_v14 = vld [vmem:[%s13516_s1 + $0x238] sm:$0xff]  }
  0x9f   : > { %3332 = vmatprep.mubr.bf16.mxu0 %v10277_v15  ;;  %v10365_v15 = vld [vmem:[%s13516_s1 + $0x2c0] sm:$0xff]  }
  0xa6   : > { %3333 = vmatmul.mubr.bf16.gmra.mrb[60].mxu0 %v10279_v16  ;;  %v10344_v16 = vld [vmem:[%s11095_s17 + $0x338] ss:$100 sps:$4 sm:$0xff]  }
  0xa7   : > { %3373 = vmatprep.mubr.bf16.mxu0 %v10284_v17 }
  0xae   : > { %3374 = vmatmul.mubr.bf16.vlgmr.msra.gmra.mrb[64].mxu0 %v10282_v18 }
  0xaf   : > { %8625 = vmatpush3.bf16.msra.mxu0 %v10286_v19  ;;  %3381 = vmatprep.mubr.bf16.mxu0 %v10287_v20 }
  0xb0   : > { %8626 = vmatprep.subr.bf16.mxu0 %v10290_v21  ;;  %v10347_v21 = vld [vmem:[%s11095_s17 + $0x404] ss:$100 sps:$4 sm:$0xff]  }
  0xb3   : > { %8627 = vmatpush3.bf16.msra.mxu0 %v10291_v22 }
  0xb4   : > { %8628 = vmatprep.subr.bf16.mxu0 %v10295_v23 }
  0xb6   : > { %3382 = vmatmul.mubr.bf16.gmra.mrb[68].mxu0 %v10289_v24  ;;  %v10349_v24 = vld [vmem:[%s11095_s17 + $0x400] ss:$100 sps:$4 sm:$0xff]  }
  0xb7   : > { %3389 = vmatprep.mubr.bf16.mxu0 %v10292_v25  ;;  %8629 = vmatpush3.bf16.msra.mxu0 %v10296_v26 }
  0xb8   : > { %8630 = vmatprep.subr.bf16.mxu0 %v10300_v27 }
  0xbb   : > { %8631 = vmatpush3.bf16.msra.mxu0 %v10301_v28 }
  0xbc   : > { %8632 = vmatprep.subr.bf16.mxu0 %v10305_v29  ;;  %v10352_v29 = vld [vmem:[%s11095_s17 + $0x4cc] ss:$100 sps:$4 sm:$0xff]  }
  0xbe   : > { %3390 = vmatmul.mubr.bf16.gmra.mrb[72].mxu0 %v10294_v30 }
  0xbf   : > { %3397 = vmatprep.mubr.bf16.mxu0 %v10297_v31  ;;  %8633 = vmatpush3.bf16.msra.mxu0 %v10306_v32  ;;  %v10354_v32 = vld [vmem:[%s11095_s17 + $0x4c8] ss:$100 sps:$4 sm:$0xff]  }
  0xc0   : > { %8634 = vmatprep.subr.bf16.mxu0 %v10310_v33 }
  0xc3   : > { %8635 = vmatpush3.bf16.msra.mxu0 %v10311_v34 }
  0xc4   : > { %8636 = vmatprep.subr.bf16.mxu0 %v10315_v35 }
  0xc6   : > { %3398 = vmatmul.mubr.bf16.gmra.mrb[76].mxu0 %v10299_v36 }
  0xc7   : > { %3405 = vmatprep.mubr.bf16.mxu0 %v10302_v37  ;;  %8637 = vmatpush3.bf16.msra.mxu0 %v10316_v38  ;;  %v10357_v37 = vld [vmem:[%s11095_s17 + $0x594] ss:$100 sps:$4 sm:$0xff]  }
  0xc8   : > { %8638 = vmatprep.subr.bf16.mxu0 %v10320_v39 }
  0xcb   : > { %8639 = vmatpush3.bf16.msra.mxu0 %v10321_v40  ;;  %v10359_v40 = vld [vmem:[%s11095_s17 + $0x590] ss:$100 sps:$4 sm:$0xff]  }
  0xcc   : > { %8688 = vmatprep.subr.bf16.mxu0 %v10325_v41 }
  0xce   : > { %3406 = vmatmul.mubr.bf16.gmra.mrb[80].mxu0 %v10304_v42 }
  0xcf   : > { %3413 = vmatprep.mubr.bf16.mxu0 %v10307_v43 }
  0xd6   : > { %3414 = vmatmul.mubr.bf16.gmra.mrb[84].mxu0 %v10309_v44 }
  0xd7   : > { %3421 = vmatprep.mubr.bf16.mxu0 %v10312_v45  ;;  %v10364_v45 = vld [vmem:[%s11095_s17 + $0x24] ss:$100 sps:$4 sm:$0xff]  }
  0xde   : > { %3422 = vmatmul.mubr.bf16.gmra.mrb[88].mxu0 %v10314_v46 }
  0xdf   : > { %3429 = vmatprep.mubr.bf16.mxu0 %v10317_v47 }
  0xe6   : > { %3430 = vmatmul.mubr.bf16.gmra.mrb[92].mxu0 %v10319_v48  ;;  %v10362_v48 = vld [vmem:[%s11095_s17 + $0x20] ss:$100 sps:$4 sm:$0xff]  }
  0xe7   : > { %3470 = vmatprep.mubr.bf16.mxu0 %v10324_v49 }
  0xee   : > { %3471 = vmatmul.mubr.bf16.vlgmr.msra.gmra.mrb[96].mxu0 %v10322_v50 }
  0xef   : > { %8689 = vmatpush3.bf16.msra.mxu0 %v10326_v51  ;;  %3478 = vmatprep.mubr.bf16.mxu0 %v10327_v52 }
  0xf0   : > { %8690 = vmatprep.subr.bf16.mxu0 %v10330_v53  ;;  %v10366_v53 = vld [vmem:[%s13516_s1 + $0x280] sm:$0xff]  }
  0xf3   : > { %8691 = vmatpush3.bf16.msra.mxu0 %v10331_v54  ;;  %v10367_v54 = vld [vmem:[%s11095_s17 + $0xec] ss:$100 sps:$4 sm:$0xff]  }
  0xf4   : > { %8692 = vmatprep.subr.bf16.mxu0 %v10335_v55 }
  0xf6   : > { %3479 = vmatmul.mubr.bf16.gmra.mrb[100].mxu0 %v10329_v56  ;;  %v10370_v56 = vld [vmem:[%s13516_s1 + $0x2c8] sm:$0xff]  }
  0xf7   : > { %3486 = vmatprep.mubr.bf16.mxu0 %v10332_v57  ;;  %8693 = vmatpush3.bf16.msra.mxu0 %v10336_v58  ;;  %v10371_v58 = vld [vmem:[%s13516_s1 + $0x288] sm:$0xff]  }
  0xf8   : > { %8694 = vmatprep.subr.bf16.mxu0 %v10340_v59  ;;  %v10375_v59 = vld [vmem:[%s13516_s1 + $0x2d0] sm:$0xff]  }
  0xfb   : > { %8695 = vmatpush3.bf16.msra.mxu0 %v10341_v60  ;;  %v10369_v60 = vld [vmem:[%s11095_s17 + $0xe8] ss:$100 sps:$4 sm:$0xff]  }
  0xfc   : > { %8696 = vmatprep.subr.bf16.mxu0 %v10345_v61 }
  0xfe   : > { %3487 = vmatmul.mubr.bf16.gmra.mrb[104].mxu0 %v10334_v62 }
  0xff   : > { %3494 = vmatprep.mubr.bf16.mxu0 %v10337_v63  ;;  %8697 = vmatpush3.bf16.msra.mxu0 %v10346_v0 }
 0x100   : > { %8698 = vmatprep.subr.bf16.mxu0 %v10350_v1  ;;  %v10372_v1 = vld [vmem:[%s11095_s17 + $0x1b4] ss:$100 sps:$4 sm:$0xff]  }
 0x101   : > { %v8448_v5 = vpop.f32.mrb[0].mxu0 }
 0x102   : > { %v8449_v7 = vpop.f32.mrb[1].mxu0 }
 0x103   : > { %v11358_v8 = vadd.f32 %v8449_v7, %v8448_v5  ;;  %v8451_v9 = vpop.f32.mrb[2].mxu0  ;;  %8699 = vmatpush3.bf16.msra.mxu0 %v10351_v2  ;;  %v10376_v2 = vld [vmem:[%s13516_s1 + $0x290] sm:$0xff]   ;;  %v10385_v7 = vld [vmem:[%s13516_s1 + $0x2e0] sm:$0xff]  }
 0x104   : > { %v8452_v11 = vpop.f32.mrb[3].mxu0  ;;  %8700 = vmatprep.subr.bf16.mxu0 %v10355_v3 }
 0x105   : > { %v11366_v13 = vadd.f32 %v8452_v11, %v8451_v9  ;;  %v10374_v9 = vld [vmem:[%s11095_s17 + $0x1b0] ss:$100 sps:$4 sm:$0xff]  }
 0x106   : > { %3495 = vmatmul.mubr.bf16.gmra.mrb[108].mxu0 %v10339_v4  ;;  %v10380_v4 = vld [vmem:[%s13516_s1 + $0x2d8] sm:$0xff]  }
 0x107   : > { %3502 = vmatprep.mubr.bf16.mxu0 %v10342_v6  ;;  %8701 = vmatpush3.bf16.msra.mxu0 %v10356_v10  ;;  %v10381_v6 = vld [vmem:[%s13516_s1 + $0x298] sm:$0xff]  }
 0x108   : > { %8702 = vmatprep.subr.bf16.mxu0 %v10360_v12 }
 0x109   : > { %v8454_v17 = vpop.f32.mrb[4].mxu0 }
 0x10a   : > { %v8455_v18 = vpop.f32.mrb[5].mxu0 }
 0x10b   : > { %v11375_v19 = vadd.f32 %v8455_v18, %v8454_v17  ;;  %v8457_v20 = vpop.f32.mrb[6].mxu0  ;;  %8703 = vmatpush3.bf16.msra.mxu0 %v10361_v14  ;;  %v10390_v18 = vld [vmem:[%s13516_s1 + $0x2e8] sm:$0xff]  }
 0x10c   : > { %v8458_v22 = vpop.f32.mrb[7].mxu0  ;;  %8752 = vmatprep.subr.bf16.mxu0 %v10365_v15  ;;  %v10377_v15 = vld [vmem:[%s11095_s17 + $0x27c] ss:$100 sps:$4 sm:$0xff]  }
 0x10d   : > { %v11378_v23 = vadd.f32 %v8458_v22, %v8457_v20  ;;  %v10395_v22 = vld [vmem:[%s13516_s1 + $0x2f0] sm:$0xff]  }
 0x10e   : > { %3503 = vmatmul.mubr.bf16.gmra.mrb[112].mxu0 %v10344_v16  ;;  %v10386_v16 = vld [vmem:[%s13516_s1 + $0x2a0] sm:$0xff]  }
 0x10f   : > { %3510 = vmatprep.mubr.bf16.mxu0 %v10347_v21  ;;  %v10391_v21 = vld [vmem:[%s13516_s1 + $0x2a8] sm:$0xff]  }
 0x111   : > { %v8460_v25 = vpop.f32.mrb[8].mxu0 }
 0x112   : > { %v8461_v26 = vpop.f32.mrb[9].mxu0 }
 0x113   : > { %v11381_v27 = vadd.f32 %v8461_v26, %v8460_v25  ;;  %v8463_v28 = vpop.f32.mrb[10].mxu0 }
 0x114   : > { %v8464_v30 = vpop.f32.mrb[11].mxu0 }
 0x115   : > { %v11384_v31 = vadd.f32 %v8464_v30, %v8463_v28  ;;  %v10382_v30 = vld [vmem:[%s11095_s17 + $0x344] ss:$100 sps:$4 sm:$0xff]  }
 0x116   : > { %3511 = vmatmul.mubr.bf16.gmra.mrb[116].mxu0 %v10349_v24  ;;  %v10379_v24 = vld [vmem:[%s11095_s17 + $0x278] ss:$100 sps:$4 sm:$0xff]  }
 0x117   : > { %3518 = vmatprep.mubr.bf16.mxu0 %v10352_v29 }
 0x119   : > { %v8466_v33 = vpop.f32.mrb[12].mxu0 }
 0x11a   : > { %v8467_v34 = vpop.f32.mrb[13].mxu0 }
 0x11b   : > { %v11387_v35 = vadd.f32 %v8467_v34, %v8466_v33  ;;  %v8469_v36 = vpop.f32.mrb[14].mxu0  ;;  %v10400_v34 = vld [vmem:[%s13516_s1 + $0x2f8] sm:$0xff]  }
 0x11c   : > { %v8470_v38 = vpop.f32.mrb[15].mxu0 }
 0x11d   : > { %v11390_v39 = vadd.f32 %v8470_v38, %v8469_v36 }
 0x11e   : > { %3519 = vmatmul.mubr.bf16.gmra.mrb[120].mxu0 %v10354_v32  ;;  %v10396_v32 = vld [vmem:[%s13516_s1 + $0x2b0] sm:$0xff]  }
 0x11f   : > { %3526 = vmatprep.mubr.bf16.mxu0 %v10357_v37 }
 0x121   : > { %v8472_v41 = vpop.f32.mrb[16].mxu0 }
 0x122   : > { %v8473_v42 = vpop.f32.mrb[17].mxu0 }
 0x123   : > { %v11393_v43 = vadd.f32 %v8473_v42, %v8472_v41  ;;  %v8475_v44 = vpop.f32.mrb[18].mxu0  ;;  %v10405_v41 = vld [vmem:[%s13516_s1 + $0x340] sm:$0xff]  }
 0x124   : > { %v8476_v46 = vpop.f32.mrb[19].mxu0  ;;  %v10384_v42 = vld [vmem:[%s11095_s17 + $0x340] ss:$100 sps:$4 sm:$0xff]  }
 0x125   : > { %v11396_v47 = vadd.f32 %v8476_v46, %v8475_v44 }
 0x126   : > { %3527 = vmatmul.mubr.bf16.gmra.mrb[124].mxu0 %v10359_v40  ;;  %v10401_v40 = vld [vmem:[%s13516_s1 + $0x2b8] sm:$0xff]  }
 0x127   : > { %3567 = vmatprep.mubr.bf16.mxu0 %v10364_v45 }
 0x129   : > { %v8478_v49 = vpop.f32.mrb[20].mxu0 }
 0x12a   : > { %v8479_v50 = vpop.f32.mrb[21].mxu0 }
 0x12b   : > { %v11399_v51 = vadd.f32 %v8479_v50, %v8478_v49  ;;  %v8481_v52 = vpop.f32.mrb[22].mxu0 }
 0x12c   : > { %v8482_v55 = vpop.f32.mrb[23].mxu0 }
 0x12d   : > { %v11408_v57 = vadd.f32 %v8482_v55, %v8481_v52 }
 0x12e   : > { %3568 = vmatmul.mubr.bf16.vlgmr.msra.gmra.mrb[128].mxu0 %v10362_v48 }
 0x12f   : > { %8753 = vmatpush3.bf16.msra.mxu0 %v10366_v53  ;;  %3575 = vmatprep.mubr.bf16.mxu0 %v10367_v54  ;;  %v10389_v53 = vld [vmem:[%s11095_s17 + $0x408] ss:$100 sps:$4 sm:$0xff]  }
 0x130   : > { %8754 = vmatprep.subr.bf16.mxu0 %v10370_v56 }
 0x131   : > { %v8484_v61 = vpop.f32.mrb[24].mxu0 }
 0x132   : > { %v8485_v62 = vpop.f32.mrb[25].mxu0 }
 0x133   : > { %v11417_v63 = vadd.f32 %v8485_v62, %v8484_v61  ;;  %v8487_v0 = vpop.f32.mrb[26].mxu0  ;;  %8755 = vmatpush3.bf16.msra.mxu0 %v10371_v58 }
 0x134   : > { %v8488_v3 = vpop.f32.mrb[27].mxu0  ;;  %8756 = vmatprep.subr.bf16.mxu0 %v10375_v59  ;;  %v10392_v59 = vld [vmem:[%s11095_s17 + $0x4d4] ss:$100 sps:$4 sm:$0xff]  }
 0x135   : > { %v11426_v5 = vadd.f32 %v8488_v3, %v8487_v0 }
 0x136   : > { %3576 = vmatmul.mubr.bf16.gmra.mrb[132].mxu0 %v10369_v60 }
 0x137   : > { %3583 = vmatprep.mubr.bf16.mxu0 %v10372_v1  ;;  %8757 = vmatpush3.bf16.msra.mxu0 %v10376_v2 }
 0x138   : > { %8758 = vmatprep.subr.bf16.mxu0 %v10380_v4  ;;  %v10397_v4 = vld [vmem:[%s11095_s17 + $0x59c] ss:$100 sps:$4 sm:$0xff]  }
 0x139   : > { %v8490_v10 = vpop.f32.mrb[28].mxu0 }
 0x13a   : > { %v8491_v11 = vpop.f32.mrb[29].mxu0 }
 0x13b   : > { %v11435_v12 = vadd.f32 %v8491_v11, %v8490_v10  ;;  %v8493_v14 = vpop.f32.mrb[30].mxu0  ;;  %8759 = vmatpush3.bf16.msra.mxu0 %v10381_v6 }
 0x13c   : > { %v8494_v17 = vpop.f32.mrb[31].mxu0  ;;  %8760 = vmatprep.subr.bf16.mxu0 %v10385_v7 }
 0x13d   : > { %v11444_v20 = vadd.f32 %v8494_v17, %v8493_v14 }
 0x13e   : > { %3584 = vmatmul.mubr.bf16.gmra.mrb[136].mxu0 %v10374_v9 }
 0x13f   : > { %3591 = vmatprep.mubr.bf16.mxu0 %v10377_v15  ;;  %8761 = vmatpush3.bf16.msra.mxu0 %v10386_v16  ;;  %v10404_v16 = vld [vmem:[%s11095_s17 + $0x2c] ss:$100 sps:$4 sm:$0xff]  }
 0x140   : > { %8762 = vmatprep.subr.bf16.mxu0 %v10390_v18 }
 0x141   : > { %v8512_v25 = vpop.f32.mrb[32].mxu0 }
 0x142   : > { %v8513_v26 = vpop.f32.mrb[33].mxu0 }
 0x143   : > { %v8514_v28 = vadd.f32 %v8513_v26, %v8512_v25  ;;  %v8515_v29 = vpop.f32.mrb[34].mxu0  ;;  %8763 = vmatpush3.bf16.msra.mxu0 %v10391_v21 }
 0x144   : > { %v8516_v33 = vpop.f32.mrb[35].mxu0  ;;  %8764 = vmatprep.subr.bf16.mxu0 %v10395_v22 }
 0x145   : > { %v11461_v36 = vadd.f32 %v8514_v28, %v11358_v8  ;;  %v8517_v37 = vadd.f32 %v8516_v33, %v8515_v29  ;;  %v10406_v28 = vld [vmem:[%s13516_s1 + $0x300] sm:$0xff]   ;;  %v10407_v29 = vld [vmem:[%s11095_s17 + $0xf4] ss:$100 sps:$4 sm:$0xff]   ;;  %v10411_v33 = vld [vmem:[%s13516_s1 + $0x308] sm:$0xff]  }
 0x146   : > { %3592 = vmatmul.mubr.bf16.gmra.mrb[140].mxu0 %v10379_v24 }
 0x147   : > { %v11464_v38 = vadd.f32 %v8517_v37, %v11366_v13  ;;  %3599 = vmatprep.mubr.bf16.mxu0 %v10382_v30  ;;  %8765 = vmatpush3.bf16.msra.mxu0 %v10396_v32  ;;  %v10387_v13 = vld [vmem:[%s11095_s17 + $0x40c] ss:$100 sps:$4 sm:$0xff]  }
 0x148   : > { %8766 = vmatprep.subr.bf16.mxu0 %v10400_v34  ;;  %v10415_v34 = vld [vmem:[%s13516_s1 + $0x350] sm:$0xff]  }
 0x149   : > { %v8518_v8 = vpop.f32.mrb[36].mxu0 }
 0x14a   : > { %v8519_v44 = vpop.f32.mrb[37].mxu0 }
 0x14b   : > { %v8520_v45 = vadd.f32 %v8519_v44, %v8518_v8  ;;  %v8521_v46 = vpop.f32.mrb[38].mxu0  ;;  %8767 = vmatpush3.bf16.msra.mxu0 %v10401_v40  ;;  %v10409_v40 = vld [vmem:[%s11095_s17 + $0xf0] ss:$100 sps:$4 sm:$0xff]   ;;  %v10412_v44 = vld [vmem:[%s11095_s17 + $0x1bc] ss:$100 sps:$4 sm:$0xff]  }
 0x14c   : > { %v8522_v48 = vpop.f32.mrb[39].mxu0  ;;  %8816 = vmatprep.subr.bf16.mxu0 %v10405_v41 }
 0x14d   : > { %v11475_v49 = vadd.f32 %v8520_v45, %v11375_v19  ;;  %v8523_v50 = vadd.f32 %v8522_v48, %v8521_v46  ;;  %v10416_v45 = vld [vmem:[%s13516_s1 + $0x310] sm:$0xff]  }
 0x14e   : > { %3600 = vmatmul.mubr.bf16.gmra.mrb[144].mxu0 %v10384_v42 }
 0x14f   : > { %v11478_v52 = vadd.f32 %v8523_v50, %v11378_v23  ;;  %3607 = vmatprep.mubr.bf16.mxu0 %v10387_v13  ;;  %v10394_v23 = vld [vmem:[%s11095_s17 + $0x4d0] ss:$100 sps:$4 sm:$0xff]   ;;  %v10421_v50 = vld [vmem:[%s13516_s1 + $0x318] sm:$0xff]  }
 0x151   : > { %v8524_v54 = vpop.f32.mrb[40].mxu0 }
 0x152   : > { %v8525_v55 = vpop.f32.mrb[41].mxu0 }
 0x153   : > { %v8526_v56 = vadd.f32 %v8525_v55, %v8524_v54  ;;  %v8527_v58 = vpop.f32.mrb[42].mxu0  ;;  %v10414_v55 = vld [vmem:[%s11095_s17 + $0x1b8] ss:$100 sps:$4 sm:$0xff]  }
 0x154   : > { %v8528_v60 = vpop.f32.mrb[43].mxu0 }
 0x155   : > { %v11483_v61 = vadd.f32 %v8526_v56, %v11381_v27  ;;  %v8529_v19 = vadd.f32 %v8528_v60, %v8527_v58  ;;  %v10417_v60 = vld [vmem:[%s11095_s17 + $0x284] ss:$100 sps:$4 sm:$0xff]  }
 0x156   : > { %3608 = vmatmul.mubr.bf16.gmra.mrb[148].mxu0 %v10389_v53  ;;  %v10425_v53 = vld [vmem:[%s13516_s1 + $0x360] sm:$0xff]  }
 0x157   : > { %v11486_v62 = vadd.f32 %v8529_v19, %v11384_v31  ;;  %3615 = vmatprep.mubr.bf16.mxu0 %v10392_v59  ;;  %v10399_v31 = vld [vmem:[%s11095_s17 + $0x598] ss:$100 sps:$4 sm:$0xff]   ;;  %v10426_v19 = vld [vmem:[%s13516_s1 + $0x320] sm:$0xff]  }
 0x159   : > { %v8530_v0 = vpop.f32.mrb[44].mxu0 }
 0x15a   : > { %v8531_v1 = vpop.f32.mrb[45].mxu0 }
 0x15b   : > { %v8532_v2 = vadd.f32 %v8531_v1, %v8530_v0  ;;  %v8533_v3 = vpop.f32.mrb[46].mxu0 }
 0x15c   : > { %v8534_v6 = vpop.f32.mrb[47].mxu0 }
 0x15d   : > { %v11491_v7 = vadd.f32 %v8532_v2, %v11387_v35  ;;  %v8535_v27 = vadd.f32 %v8534_v6, %v8533_v3  ;;  %v10431_v2 = vld [vmem:[%s13516_s1 + $0x328] sm:$0xff]   ;;  %v10435_v3 = vld [vmem:[%s13516_s1 + $0x370] sm:$0xff]   ;;  %v10419_v6 = vld [vmem:[%s11095_s17 + $0x280] ss:$100 sps:$4 sm:$0xff]  }
 0x15e   : > { %3616 = vmatmul.mubr.bf16.gmra.mrb[152].mxu0 %v10394_v23 }
 0x15f   : > { %v11494_v9 = vadd.f32 %v8535_v27, %v11390_v39  ;;  %3623 = vmatprep.mubr.bf16.mxu0 %v10397_v4  ;;  %v10402_v39 = vld [vmem:[%s11095_s17 + $0x28] ss:$100 sps:$4 sm:$0xff]  }
 0x161   : > { %v8536_v10 = vpop.f32.mrb[48].mxu0 }
 0x162   : > { %v8537_v11 = vpop.f32.mrb[49].mxu0 }
 0x163   : > { %v8538_v14 = vadd.f32 %v8537_v11, %v8536_v10  ;;  %v8539_v15 = vpop.f32.mrb[50].mxu0  ;;  %v10422_v11 = vld [vmem:[%s11095_s17 + $0x34c] ss:$100 sps:$4 sm:$0xff]  }
 0x164   : > { %v8540_v17 = vpop.f32.mrb[51].mxu0 }
 0x165   : > { %v11499_v18 = vadd.f32 %v8538_v14, %v11393_v43  ;;  %v8541_v35 = vadd.f32 %v8540_v17, %v8539_v15  ;;  %v10410_v43 = vld [vmem:[%s13516_s1 + $0x348] sm:$0xff]   ;;  %v10436_v14 = vld [vmem:[%s13516_s1 + $0x330] sm:$0xff]  }
 0x166   : > { %3624 = vmatmul.mubr.bf16.gmra.mrb[156].mxu0 %v10399_v31 }
 0x167   : > { %v11502_v21 = vadd.f32 %v8541_v35, %v11396_v47  ;;  %3664 = vmatprep.mubr.bf16.mxu0 %v10404_v16  ;;  %v10441_v35 = vld [vmem:[%s13516_s1 + $0x338] sm:$0xff]  }
 0x169   : > { %v8542_v22 = vpop.f32.mrb[52].mxu0 }
 0x16a   : > { %v8543_v24 = vpop.f32.mrb[53].mxu0 }
 0x16b   : > { %v8544_v25 = vadd.f32 %v8543_v24, %v8542_v22  ;;  %v8545_v26 = vpop.f32.mrb[54].mxu0  ;;  %v10424_v24 = vld [vmem:[%s11095_s17 + $0x348] ss:$100 sps:$4 sm:$0xff]  }
 0x16c   : > { %v8546_v30 = vpop.f32.mrb[55].mxu0 }
 0x16d   : > { %v11513_v47 = vadd.f32 %v8544_v25, %v11399_v51  ;;  %v8547_v32 = vadd.f32 %v8546_v30, %v8545_v26 }
 0x16e   : > { %3665 = vmatmul.mubr.bf16.vlgmr.msra.gmra.mrb[160].mxu0 %v10402_v39  ;;  %v10445_v39 = vld [vmem:[%s13516_s1 + $0x3c0] sm:$0xff]  }
 0x16f   : > { %v11522_v37 = vadd.f32 %v8547_v32, %v11408_v57  ;;  %8817 = vmatpush3.bf16.msra.mxu0 %v10406_v28  ;;  %3672 = vmatprep.mubr.bf16.mxu0 %v10407_v29  ;;  %v10420_v57 = vld [vmem:[%s13516_s1 + $0x358] sm:$0xff]  }
 0x170   : > { %8818 = vmatprep.subr.bf16.mxu0 %v10410_v43  ;;  %v10427_v29 = vld [vmem:[%s11095_s17 + $0x414] ss:$100 sps:$4 sm:$0xff]  }
 0x171   : > { %v8548_v41 = vpop.f32.mrb[56].mxu0 }
 0x172   : > { %v8549_v51 = vpop.f32.mrb[57].mxu0 }
 0x173   : > { %v8550_v42 = vadd.f32 %v8549_v51, %v8548_v41  ;;  %v8551_v8 = vpop.f32.mrb[58].mxu0  ;;  %8819 = vmatpush3.bf16.msra.mxu0 %v10411_v33  ;;  %v10429_v33 = vld [vmem:[%s11095_s17 + $0x410] ss:$100 sps:$4 sm:$0xff]  }
 0x174   : > { %v8552_v46 = vpop.f32.mrb[59].mxu0  ;;  %8820 = vmatprep.subr.bf16.mxu0 %v10415_v34 }
 0x175   : > { %v11533_v13 = vadd.f32 %v8550_v42, %v11417_v63  ;;  %v8553_v48 = vadd.f32 %v8552_v46, %v8551_v8  ;;  %v10432_v42 = vld [vmem:[%s11095_s17 + $0x4dc] ss:$100 sps:$4 sm:$0xff]  }
 0x176   : > { %3673 = vmatmul.mubr.bf16.gmra.mrb[164].mxu0 %v10409_v40 }
 0x177   : > { %v11542_v54 = vadd.f32 %v8553_v48, %v11426_v5  ;;  %3680 = vmatprep.mubr.bf16.mxu0 %v10412_v44  ;;  %8821 = vmatpush3.bf16.msra.mxu0 %v10416_v45  ;;  %v10430_v5 = vld [vmem:[%s13516_s1 + $0x368] sm:$0xff]  }
 0x178   : > { %8822 = vmatprep.subr.bf16.mxu0 %v10420_v57 }
 0x179   : > { %v8554_v56 = vpop.f32.mrb[60].mxu0 }
 0x17a   : > { %v8555_v63 = vpop.f32.mrb[61].mxu0 }
 0x17b   : > { %v8556_v58 = vadd.f32 %v8555_v63, %v8554_v56  ;;  %v8557_v59 = vpop.f32.mrb[62].mxu0  ;;  %8823 = vmatpush3.bf16.msra.mxu0 %v10421_v50 }
 0x17c   : > { %v8558_v23 = vpop.f32.mrb[63].mxu0  ;;  %8824 = vmatprep.subr.bf16.mxu0 %v10425_v53  ;;  %v10437_v53 = vld [vmem:[%s11095_s17 + $0x5a4] ss:$100 sps:$4 sm:$0xff]  }
 0x17d   : > { %v11553_v0 = vadd.f32 %v8556_v58, %v11435_v12  ;;  %v8559_v1 = vadd.f32 %v8558_v23, %v8557_v59  ;;  %v10444_v23 = vld [vmem:[%s11095_s17 + $0x34] ss:$100 sps:$4 sm:$0xff]  }
 0x17e   : > { %3681 = vmatmul.mubr.bf16.gmra.mrb[168].mxu0 %v10414_v55 }
 0x17f   : > { %v11562_v4 = vadd.f32 %v8559_v1, %v11444_v20  ;;  %3688 = vmatprep.mubr.bf16.mxu0 %v10417_v60  ;;  %8825 = vmatpush3.bf16.msra.mxu0 %v10426_v19  ;;  %v10440_v20 = vld [vmem:[%s13516_s1 + $0x378] sm:$0xff]  }
 0x180   : > { %8826 = vmatprep.subr.bf16.mxu0 %v10430_v5 }
 0x181   : > { %v8576_v27 = vpop.f32.mrb[64].mxu0 }
 0x182   : > { %v8577_v12 = vpop.f32.mrb[65].mxu0 }
 0x183   : > { %v8578_v31 = vadd.f32 %v8577_v12, %v8576_v27  ;;  %v8579_v10 = vpop.f32.mrb[66].mxu0  ;;  %8827 = vmatpush3.bf16.msra.mxu0 %v10431_v2 }
 0x184   : > { %v8580_v15 = vpop.f32.mrb[67].mxu0  ;;  %8828 = vmatprep.subr.bf16.mxu0 %v10435_v3 }
 0x185   : > { %v11573_v16 = vadd.f32 %v8578_v31, %v11461_v36  ;;  %v8581_v17 = vadd.f32 %v8580_v15, %v8579_v10  ;;  %v10446_v31 = vld [vmem:[%s13516_s1 + $0x380] sm:$0xff]  }
 0x186   : > { %3689 = vmatmul.mubr.bf16.gmra.mrb[172].mxu0 %v10419_v6  ;;  %v10447_v10 = vld [vmem:[%s11095_s17 + $0xfc] ss:$100 sps:$4 sm:$0xff]  }
 0x187   : > { %v11582_v22 = vadd.f32 %v8581_v17, %v11464_v38  ;;  %3696 = vmatprep.mubr.bf16.mxu0 %v10422_v11  ;;  %8829 = vmatpush3.bf16.msra.mxu0 %v10436_v14  ;;  %v10455_v17 = vld [vmem:[%s13516_s1 + $0x3d0] sm:$0xff]  }
 0x188   : > { %8830 = vmatprep.subr.bf16.mxu0 %v10440_v20  ;;  %v10451_v20 = vld [vmem:[%s13516_s1 + $0x388] sm:$0xff]  }
 0x189   : > { %v8582_v36 = vpop.f32.mrb[68].mxu0 }
 0x18a   : > { %v8583_v25 = vpop.f32.mrb[69].mxu0 }
 0x18b   : > { %v8584_v26 = vadd.f32 %v8583_v25, %v8582_v36  ;;  %v8585_v28 = vpop.f32.mrb[70].mxu0  ;;  %8831 = vmatpush3.bf16.msra.mxu0 %v10441_v35  ;;  %v10449_v35 = vld [vmem:[%s11095_s17 + $0xf8] ss:$100 sps:$4 sm:$0xff]   ;;  %v10456_v25 = vld [vmem:[%s13516_s1 + $0x390] sm:$0xff]  }
 0x18c   : > { %v8586_v30 = vpop.f32.mrb[71].mxu0  ;;  %8880 = vmatprep.subr.bf16.mxu0 %v10445_v39 }
 0x18d   : > { %v11587_v43 = vadd.f32 %v8584_v26, %v11475_v49  ;;  %v8587_v32 = vadd.f32 %v8586_v30, %v8585_v28  ;;  %v10460_v28 = vld [vmem:[%s13516_s1 + $0x3d8] sm:$0xff]  }
 0x18e   : > { %3697 = vmatmul.mubr.bf16.gmra.mrb[176].mxu0 %v10424_v24 }
 0x18f   : > { %v11590_v38 = vadd.f32 %v8587_v32, %v11478_v52  ;;  %3704 = vmatprep.mubr.bf16.mxu0 %v10427_v29  ;;  %v10434_v52 = vld [vmem:[%s11095_s17 + $0x4d8] ss:$100 sps:$4 sm:$0xff]  }
 0x191   : > { %v8588_v34 = vpop.f32.mrb[72].mxu0 }
 0x192   : > { %v8589_v40 = vpop.f32.mrb[73].mxu0 }
 0x193   : > { %v8590_v41 = vadd.f32 %v8589_v40, %v8588_v34  ;;  %v8591_v51 = vpop.f32.mrb[74].mxu0  ;;  %v10465_v34 = vld [vmem:[%s13516_s1 + $0x3e0] sm:$0xff]  }
 0x194   : > { %v8592_v8 = vpop.f32.mrb[75].mxu0  ;;  %v10454_v40 = vld [vmem:[%s11095_s17 + $0x1c0] ss:$100 sps:$4 sm:$0xff]  }
 0x195   : > { %v11595_v44 = vadd.f32 %v8590_v41, %v11483_v61  ;;  %v8593_v49 = vadd.f32 %v8592_v8, %v8591_v51  ;;  %v10457_v8 = vld [vmem:[%s11095_s17 + $0x28c] ss:$100 sps:$4 sm:$0xff]  }
 0x196   : > { %3705 = vmatmul.mubr.bf16.gmra.mrb[180].mxu0 %v10429_v33  ;;  %v10461_v33 = vld [vmem:[%s13516_s1 + $0x398] sm:$0xff]  }
 0x197   : > { %v11598_v45 = vadd.f32 %v8593_v49, %v11486_v62  ;;  %3712 = vmatprep.mubr.bf16.mxu0 %v10432_v42  ;;  %v10439_v62 = vld [vmem:[%s11095_s17 + $0x5a0] ss:$100 sps:$4 sm:$0xff]  }
 0x199   : > { %v8594_v46 = vpop.f32.mrb[76].mxu0 }
 0x19a   : > { %v8595_v57 = vpop.f32.mrb[77].mxu0 }
 0x19b   : > { %v8596_v48 = vadd.f32 %v8595_v57, %v8594_v46  ;;  %v8597_v50 = vpop.f32.mrb[78].mxu0 }
 0x19c   : > { %v8598_v55 = vpop.f32.mrb[79].mxu0 }
 0x19d   : > { %v11603_v56 = vadd.f32 %v8596_v48, %v11491_v7  ;;  %v8599_v61 = vadd.f32 %v8598_v55, %v8597_v50  ;;  %v10471_v50 = vld [vmem:[%s13516_s1 + $0x3a8] sm:$0xff]  }
 0x19e   : > { %3713 = vmatmul.mubr.bf16.gmra.mrb[184].mxu0 %v10434_v52  ;;  %v10470_v52 = vld [vmem:[%s13516_s1 + $0x3e8] sm:$0xff]  }
 0x19f   : > { %v11606_v63 = vadd.f32 %v8599_v61, %v11494_v9  ;;  %3720 = vmatprep.mubr.bf16.mxu0 %v10437_v53  ;;  %v10442_v9 = vld [vmem:[%s11095_s17 + $0x30] ss:$100 sps:$4 sm:$0xff]   ;;  %v10459_v55 = vld [vmem:[%s11095_s17 + $0x288] ss:$100 sps:$4 sm:$0xff]  }
 0x1a0   : > { %v10475_v53 = vld [vmem:[%s13516_s1 + $0x3f0] sm:$0xff]  }
 0x1a1   : > { %v8600_v58 = vpop.f32.mrb[80].mxu0 }
 0x1a2   : > { %v8601_v59 = vpop.f32.mrb[81].mxu0 }
 0x1a3   : > { %v8602_v60 = vadd.f32 %v8601_v59, %v8600_v58  ;;  %v8603_v19 = vpop.f32.mrb[82].mxu0  ;;  %v10462_v59 = vld [vmem:[%s11095_s17 + $0x354] ss:$100 sps:$4 sm:$0xff]  }
 0x1a4   : > { %v8604_v5 = vpop.f32.mrb[83].mxu0 }
 0x1a5   : > { %v11611_v1 = vadd.f32 %v8602_v60, %v11499_v18  ;;  %v8605_v7 = vadd.f32 %v8604_v5, %v8603_v19  ;;  %v10450_v18 = vld [vmem:[%s13516_s1 + $0x3c8] sm:$0xff]   ;;  %v10480_v19 = vld [vmem:[%s13516_s1 + $0x3f8] sm:$0xff]  }
 0x1a6   : > { %3721 = vmatmul.mubr.bf16.gmra.mrb[188].mxu0 %v10439_v62 }
 0x1a7   : > { %v11614_v2 = vadd.f32 %v8605_v7, %v11502_v21  ;;  %3761 = vmatprep.mubr.bf16.mxu0 %v10444_v23 }
 0x1a9   : > { %v8606_v3 = vpop.f32.mrb[84].mxu0 }
 0x1aa   : > { %v8607_v6 = vpop.f32.mrb[85].mxu0 }
 0x1ab   : > { %v8608_v27 = vadd.f32 %v8607_v6, %v8606_v3  ;;  %v8609_v12 = vpop.f32.mrb[86].mxu0  ;;  %v10485_v3 = vld [vmem:[%s13516_s1 + $0x440] sm:$0xff]   ;;  %v10464_v6 = vld [vmem:[%s11095_s17 + $0x350] ss:$100 sps:$4 sm:$0xff]  }
 0x1ac   : > { %v8610_v11 = vpop.f32.mrb[87].mxu0 }
 0x1ad   : > { %v11625_v21 = vadd.f32 %v8608_v27, %v11513_v47  ;;  %v8611_v14 = vadd.f32 %v8610_v11, %v8609_v12 }
 0x1ae   : > { %3762 = vmatmul.mubr.bf16.vlgmr.msra.gmra.mrb[192].mxu0 %v10442_v9  ;;  %v10481_v9 = vld [vmem:[%s13516_s1 + $0x3b8] sm:$0xff]  }
 0x1af   : > { %v11628_v15 = vadd.f32 %v8611_v14, %v11522_v37  ;;  %8881 = vmatpush3.bf16.msra.mxu0 %v10446_v31  ;;  %3769 = vmatprep.mubr.bf16.mxu0 %v10447_v10  ;;  %v10452_v37 = vld [vmem:[%s11095_s17 + $0x1c4] ss:$100 sps:$4 sm:$0xff]  }
 0x1b0   : > { %8882 = vmatprep.subr.bf16.mxu0 %v10450_v18 }
 0x1b1   : > { %v8612_v39 = vpop.f32.mrb[88].mxu0 }
 0x1b2   : > { %v8613_v47 = vpop.f32.mrb[89].mxu0 }
 0x1b3   : > { %v8614_v24 = vadd.f32 %v8613_v47, %v8612_v39  ;;  %v8615_v36 = vpop.f32.mrb[90].mxu0  ;;  %8883 = vmatpush3.bf16.msra.mxu0 %v10451_v20  ;;  %v10469_v20 = vld [vmem:[%s11095_s17 + $0x418] ss:$100 sps:$4 sm:$0xff]  }
 0x1b4   : > { %v8616_v26 = vpop.f32.mrb[91].mxu0  ;;  %8884 = vmatprep.subr.bf16.mxu0 %v10455_v17 }
 0x1b5   : > { %v11645_v29 = vadd.f32 %v8614_v24, %v11533_v13  ;;  %v8617_v30 = vadd.f32 %v8616_v26, %v8615_v36  ;;  %v10472_v24 = vld [vmem:[%s11095_s17 + $0x4e4] ss:$100 sps:$4 sm:$0xff]  }
 0x1b6   : > { %3770 = vmatmul.mubr.bf16.gmra.mrb[196].mxu0 %v10449_v35 }
 0x1b7   : > { %v11648_v32 = vadd.f32 %v8617_v30, %v11542_v54  ;;  %3777 = vmatprep.mubr.bf16.mxu0 %v10452_v37  ;;  %8885 = vmatpush3.bf16.msra.mxu0 %v10456_v25  ;;  %v10466_v54 = vld [vmem:[%s13516_s1 + $0x3a0] sm:$0xff]  }
 0x1b8   : > { %8886 = vmatprep.subr.bf16.mxu0 %v10460_v28 }
 0x1b9   : > { %v8618_v41 = vpop.f32.mrb[92].mxu0 }
 0x1ba   : > { %v8619_v13 = vpop.f32.mrb[93].mxu0 }
 0x1bb   : > { %v8620_v51 = vadd.f32 %v8619_v13, %v8618_v41  ;;  %v8621_v42 = vpop.f32.mrb[94].mxu0  ;;  %8887 = vmatpush3.bf16.msra.mxu0 %v10461_v33 }
 0x1bc   : > { %v8622_v49 = vpop.f32.mrb[95].mxu0  ;;  %8888 = vmatprep.subr.bf16.mxu0 %v10465_v34  ;;  %v10477_v34 = vld [vmem:[%s11095_s17 + $0x5ac] ss:$100 sps:$4 sm:$0xff]  }
 0x1bd   : > { %v11665_v46 = vadd.f32 %v8620_v51, %v11553_v0  ;;  %v8623_v57 = vadd.f32 %v8622_v49, %v8621_v42  ;;  %v10484_v49 = vld [vmem:[%s11095_s17 + $0x3c] ss:$100 sps:$4 sm:$0xff]  }
 0x1be   : > { %3778 = vmatmul.mubr.bf16.gmra.mrb[200].mxu0 %v10454_v40 }
 0x1bf   : > { %v11668_v48 = vadd.f32 %v8623_v57, %v11562_v4  ;;  %3785 = vmatprep.mubr.bf16.mxu0 %v10457_v8  ;;  %8889 = vmatpush3.bf16.msra.mxu0 %v10466_v54  ;;  %v10476_v4 = vld [vmem:[%s13516_s1 + $0x3b0] sm:$0xff]  }
 0x1c0   : > { %8890 = vmatprep.subr.bf16.mxu0 %v10470_v52 }
 0x1c1   : > { %v8640_v61 = vpop.f32.mrb[96].mxu0 }
 0x1c2   : > { %v8641_v0 = vpop.f32.mrb[97].mxu0 }
 0x1c3   : > { %v8642_v62 = vadd.f32 %v8641_v0, %v8640_v61  ;;  %v8643_v58 = vpop.f32.mrb[98].mxu0  ;;  %8891 = vmatpush3.bf16.msra.mxu0 %v10471_v50 }
 0x1c4   : > { %v8644_v60 = vpop.f32.mrb[99].mxu0  ;;  %8892 = vmatprep.subr.bf16.mxu0 %v10475_v53  ;;  %v10482_v53 = vld [vmem:[%s11095_s17 + $0x38] ss:$100 sps:$4 sm:$0xff]  }
 0x1c5   : > { %v11685_v23 = vadd.f32 %v8642_v62, %v11573_v16  ;;  %v8645_v5 = vadd.f32 %v8644_v60, %v8643_v58  ;;  %v10486_v62 = vld [vmem:[%s13516_s1 + $0x400] sm:$0xff]   ;;  %v10491_v60 = vld [vmem:[%s13516_s1 + $0x408] sm:$0xff]  }
 0x1c6   : > { %3786 = vmatmul.mubr.bf16.gmra.mrb[204].mxu0 %v10459_v55  ;;  %v10487_v58 = vld [vmem:[%s11095_s17 + $0x104] ss:$100 sps:$4 sm:$0xff]  }
 0x1c7   : > { %v11688_v7 = vadd.f32 %v8645_v5, %v11582_v22  ;;  %3793 = vmatprep.mubr.bf16.mxu0 %v10462_v59  ;;  %8893 = vmatpush3.bf16.msra.mxu0 %v10476_v4  ;;  %v10467_v22 = vld [vmem:[%s11095_s17 + $0x41c] ss:$100 sps:$4 sm:$0xff]  }
 0x1c8   : > { %8894 = vmatprep.subr.bf16.mxu0 %v10480_v19  ;;  %v10495_v19 = vld [vmem:[%s13516_s1 + $0x450] sm:$0xff]  }
 0x1c9   : > { %v8646_v16 = vpop.f32.mrb[100].mxu0 }
 0x1ca   : > { %v8647_v27 = vpop.f32.mrb[101].mxu0 }
 0x1cb   : > { %v8648_v12 = vadd.f32 %v8647_v27, %v8646_v16  ;;  %v8649_v31 = vpop.f32.mrb[102].mxu0  ;;  %8895 = vmatpush3.bf16.msra.mxu0 %v10481_v9  ;;  %v10489_v9 = vld [vmem:[%s11095_s17 + $0x100] ss:$100 sps:$4 sm:$0xff]   ;;  %v10492_v27 = vld [vmem:[%s11095_s17 + $0x1cc] ss:$100 sps:$4 sm:$0xff]  }
 0x1cc   : > { %v8650_v10 = vpop.f32.mrb[103].mxu0  ;;  %8944 = vmatprep.subr.bf16.mxu0 %v10485_v3 }
 0x1cd   : > { %v11699_v11 = vadd.f32 %v8648_v12, %v11587_v43  ;;  %v8651_v18 = vadd.f32 %v8650_v10, %v8649_v31  ;;  %v10496_v12 = vld [vmem:[%s13516_s1 + $0x410] sm:$0xff]  }
 0x1ce   : > { %3794 = vmatmul.mubr.bf16.gmra.mrb[208].mxu0 %v10464_v6 }
 0x1cf   : > { %v11702_v14 = vadd.f32 %v8651_v18, %v11590_v38  ;;  %3801 = vmatprep.mubr.bf16.mxu0 %v10467_v22  ;;  %v10474_v38 = vld [vmem:[%s11095_s17 + $0x4e0] ss:$100 sps:$4 sm:$0xff]   ;;  %v10501_v18 = vld [vmem:[%s13516_s1 + $0x418] sm:$0xff]  }
 0x1d1   : > { %v8652_v17 = vpop.f32.mrb[104].mxu0 }
 0x1d2   : > { %v8653_v35 = vpop.f32.mrb[105].mxu0 }
 0x1d3   : > { %v8654_v39 = vadd.f32 %v8653_v35, %v8652_v17  ;;  %v8655_v47 = vpop.f32.mrb[106].mxu0  ;;  %v10505_v17 = vld [vmem:[%s13516_s1 + $0x460] sm:$0xff]  }
 0x1d4   : > { %v8656_v36 = vpop.f32.mrb[107].mxu0 }
 0x1d5   : > { %v8657_v37 = vadd.f32 %v8656_v36, %v8655_v47  ;;  %v11707_v25 = vadd.f32 %v8654_v39, %v11595_v44  ;;  %v10494_v47 = vld [vmem:[%s11095_s17 + $0x1c8] ss:$100 sps:$4 sm:$0xff]   ;;  %v10497_v36 = vld [vmem:[%s11095_s17 + $0x294] ss:$100 sps:$4 sm:$0xff]  }
 0x1d6   : > { %3802 = vmatmul.mubr.bf16.gmra.mrb[212].mxu0 %v10469_v20 }
 0x1d7   : > { %3809 = vmatprep.mubr.bf16.mxu0 %v10472_v24  ;;  %v11710_v43 = vadd.f32 %v8657_v37, %v11598_v45  ;;  %v10479_v45 = vld [vmem:[%s11095_s17 + $0x5a8] ss:$100 sps:$4 sm:$0xff]   ;;  %v10506_v37 = vld [vmem:[%s13516_s1 + $0x420] sm:$0xff]  }
 0x1d9   : > { %v8658_v26 = vpop.f32.mrb[108].mxu0 }
 0x1da   : > { %v8659_v28 = vpop.f32.mrb[109].mxu0 }
 0x1db   : > { %v8660_v30 = vadd.f32 %v8659_v28, %v8658_v26  ;;  %v8661_v33 = vpop.f32.mrb[110].mxu0 }
 0x1dc   : > { %v8662_v40 = vpop.f32.mrb[111].mxu0 }
 0x1dd   : > { %v8663_v41 = vadd.f32 %v8662_v40, %v8661_v33  ;;  %v11715_v13 = vadd.f32 %v8660_v30, %v11603_v56  ;;  %v10511_v30 = vld [vmem:[%s13516_s1 + $0x428] sm:$0xff]  }
 0x1de   : > { %3810 = vmatmul.mubr.bf16.gmra.mrb[216].mxu0 %v10474_v38 }
 0x1df   : > { %3817 = vmatprep.mubr.bf16.mxu0 %v10477_v34  ;;  %v11718_v44 = vadd.f32 %v8663_v41, %v11606_v63  ;;  %v10515_v34 = vld [vmem:[%s13516_s1 + $0x470] sm:$0xff]  }
 0x1e1   : > { %v8664_v51 = vpop.f32.mrb[112].mxu0 }
 0x1e2   : > { %v8665_v42 = vpop.f32.mrb[113].mxu0 }
 0x1e3   : > { %v8666_v8 = vadd.f32 %v8665_v42, %v8664_v51  ;;  %v8667_v54 = vpop.f32.mrb[114].mxu0  ;;  %v10502_v42 = vld [vmem:[%s11095_s17 + $0x35c] ss:$100 sps:$4 sm:$0xff]  }
 0x1e4   : > { %v8668_v52 = vpop.f32.mrb[115].mxu0 }
 0x1e5   : > { %v8669_v57 = vadd.f32 %v8668_v52, %v8667_v54  ;;  %v11723_v50 = vadd.f32 %v8666_v8, %v11611_v1  ;;  %v10490_v1 = vld [vmem:[%s13516_s1 + $0x448] sm:$0xff]   ;;  %v10516_v8 = vld [vmem:[%s13516_s1 + $0x430] sm:$0xff]  }
 0x1e6   : > { %3818 = vmatmul.mubr.bf16.gmra.mrb[220].mxu0 %v10479_v45  ;;  %v10499_v45 = vld [vmem:[%s11095_s17 + $0x290] ss:$100 sps:$4 sm:$0xff]  }
 0x1e7   : > { %3858 = vmatprep.mubr.bf16.mxu0 %v10484_v49  ;;  %v11726_v56 = vadd.f32 %v8669_v57, %v11614_v2  ;;  %v10521_v57 = vld [vmem:[%s13516_s1 + $0x438] sm:$0xff]  }
 0x1e9   : > { %v8670_v63 = vpop.f32.mrb[116].mxu0 }
 0x1ea   : > { %v8671_v55 = vpop.f32.mrb[117].mxu0 }
 0x1eb   : > { %v8672_v61 = vadd.f32 %v8671_v55, %v8670_v63  ;;  %v8673_v0 = vpop.f32.mrb[118].mxu0  ;;  %v10525_v63 = vld [vmem:[%s13516_s1 + $0x4c0] sm:$0xff]  }
 0x1ec   : > { %v8674_v59 = vpop.f32.mrb[119].mxu0 }
 0x1ed   : > { %v8675_v4 = vadd.f32 %v8674_v59, %v8673_v0  ;;  %v11737_v2 = vadd.f32 %v8672_v61, %v11625_v21 }
 0x1ee   : > { %3859 = vmatmul.mubr.bf16.vlgmr.msra.gmra.mrb[224].mxu0 %v10482_v53 }
 0x1ef   : > { %8945 = vmatpush3.bf16.msra.mxu0 %v10486_v62  ;;  %3866 = vmatprep.mubr.bf16.mxu0 %v10487_v58  ;;  %v11746_v5 = vadd.f32 %v8675_v4, %v11628_v15  ;;  %v10500_v15 = vld [vmem:[%s13516_s1 + $0x458] sm:$0xff]   ;;  %v10507_v58 = vld [vmem:[%s11095_s17 + $0x424] ss:$100 sps:$4 sm:$0xff]  }
 0x1f0   : > { %8946 = vmatprep.subr.bf16.mxu0 %v10490_v1 }
 0x1f1   : > { %v8676_v3 = vpop.f32.mrb[120].mxu0 }
 0x1f2   : > { %v8677_v6 = vpop.f32.mrb[121].mxu0 }
 0x1f3   : > { %v8678_v21 = vadd.f32 %v8677_v6, %v8676_v3  ;;  %v8679_v16 = vpop.f32.mrb[122].mxu0  ;;  %8947 = vmatpush3.bf16.msra.mxu0 %v10491_v60 }
 0x1f4   : > { %v8680_v31 = vpop.f32.mrb[123].mxu0  ;;  %8948 = vmatprep.subr.bf16.mxu0 %v10495_v19 }
 0x1f5   : > { %v8681_v22 = vadd.f32 %v8680_v31, %v8679_v16  ;;  %v11757_v10 = vadd.f32 %v8678_v21, %v11645_v29  ;;  %v10512_v21 = vld [vmem:[%s11095_s17 + $0x4ec] ss:$100 sps:$4 sm:$0xff]  }
 0x1f6   : > { %3867 = vmatmul.mubr.bf16.gmra.mrb[228].mxu0 %v10489_v9  ;;  %v10509_v9 = vld [vmem:[%s11095_s17 + $0x420] ss:$100 sps:$4 sm:$0xff]  }
 0x1f7   : > { %3874 = vmatprep.mubr.bf16.mxu0 %v10492_v27  ;;  %8949 = vmatpush3.bf16.msra.mxu0 %v10496_v12  ;;  %v11763_v20 = vadd.f32 %v8681_v22, %v11648_v32  ;;  %v10510_v32 = vld [vmem:[%s13516_s1 + $0x468] sm:$0xff]  }
 0x1f8   : > { %8950 = vmatprep.subr.bf16.mxu0 %v10500_v15  ;;  %v10514_v15 = vld [vmem:[%s11095_s17 + $0x4e8] ss:$100 sps:$4 sm:$0xff]  }
 0x1f9   : > { %v8682_v35 = vpop.f32.mrb[124].mxu0 }
 0x1fa   : > { %v8683_v39 = vpop.f32.mrb[125].mxu0 }
 0x1fb   : > { %v8684_v29 = vadd.f32 %v8683_v39, %v8682_v35  ;;  %v8685_v24 = vpop.f32.mrb[126].mxu0  ;;  %8951 = vmatpush3.bf16.msra.mxu0 %v10501_v18 }
 0x1fc   : > { %v8686_v38 = vpop.f32.mrb[127].mxu0  ;;  %8952 = vmatprep.subr.bf16.mxu0 %v10505_v17  ;;  %v10517_v17 = vld [vmem:[%s11095_s17 + $0x5b4] ss:$100 sps:$4 sm:$0xff]  }
 0x1fd   : > { %v8687_v26 = vadd.f32 %v8686_v38, %v8685_v24  ;;  %v11777_v28 = vadd.f32 %v8684_v29, %v11665_v46  ;;  %v10519_v24 = vld [vmem:[%s11095_s17 + $0x5b0] ss:$100 sps:$4 sm:$0xff]   ;;  %v10524_v38 = vld [vmem:[%s11095_s17 + $0x44] ss:$100 sps:$4 sm:$0xff]  }
 0x1fe   : > { %3875 = vmatmul.mubr.bf16.gmra.mrb[232].mxu0 %v10494_v47 }
 0x1ff   : > { %3882 = vmatprep.mubr.bf16.mxu0 %v10497_v36  ;;  %8953 = vmatpush3.bf16.msra.mxu0 %v10506_v37  ;;  %v11783_v33 = vadd.f32 %v8687_v26, %v11668_v48  ;;  %v10520_v48 = vld [vmem:[%s13516_s1 + $0x478] sm:$0xff]  }
 0x200   : > { %8954 = vmatprep.subr.bf16.mxu0 %v10510_v32 }
 0x201   : > { %v8704_v40 = vpop.f32.mrb[128].mxu0 }
 0x202   : > { %v8705_v41 = vpop.f32.mrb[129].mxu0 }
 0x203   : > { %v8706_v46 = vadd.f32 %v8705_v41, %v8704_v40  ;;  %v8707_v51 = vpop.f32.mrb[130].mxu0  ;;  %8955 = vmatpush3.bf16.msra.mxu0 %v10511_v30  ;;  %v10522_v40 = vld [vmem:[%s11095_s17 + $0x40] ss:$100 sps:$4 sm:$0xff]  }
 0x204   : > { %v8708_v54 = vpop.f32.mrb[131].mxu0  ;;  %8956 = vmatprep.subr.bf16.mxu0 %v10515_v34 }
 0x205   : > { %v8709_v49 = vadd.f32 %v8708_v54, %v8707_v51  ;;  %v11797_v52 = vadd.f32 %v8706_v46, %v11685_v23  ;;  %v10504_v23 = vld [vmem:[%s11095_s17 + $0x358] ss:$100 sps:$4 sm:$0xff]   ;;  %v10526_v46 = vld [vmem:[%s13516_s1 + $0x480] sm:$0xff]   ;;  %v10529_v51 = vld [vmem:[%s11095_s17 + $0x10c] ss:$100 sps:$4 sm:$0xff]  }
 0x206   : > { %3883 = vmatmul.mubr.bf16.gmra.mrb[236].mxu0 %v10499_v45  ;;  %v11854_v54 = vld [vmem:[%s13516_s1 + $0x5c0] sm:$0xff]  }
 0x207   : > { %3890 = vmatprep.mubr.bf16.mxu0 %v10502_v42  ;;  %8957 = vmatpush3.bf16.msra.mxu0 %v10516_v8  ;;  %v11803_v53 = vadd.f32 %v8709_v49, %v11688_v7  ;;  %v10531_v49 = vld [vmem:[%s13516_s1 + $0x488] sm:$0xff]  }
 0x208   : > { %8958 = vmatprep.subr.bf16.mxu0 %v10520_v48  ;;  %10031 = vmatprep.subr.bf16.mxu1 %v11854_v54 }
 0x209   : > { %v8710_v55 = vpop.f32.mrb[132].mxu0 }
 0x20a   : > { %v8711_v61 = vpop.f32.mrb[133].mxu0 }
 0x20b   : > { %v8712_v0 = vadd.f32 %v8711_v61, %v8710_v55  ;;  %v8713_v62 = vpop.f32.mrb[134].mxu0  ;;  %8959 = vmatpush3.bf16.msra.mxu0 %v10521_v57  ;;  %v10535_v57 = vld [vmem:[%s13516_s1 + $0x4d0] sm:$0xff]   ;;  %v10527_v55 = vld [vmem:[%s11095_s17 + $0x108] ss:$100 sps:$4 sm:$0xff]  }
 0x20c   : > { %v8714_v59 = vpop.f32.mrb[135].mxu0  ;;  %9008 = vmatprep.subr.bf16.mxu0 %v10525_v63  ;;  %v11876_v61 = vld [vmem:[%s13516_s1 + $0x5c8] sm:$0xff]  }
 0x20d   : > { %v8715_v1 = vadd.f32 %v8714_v59, %v8713_v62  ;;  %v11811_v7 = vadd.f32 %v8712_v0, %v11699_v11  ;;  %v10534_v62 = vld [vmem:[%s11095_s17 + $0x1d4] ss:$100 sps:$4 sm:$0xff]   ;;  %v11885_v59 = vld [vmem:[%s13516_s1 + $0x588] sm:$0xff]  }
 0x20e   : > { %3891 = vmatmul.mubr.bf16.gmra.mrb[240].mxu0 %v10504_v23 }
 0x20f   : > { %3898 = vmatprep.mubr.bf16.mxu0 %v10507_v58  ;;  %v11814_v4 = vadd.f32 %v8715_v1, %v11702_v14  ;;  %v10536_v58 = vld [vmem:[%s13516_s1 + $0x490] sm:$0xff]  }
 0x211   : > { %v8716_v60 = vpop.f32.mrb[136].mxu0 }
 0x212   : > { %v8717_v19 = vpop.f32.mrb[137].mxu0 }
 0x213   : > { %v8718_v3 = vadd.f32 %v8717_v19, %v8716_v60  ;;  %v8719_v6 = vpop.f32.mrb[138].mxu0  ;;  %v10540_v60 = vld [vmem:[%s13516_s1 + $0x4d8] sm:$0xff]  }
 0x214   : > { %v8720_v16 = vpop.f32.mrb[139].mxu0 }
 0x215   : > { %v11819_v27 = vadd.f32 %v8718_v3, %v11707_v25  ;;  %v8721_v12 = vadd.f32 %v8720_v16, %v8719_v6  ;;  %v11898_v3 = vld [vmem:[%s13516_s1 + $0x5d0] sm:$0xff]   ;;  %v10545_v16 = vld [vmem:[%s13516_s1 + $0x4e0] sm:$0xff]  }
 0x216   : > { %3899 = vmatmul.mubr.bf16.gmra.mrb[244].mxu0 %v10509_v9 }
 0x217   : > { %v11822_v11 = vadd.f32 %v8721_v12, %v11710_v43  ;;  %3906 = vmatprep.mubr.bf16.mxu0 %v10512_v21  ;;  %v11909_v21 = vld [vmem:[%s13516_s1 + $0x590] sm:$0xff]  }
 0x219   : > { %v8722_v14 = vpop.f32.mrb[140].mxu0 }
 0x21a   : > { %v8723_v31 = vpop.f32.mrb[141].mxu0 }
 0x21b   : > { %v8724_v22 = vadd.f32 %v8723_v31, %v8722_v14  ;;  %v8725_v18 = vpop.f32.mrb[142].mxu0  ;;  %v10532_v14 = vld [vmem:[%s11095_s17 + $0x1d0] ss:$100 sps:$4 sm:$0xff]   ;;  %v11920_v31 = vld [vmem:[%s13516_s1 + $0x5d8] sm:$0xff]  }
 0x21c   : > { %v8726_v35 = vpop.f32.mrb[143].mxu0 }
 0x21d   : > { %v11827_v39 = vadd.f32 %v8724_v22, %v11715_v13  ;;  %v8727_v25 = vadd.f32 %v8726_v35, %v8725_v18  ;;  %v10539_v18 = vld [vmem:[%s11095_s17 + $0x29c] ss:$100 sps:$4 sm:$0xff]  }
 0x21e   : > { %3907 = vmatmul.mubr.bf16.gmra.mrb[248].mxu0 %v10514_v15  ;;  %v11929_v35 = vld [vmem:[%s13516_s1 + $0x598] sm:$0xff]  }
 0x21f   : > { %v11830_v47 = vadd.f32 %v8727_v25, %v11718_v44  ;;  %3914 = vmatprep.mubr.bf16.mxu0 %v10517_v17  ;;  %v10546_v17 = vld [vmem:[%s13516_s1 + $0x4a0] sm:$0xff]  }
 0x221   : > { %v8728_v43 = vpop.f32.mrb[144].mxu0 }
 0x222   : > { %v8729_v29 = vpop.f32.mrb[145].mxu0 }
 0x223   : > { %v8730_v36 = vadd.f32 %v8729_v29, %v8728_v43  ;;  %v8731_v37 = vpop.f32.mrb[146].mxu0  ;;  %v10550_v43 = vld [vmem:[%s13516_s1 + $0x4e8] sm:$0xff]  }
 0x224   : > { %v8732_v32 = vpop.f32.mrb[147].mxu0 }
 0x225   : > { %v11835_v26 = vadd.f32 %v8730_v36, %v11723_v50  ;;  %v8733_v13 = vadd.f32 %v8732_v32, %v8731_v37  ;;  %v10530_v50 = vld [vmem:[%s13516_s1 + $0x4c8] sm:$0xff]   ;;  %v11942_v36 = vld [vmem:[%s13516_s1 + $0x5e0] sm:$0xff]   ;;  %v10555_v32 = vld [vmem:[%s13516_s1 + $0x4f0] sm:$0xff]  }
 0x226   : > { %3915 = vmatmul.mubr.bf16.gmra.mrb[252].mxu0 %v10519_v24 }
 0x227   : > { %v11838_v30 = vadd.f32 %v8733_v13, %v11726_v56  ;;  %3955 = vmatprep.mubr.bf16.mxu0 %v10524_v38  ;;  %v11953_v38 = vld [vmem:[%s13516_s1 + $0x5a0] sm:$0xff]  }
 0x229   : > { %v8734_v44 = vpop.f32.mrb[148].mxu0 }
 0x22a   : > { %v8735_v34 = vpop.f32.mrb[149].mxu0 }
 0x22b   : > { %v8736_v41 = vadd.f32 %v8735_v34, %v8734_v44  ;;  %v8737_v45 = vpop.f32.mrb[150].mxu0  ;;  %v10537_v44 = vld [vmem:[%s11095_s17 + $0x298] ss:$100 sps:$4 sm:$0xff]   ;;  %v11964_v34 = vld [vmem:[%s13516_s1 + $0x5e8] sm:$0xff]  }
 0x22c   : > { %v8738_v42 = vpop.f32.mrb[151].mxu0 }
 0x22d   : > { %v11849_v56 = vadd.f32 %v8736_v41, %v11737_v2  ;;  %v8739_v8 = vadd.f32 %v8738_v42, %v8737_v45  ;;  %v11865_v2 = vld [vmem:[%s13516_s1 + $0x580] sm:$0xff]  }
 0x22e   : > { %3956 = vmatmul.mubr.bf16.vlgmr.msra.gmra.mrb[0].mxu0 %v10522_v40  ;;  %10039 = vmatpush3.bf16.msra.mxu1 %v11865_v2  ;;  %v10544_v45 = vld [vmem:[%s11095_s17 + $0x364] ss:$100 sps:$4 sm:$0xff]  }
 0x22f   : > { %v11857_v48 = vadd.f32 %v8739_v8, %v11746_v5  ;;  %9009 = vmatpush3.bf16.msra.mxu0 %v10526_v46  ;;  %3963 = vmatprep.mubr.bf16.mxu0 %v10529_v51  ;;  %v10556_v46 = vld [vmem:[%s13516_s1 + $0x4b0] sm:$0xff]   ;;  %v11973_v51 = vld [vmem:[%s13516_s1 + $0x5a8] sm:$0xff]  }
 0x230   : > { %9010 = vmatprep.subr.bf16.mxu0 %v10530_v50  ;;  %10032 = vmatprep.subr.bf16.mxu1 %v11876_v61  ;;  %v10560_v50 = vld [vmem:[%s13516_s1 + $0x4f8] sm:$0xff]  }
 0x231   : > { %v8740_v5 = vpop.f32.mrb[152].mxu0 }
 0x232   : > { %v8741_v63 = vpop.f32.mrb[153].mxu0  ;;  %10040 = vmatpush3.bf16.msra.mxu1 %v11885_v59 }
 0x233   : > { %v8742_v23 = vadd.f32 %v8741_v63, %v8740_v5  ;;  %v8743_v0 = vpop.f32.mrb[154].mxu0  ;;  %9011 = vmatpush3.bf16.msra.mxu0 %v10531_v49  ;;  %10033 = vmatprep.subr.bf16.mxu1 %v11898_v3  ;;  %v11997_v63 = vld [vmem:[%s13516_s1 + $0x5b0] sm:$0xff]  }
 0x234   : > { %v8744_v1 = vpop.f32.mrb[155].mxu0  ;;  %9012 = vmatprep.subr.bf16.mxu0 %v10535_v57  ;;  %v11986_v57 = vld [vmem:[%s13516_s1 + $0x5f0] sm:$0xff]  }
 0x235   : > { %v11892_v19 = vadd.f32 %v8742_v23, %v11757_v10  ;;  %v8745_v9 = vadd.f32 %v8744_v1, %v8743_v0  ;;  %v10541_v10 = vld [vmem:[%s13516_s1 + $0x498] sm:$0xff]   ;;  %v10542_v0 = vld [vmem:[%s11095_s17 + $0x360] ss:$100 sps:$4 sm:$0xff]  }
 0x236   : > { %3964 = vmatmul.mubr.bf16.gmra.mrb[4].mxu0 %v10527_v55  ;;  %10041 = vmatpush3.bf16.msra.mxu1 %v11909_v21  ;;  %v10565_v55 = vld [vmem:[%s13516_s1 + $0x540] sm:$0xff]  }
 0x237   : > { %v11901_v6 = vadd.f32 %v8745_v9, %v11763_v20  ;;  %3971 = vmatprep.mubr.bf16.mxu0 %v10534_v62  ;;  %9013 = vmatpush3.bf16.msra.mxu0 %v10536_v58  ;;  %v12008_v62 = vld [vmem:[%s13516_s1 + $0x5f8] sm:$0xff]  }
 0x238   : > { %9014 = vmatprep.subr.bf16.mxu0 %v10540_v60  ;;  %10034 = vmatprep.subr.bf16.mxu1 %v11920_v31  ;;  %v10549_v60 = vld [vmem:[%s11095_s17 + $0x42c] ss:$100 sps:$4 sm:$0xff]   ;;  %v12014_v9 = vld [vmem:[%s13516_s1 + $0x5b8] sm:$0xff]  }
 0x239   : > { %v8746_v20 = vpop.f32.mrb[156].mxu0 }
 0x23a   : > { %v8747_v12 = vpop.f32.mrb[157].mxu0  ;;  %10042 = vmatpush3.bf16.msra.mxu1 %v11929_v35 }
 0x23b   : > { %v8748_v15 = vadd.f32 %v8747_v12, %v8746_v20  ;;  %v8749_v22 = vpop.f32.mrb[158].mxu0  ;;  %9015 = vmatpush3.bf16.msra.mxu0 %v10541_v10  ;;  %10035 = vmatprep.subr.bf16.mxu1 %v11942_v36  ;;  %v10635_v12 = vld [vmem:[%s11095_s17 + $0x37c] ss:$100 sps:$4 sm:$0xff]  }
 0x23c   : > { %v8750_v25 = vpop.f32.mrb[159].mxu0  ;;  %9016 = vmatprep.subr.bf16.mxu0 %v10545_v16  ;;  %4278 = vmatprep.mubr.bf16.mxu1 %v10635_v12  ;;  %v10651_v12 = vld [vmem:[%s11095_s17 + $0x5d4] ss:$100 sps:$4 sm:$0xff]  }
 0x23d   : > { %v11936_v29 = vadd.f32 %v8748_v15, %v11777_v28  ;;  %v8751_v24 = vadd.f32 %v8750_v25, %v8749_v22  ;;  %v10551_v28 = vld [vmem:[%s13516_s1 + $0x4a8] sm:$0xff]  }
 0x23e   : > { %3972 = vmatmul.mubr.bf16.gmra.mrb[8].mxu0 %v10532_v14  ;;  %10043 = vmatpush3.bf16.msra.mxu1 %v11953_v38  ;;  %v10633_v14 = vld [vmem:[%s11095_s17 + $0x378] ss:$100 sps:$4 sm:$0xff]  }
 0x23f   : > { %v11945_v37 = vadd.f32 %v8751_v24, %v11783_v33  ;;  %3979 = vmatprep.mubr.bf16.mxu0 %v10539_v18  ;;  %9017 = vmatpush3.bf16.msra.mxu0 %v10546_v17  ;;  %v10547_v17 = vld [vmem:[%s11095_s17 + $0x428] ss:$100 sps:$4 sm:$0xff]  }
 0x240   : > { %9018 = vmatprep.subr.bf16.mxu0 %v10550_v43  ;;  %10036 = vmatprep.subr.bf16.mxu1 %v11964_v34  ;;  %v10554_v43 = vld [vmem:[%s11095_s17 + $0x4f4] ss:$100 sps:$4 sm:$0xff]  }
 0x241   : > { %v8768_v33 = vpop.f32.mrb[160].mxu0 }
 0x242   : > { %v8769_v13 = vpop.f32.mrb[161].mxu0  ;;  %10044 = vmatpush3.bf16.msra.mxu1 %v11973_v51 }
 0x243   : > { %v8770_v40 = vadd.f32 %v8769_v13, %v8768_v33  ;;  %v8771_v41 = vpop.f32.mrb[162].mxu0  ;;  %9019 = vmatpush3.bf16.msra.mxu0 %v10551_v28  ;;  %10037 = vmatprep.subr.bf16.mxu1 %v11986_v57  ;;  %v10639_v33 = vld [vmem:[%s11095_s17 + $0x444] ss:$100 sps:$4 sm:$0xff]  }
 0x244   : > { %v8772_v42 = vpop.f32.mrb[163].mxu0  ;;  %9020 = vmatprep.subr.bf16.mxu0 %v10555_v32 }
 0x245   : > { %v11980_v8 = vadd.f32 %v8770_v40, %v11797_v52  ;;  %v8773_v49 = vadd.f32 %v8772_v42, %v8771_v41  ;;  %v10561_v52 = vld [vmem:[%s13516_s1 + $0x4b8] sm:$0xff]   ;;  %v10552_v41 = vld [vmem:[%s11095_s17 + $0x4f0] ss:$100 sps:$4 sm:$0xff]  }
 0x246   : > { %3980 = vmatmul.mubr.bf16.gmra.mrb[12].mxu0 %v10537_v44  ;;  %10045 = vmatpush3.bf16.msra.mxu1 %v11997_v63 }
 0x247   : > { %v11989_v5 = vadd.f32 %v8773_v49, %v11803_v53  ;;  %3987 = vmatprep.mubr.bf16.mxu0 %v10544_v45  ;;  %9021 = vmatpush3.bf16.msra.mxu0 %v10556_v46 }
 0x248   : > { %9022 = vmatprep.subr.bf16.mxu0 %v10560_v50  ;;  %10038 = vmatprep.subr.bf16.mxu1 %v12008_v62 }
 0x249   : > { %v8774_v53 = vpop.f32.mrb[164].mxu0 }
 0x24a   : > { %v8775_v23 = vpop.f32.mrb[165].mxu0  ;;  %10046 = vmatpush3.bf16.msra.mxu1 %v12014_v9 }
 0x24b   : > { %v8776_v58 = vadd.f32 %v8775_v23, %v8774_v53  ;;  %v8777_v1 = vpop.f32.mrb[166].mxu0  ;;  %9023 = vmatpush3.bf16.msra.mxu0 %v10561_v52  ;;  %v10645_v52 = vld [vmem:[%s11095_s17 + $0x50c] ss:$100 sps:$4 sm:$0xff]  }
 0x24c   : > { %v8778_v10 = vpop.f32.mrb[167].mxu0  ;;  %9072 = vmatprep.subr.bf16.mxu0 %v10565_v55 }
 0x24d   : > { %v12018_v16 = vadd.f32 %v8776_v58, %v11811_v7  ;;  %v8779_v20 = vadd.f32 %v8778_v10, %v8777_v1  ;;  %4279 = vmatmul.mubr.bf16.vlgmr.msra.gmra.mrb[0].mxu1 %v10633_v14 }
 0x24e   : > { %3988 = vmatmul.mubr.bf16.gmra.mrb[16].mxu0 %v10542_v0  ;;  %4286 = vmatprep.mubr.bf16.mxu1 %v10639_v33  ;;  %v10557_v0 = vld [vmem:[%s11095_s17 + $0x5b8] ss:$100 sps:$4 sm:$0xff]  }
 0x24f   : > { %v12024_v15 = vadd.f32 %v8779_v20, %v11814_v4  ;;  %3995 = vmatprep.mubr.bf16.mxu0 %v10549_v60  ;;  %v10641_v4 = vld [vmem:[%s11095_s17 + $0x440] ss:$100 sps:$4 sm:$0xff]  }
 0x251   : > { %v8780_v22 = vpop.f32.mrb[168].mxu0 }
 0x252   : > { %v8781_v18 = vpop.f32.mrb[169].mxu0 }
 0x253   : > { %v8782_v7 = vadd.f32 %v8781_v18, %v8780_v22  ;;  %v8783_v25 = vpop.f32.mrb[170].mxu0 }
 0x254   : > { %v8784_v24 = vpop.f32.mrb[171].mxu0 }
 0x255   : > { %v12029_v28 = vadd.f32 %v8782_v7, %v11819_v27  ;;  %v8785_v32 = vadd.f32 %v8784_v24, %v8783_v25  ;;  %4287 = vmatmul.mubr.bf16.gmra.mrb[4].mxu1 %v10641_v4  ;;  %v10559_v27 = vld [vmem:[%s11095_s17 + $0x5bc] ss:$100 sps:$4 sm:$0xff]  }
 0x256   : > { %3996 = vmatmul.mubr.bf16.gmra.mrb[20].mxu0 %v10547_v17  ;;  %4294 = vmatprep.mubr.bf16.mxu1 %v10645_v52  ;;  %v10562_v17 = vld [vmem:[%s11095_s17 + $0x48] ss:$100 sps:$4 sm:$0xff]   ;;  %v10580_v52 = vld [vmem:[%s13516_s1 + $0x558] sm:$0xff]  }
 0x257   : > { %v12034_v13 = vadd.f32 %v8785_v32, %v11822_v11  ;;  %4003 = vmatprep.mubr.bf16.mxu0 %v10554_v43  ;;  %v10647_v11 = vld [vmem:[%s11095_s17 + $0x508] ss:$100 sps:$4 sm:$0xff]   ;;  %v10569_v43 = vld [vmem:[%s11095_s17 + $0x114] ss:$100 sps:$4 sm:$0xff]  }
 0x259   : > { %v8786_v44 = vpop.f32.mrb[172].mxu0 }
 0x25a   : > { %v8787_v40 = vpop.f32.mrb[173].mxu0 }
 0x25b   : > { %v8788_v45 = vadd.f32 %v8787_v40, %v8786_v44  ;;  %v8789_v46 = vpop.f32.mrb[174].mxu0  ;;  %v10571_v44 = vld [vmem:[%s13516_s1 + $0x508] sm:$0xff]   ;;  %v10575_v40 = vld [vmem:[%s13516_s1 + $0x550] sm:$0xff]  }
 0x25c   : > { %v8790_v42 = vpop.f32.mrb[175].mxu0 }
 0x25d   : > { %v12039_v50 = vadd.f32 %v8788_v45, %v11827_v39  ;;  %v8791_v49 = vadd.f32 %v8790_v42, %v8789_v46  ;;  %4295 = vmatmul.mubr.bf16.gmra.mrb[8].mxu1 %v10647_v11  ;;  %v10564_v39 = vld [vmem:[%s11095_s17 + $0x4c] ss:$100 sps:$4 sm:$0xff]   ;;  %v10574_v42 = vld [vmem:[%s11095_s17 + $0x1dc] ss:$100 sps:$4 sm:$0xff]  }
 0x25e   : > { %4004 = vmatmul.mubr.bf16.gmra.mrb[24].mxu0 %v10552_v41  ;;  %4302 = vmatprep.mubr.bf16.mxu1 %v10651_v12  ;;  %v10579_v12 = vld [vmem:[%s11095_s17 + $0x2a4] ss:$100 sps:$4 sm:$0xff]  }
 0x25f   : > { %v12044_v55 = vadd.f32 %v8791_v49, %v11830_v47  ;;  %4011 = vmatprep.mubr.bf16.mxu0 %v10559_v27  ;;  %v10653_v47 = vld [vmem:[%s11095_s17 + $0x5d0] ss:$100 sps:$4 sm:$0xff]  }
 0x261   : > { %v8792_v53 = vpop.f32.mrb[176].mxu0 }
 0x262   : > { %v8793_v23 = vpop.f32.mrb[177].mxu0 }
 0x263   : > { %v8794_v58 = vadd.f32 %v8793_v23, %v8792_v53  ;;  %v8795_v1 = vpop.f32.mrb[178].mxu0 }
 0x264   : > { %v8796_v60 = vpop.f32.mrb[179].mxu0 }
 0x265   : > { %v12049_v10 = vadd.f32 %v8794_v58, %v11835_v26  ;;  %v8797_v20 = vadd.f32 %v8796_v60, %v8795_v1  ;;  %4303 = vmatmul.mubr.bf16.gmra.mrb[12].mxu1 %v10653_v47  ;;  %v10566_v26 = vld [vmem:[%s13516_s1 + $0x500] sm:$0xff]  }
 0x266   : > { %4012 = vmatmul.mubr.bf16.gmra.mrb[28].mxu0 %v10557_v0  ;;  %v10581_v0 = vld [vmem:[%s13516_s1 + $0x518] sm:$0xff]   ;;  %v10585_v58 = vld [vmem:[%s13516_s1 + $0x560] sm:$0xff]  }
 0x267   : > { %v12054_v14 = vadd.f32 %v8797_v20, %v11838_v30  ;;  %4052 = vmatprep.mubr.bf16.mxu0 %v10564_v39  ;;  %v10570_v30 = vld [vmem:[%s13516_s1 + $0x548] sm:$0xff]  }
 0x269   : > { %v8798_v22 = vpop.f32.mrb[180].mxu0 }
 0x26a   : > { %v8799_v18 = vpop.f32.mrb[181].mxu0 }
 0x26b   : > { %v8800_v7 = vadd.f32 %v8799_v18, %v8798_v22  ;;  %v8801_v25 = vpop.f32.mrb[182].mxu0  ;;  %v10590_v22 = vld [vmem:[%s13516_s1 + $0x568] sm:$0xff]  }
 0x26c   : > { %v8802_v24 = vpop.f32.mrb[183].mxu0 }
 0x26d   : > { %v12065_v32 = vadd.f32 %v8800_v7, %v11849_v56  ;;  %v8803_v33 = vadd.f32 %v8802_v24, %v8801_v25  ;;  %v10567_v56 = vld [vmem:[%s11095_s17 + $0x110] ss:$100 sps:$4 sm:$0xff]   ;;  %v10591_v25 = vld [vmem:[%s13516_s1 + $0x528] sm:$0xff]  }
 0x26e   : > { %4053 = vmatmul.mubr.bf16.vlgmr.msra.gmra.mrb[32].mxu0 %v10562_v17 }
 0x26f   : > { %v12068_v4 = vadd.f32 %v8803_v33, %v11857_v48  ;;  %9073 = vmatpush3.bf16.msra.mxu0 %v10566_v26  ;;  %4060 = vmatprep.mubr.bf16.mxu0 %v10569_v43  ;;  %v10576_v48 = vld [vmem:[%s13516_s1 + $0x510] sm:$0xff]  }
 0x270   : > { %9074 = vmatprep.subr.bf16.mxu0 %v10570_v30  ;;  %v10595_v26 = vld [vmem:[%s13516_s1 + $0x570] sm:$0xff]  }
 0x271   : > { %v8804_v41 = vpop.f32.mrb[184].mxu0 }
 0x272   : > { %v8805_v45 = vpop.f32.mrb[185].mxu0 }
 0x273   : > { %v8806_v46 = vadd.f32 %v8805_v45, %v8804_v41  ;;  %v8807_v27 = vpop.f32.mrb[186].mxu0  ;;  %9075 = vmatpush3.bf16.msra.mxu0 %v10571_v44  ;;  %v10584_v44 = vld [vmem:[%s11095_s17 + $0x36c] ss:$100 sps:$4 sm:$0xff]   ;;  %v10600_v41 = vld [vmem:[%s13516_s1 + $0x578] sm:$0xff]  }
 0x274   : > { %v8808_v49 = vpop.f32.mrb[187].mxu0  ;;  %9076 = vmatprep.subr.bf16.mxu0 %v10575_v40 }
 0x275   : > { %v12085_v11 = vadd.f32 %v8806_v46, %v11892_v19  ;;  %v8809_v53 = vadd.f32 %v8808_v49, %v8807_v27  ;;  %v10572_v19 = vld [vmem:[%s11095_s17 + $0x1d8] ss:$100 sps:$4 sm:$0xff]   ;;  %v10582_v49 = vld [vmem:[%s11095_s17 + $0x368] ss:$100 sps:$4 sm:$0xff]  }
 0x276   : > { %4061 = vmatmul.mubr.bf16.gmra.mrb[36].mxu0 %v10567_v56  ;;  %v10601_v27 = vld [vmem:[%s13516_s1 + $0x538] sm:$0xff]  }
 0x277   : > { %v12088_v23 = vadd.f32 %v8809_v53, %v11901_v6  ;;  %4068 = vmatprep.mubr.bf16.mxu0 %v10574_v42  ;;  %9077 = vmatpush3.bf16.msra.mxu0 %v10576_v48  ;;  %v10586_v6 = vld [vmem:[%s13516_s1 + $0x520] sm:$0xff]   ;;  %v10589_v53 = vld [vmem:[%s11095_s17 + $0x434] ss:$100 sps:$4 sm:$0xff]  }
 0x278   : > { %9078 = vmatprep.subr.bf16.mxu0 %v10580_v52 }
 0x279   : > { %v8810_v1 = vpop.f32.mrb[188].mxu0 }
 0x27a   : > { %v8811_v39 = vpop.f32.mrb[189].mxu0 }
 0x27b   : > { %v8812_v60 = vadd.f32 %v8811_v39, %v8810_v1  ;;  %v8813_v20 = vpop.f32.mrb[190].mxu0  ;;  %9079 = vmatpush3.bf16.msra.mxu0 %v10581_v0 }
 0x27c   : > { %v8814_v47 = vpop.f32.mrb[191].mxu0  ;;  %9080 = vmatprep.subr.bf16.mxu0 %v10585_v58 }
 0x27d   : > { %v12105_v18 = vadd.f32 %v8812_v60, %v11936_v29  ;;  %v8815_v17 = vadd.f32 %v8814_v47, %v8813_v20  ;;  %v10577_v29 = vld [vmem:[%s11095_s17 + $0x2a0] ss:$100 sps:$4 sm:$0xff]   ;;  %v10587_v60 = vld [vmem:[%s11095_s17 + $0x430] ss:$100 sps:$4 sm:$0xff]  }
 0x27e   : > { %4069 = vmatmul.mubr.bf16.gmra.mrb[40].mxu0 %v10572_v19 }
 0x27f   : > { %v12108_v7 = vadd.f32 %v8815_v17, %v11945_v37  ;;  %4076 = vmatprep.mubr.bf16.mxu0 %v10579_v12  ;;  %9081 = vmatpush3.bf16.msra.mxu0 %v10586_v6  ;;  %v10596_v37 = vld [vmem:[%s13516_s1 + $0x530] sm:$0xff]   ;;  %v10594_v6 = vld [vmem:[%s11095_s17 + $0x4fc] ss:$100 sps:$4 sm:$0xff]  }
 0x280   : > { %9082 = vmatprep.subr.bf16.mxu0 %v10590_v22 }
 0x281   : > { %v8832_v43 = vpop.f32.mrb[192].mxu0 }
 0x282   : > { %v8833_v24 = vpop.f32.mrb[193].mxu0 }
 0x283   : > { %v8834_v30 = vadd.f32 %v8833_v24, %v8832_v43  ;;  %v8835_v33 = vpop.f32.mrb[194].mxu0  ;;  %9083 = vmatpush3.bf16.msra.mxu0 %v10591_v25  ;;  %v10592_v25 = vld [vmem:[%s11095_s17 + $0x4f8] ss:$100 sps:$4 sm:$0xff]   ;;  %v10599_v24 = vld [vmem:[%s11095_s17 + $0x5c4] ss:$100 sps:$4 sm:$0xff]  }
 0x284   : > { %v8836_v40 = vpop.f32.mrb[195].mxu0  ;;  %9084 = vmatprep.subr.bf16.mxu0 %v10595_v26 }
 0x285   : > { %v12125_v45 = vadd.f32 %v8834_v30, %v11980_v8  ;;  %v8837_v56 = vadd.f32 %v8836_v40, %v8835_v33 }
 0x286   : > { %4077 = vmatmul.mubr.bf16.gmra.mrb[44].mxu0 %v10577_v29 }
 0x287   : > { %v12128_v46 = vadd.f32 %v8837_v56, %v11989_v5  ;;  %4084 = vmatprep.mubr.bf16.mxu0 %v10584_v44  ;;  %9085 = vmatpush3.bf16.msra.mxu0 %v10596_v37  ;;  %v10597_v37 = vld [vmem:[%s11095_s17 + $0x5c0] ss:$100 sps:$4 sm:$0xff]   ;;  %v10604_v56 = vld [vmem:[%s11095_s17 + $0x54] ss:$100 sps:$4 sm:$0xff]  }
 0x288   : > { %9086 = vmatprep.subr.bf16.mxu0 %v10600_v41 }
 0x289   : > { %v8838_v42 = vpop.f32.mrb[196].mxu0 }
 0x28a   : > { %v8839_v48 = vpop.f32.mrb[197].mxu0 }
 0x28b   : > { %v8840_v52 = vadd.f32 %v8839_v48, %v8838_v42  ;;  %v8841_v8 = vpop.f32.mrb[198].mxu0  ;;  %9087 = vmatpush3.bf16.msra.mxu0 %v10601_v27 }
 0x28c   : > { %v8842_v0 = vpop.f32.mrb[199].mxu0  ;;  %9136 = vmatprep.subr.bf16.mxu0 %v11854_v54 }
 0x28d   : > { %v12137_v5 = vadd.f32 %v8840_v52, %v12018_v16  ;;  %v8843_v58 = vadd.f32 %v8842_v0, %v8841_v8  ;;  %v10602_v52 = vld [vmem:[%s11095_s17 + $0x50] ss:$100 sps:$4 sm:$0xff]   ;;  %v10610_v0 = vld [vmem:[%s11095_s17 + $0x11c] ss:$100 sps:$4 sm:$0xff]  }
 0x28e   : > { %4085 = vmatmul.mubr.bf16.gmra.mrb[48].mxu0 %v10582_v49 }
 0x28f   : > { %v12140_v1 = vadd.f32 %v8843_v58, %v12024_v15  ;;  %4092 = vmatprep.mubr.bf16.mxu0 %v10589_v53 }
 0x291   : > { %v8844_v39 = vpop.f32.mrb[200].mxu0 }
 0x292   : > { %v8845_v19 = vpop.f32.mrb[201].mxu0 }
 0x293   : > { %v8846_v20 = vadd.f32 %v8845_v19, %v8844_v39  ;;  %v8847_v12 = vpop.f32.mrb[202].mxu0 }
 0x294   : > { %v8848_v47 = vpop.f32.mrb[203].mxu0 }
 0x295   : > { %v12145_v54 = vadd.f32 %v8846_v20, %v12029_v28  ;;  %v8849_v16 = vadd.f32 %v8848_v47, %v8847_v12  ;;  %v10608_v20 = vld [vmem:[%s11095_s17 + $0x118] ss:$100 sps:$4 sm:$0xff]  }
 0x296   : > { %4093 = vmatmul.mubr.bf16.gmra.mrb[52].mxu0 %v10587_v60 }
 0x297   : > { %v12148_v22 = vadd.f32 %v8849_v16, %v12034_v13  ;;  %4100 = vmatprep.mubr.bf16.mxu0 %v10594_v6 }
 0x299   : > { %v8850_v15 = vpop.f32.mrb[204].mxu0 }
 0x29a   : > { %v8851_v17 = vpop.f32.mrb[205].mxu0 }
 0x29b   : > { %v8852_v26 = vadd.f32 %v8851_v17, %v8850_v15  ;;  %v8853_v43 = vpop.f32.mrb[206].mxu0  ;;  %v10615_v15 = vld [vmem:[%s11095_s17 + $0x1e0] ss:$100 sps:$4 sm:$0xff]  }
 0x29c   : > { %v8854_v29 = vpop.f32.mrb[207].mxu0 }
 0x29d   : > { %v12153_v30 = vadd.f32 %v8852_v26, %v12039_v50  ;;  %v8855_v28 = vadd.f32 %v8854_v29, %v8853_v43 }
 0x29e   : > { %4101 = vmatmul.mubr.bf16.gmra.mrb[56].mxu0 %v10592_v25 }
 0x29f   : > { %v12156_v33 = vadd.f32 %v8855_v28, %v12044_v55  ;;  %4108 = vmatprep.mubr.bf16.mxu0 %v10599_v24  ;;  %v10622_v24 = vld [vmem:[%s11095_s17 + $0x2a8] ss:$100 sps:$4 sm:$0xff]  }
 0x2a1   : > { %v8856_v13 = vpop.f32.mrb[208].mxu0 }
 0x2a2   : > { %v8857_v44 = vpop.f32.mrb[209].mxu0 }
 0x2a3   : > { %v8858_v40 = vadd.f32 %v8857_v44, %v8856_v13  ;;  %v8859_v41 = vpop.f32.mrb[210].mxu0 }
 0x2a4   : > { %v8860_v27 = vpop.f32.mrb[211].mxu0 }
 0x2a5   : > { %v12161_v42 = vadd.f32 %v8858_v40, %v12049_v10  ;;  %v8861_v50 = vadd.f32 %v8860_v27, %v8859_v41  ;;  %v10636_v27 = vld [vmem:[%s11095_s17 + $0x438] ss:$100 sps:$4 sm:$0xff]  }
 0x2a6   : > { %4109 = vmatmul.mubr.bf16.gmra.mrb[60].mxu0 %v10597_v37  ;;  %v10638_v37 = vld [vmem:[%s11095_s17 + $0x43c] ss:$100 sps:$4 sm:$0xff]  }
 0x2a7   : > { %v12164_v48 = vadd.f32 %v8861_v50, %v12054_v14  ;;  %4149 = vmatprep.mubr.bf16.mxu0 %v10604_v56 }
 0x2a9   : > { %v8862_v55 = vpop.f32.mrb[212].mxu0 }
 0x2aa   : > { %v8863_v49 = vpop.f32.mrb[213].mxu0 }
 0x2ab   : > { %v8864_v8 = vadd.f32 %v8863_v49, %v8862_v55  ;;  %v8865_v53 = vpop.f32.mrb[214].mxu0 }
 0x2ac   : > { %v8866_v58 = vpop.f32.mrb[215].mxu0 }
 0x2ad   : > { %v12169_v39 = vadd.f32 %v8864_v8, %v12065_v32  ;;  %v8867_v10 = vadd.f32 %v8866_v58, %v8865_v53  ;;  %v10617_v32 = vld [vmem:[%s11095_s17 + $0x1e4] ss:$100 sps:$4 sm:$0xff]  }
 0x2ae   : > { %4150 = vmatmul.mubr.bf16.vlgmr.msra.gmra.mrb[64].mxu0 %v10602_v52 }
 0x2af   : > { %v12172_v19 = vadd.f32 %v8867_v10, %v12068_v4  ;;  %9137 = vmatpush3.bf16.msra.mxu0 %v11865_v2  ;;  %4157 = vmatprep.mubr.bf16.mxu0 %v10610_v0  ;;  %v10642_v0 = vld [vmem:[%s11095_s17 + $0x500] ss:$100 sps:$4 sm:$0xff]  }
 0x2b0   : > { %9138 = vmatprep.subr.bf16.mxu0 %v11876_v61 }
 0x2b1   : > { %v8868_v14 = vpop.f32.mrb[216].mxu0 }
 0x2b2   : > { %v8869_v60 = vpop.f32.mrb[217].mxu0 }
 0x2b3   : > { %v8870_v12 = vadd.f32 %v8869_v60, %v8868_v14  ;;  %v8871_v6 = vpop.f32.mrb[218].mxu0  ;;  %9139 = vmatpush3.bf16.msra.mxu0 %v11885_v59  ;;  %v10650_v14 = vld [vmem:[%s11095_s17 + $0x5cc] ss:$100 sps:$4 sm:$0xff]  }
 0x2b4   : > { %v8872_v47 = vpop.f32.mrb[219].mxu0  ;;  %9140 = vmatprep.subr.bf16.mxu0 %v11898_v3  ;;  %v10624_v3 = vld [vmem:[%s11095_s17 + $0x2ac] ss:$100 sps:$4 sm:$0xff]  }
 0x2b5   : > { %v12181_v4 = vadd.f32 %v8870_v12, %v12085_v11  ;;  %v8873_v2 = vadd.f32 %v8872_v47, %v8871_v6 }
 0x2b6   : > { %4158 = vmatmul.mubr.bf16.gmra.mrb[68].mxu0 %v10608_v20 }
 0x2b7   : > { %v12184_v61 = vadd.f32 %v8873_v2, %v12088_v23  ;;  %4165 = vmatprep.mubr.bf16.mxu0 %v10617_v32  ;;  %9141 = vmatpush3.bf16.msra.mxu0 %v11909_v21  ;;  %v10648_v32 = vld [vmem:[%s11095_s17 + $0x5c8] ss:$100 sps:$4 sm:$0xff]  }
 0x2b8   : > { %9142 = vmatprep.subr.bf16.mxu0 %v11920_v31 }
 0x2b9   : > { %v8874_v16 = vpop.f32.mrb[220].mxu0 }
 0x2ba   : > { %v8875_v59 = vpop.f32.mrb[221].mxu0 }
 0x2bb   : > { %v8876_v17 = vadd.f32 %v8875_v59, %v8874_v16  ;;  %v8877_v25 = vpop.f32.mrb[222].mxu0  ;;  %9143 = vmatpush3.bf16.msra.mxu0 %v11929_v35  ;;  %v10656_v16 = vld [vmem:[%s11095_s17 + $0x5c] ss:$100 sps:$4 sm:$0xff]  }
 0x2bc   : > { %v8878_v11 = vpop.f32.mrb[223].mxu0  ;;  %9144 = vmatprep.subr.bf16.mxu0 %v11942_v36  ;;  %v10631_v36 = vld [vmem:[%s11095_s17 + $0x374] ss:$100 sps:$4 sm:$0xff]  }
 0x2bd   : > { %v12193_v23 = vadd.f32 %v8876_v17, %v12105_v18  ;;  %v8879_v26 = vadd.f32 %v8878_v11, %v8877_v25 }
 0x2be   : > { %4166 = vmatmul.mubr.bf16.gmra.mrb[72].mxu0 %v10615_v15 }
 0x2bf   : > { %v12196_v21 = vadd.f32 %v8879_v26, %v12108_v7  ;;  %4173 = vmatprep.mubr.bf16.mxu0 %v10624_v3  ;;  %9145 = vmatpush3.bf16.msra.mxu0 %v11953_v38  ;;  %v10654_v3 = vld [vmem:[%s11095_s17 + $0x58] ss:$100 sps:$4 sm:$0xff]  }
 0x2c0   : > { %9146 = vmatprep.subr.bf16.mxu0 %v11964_v34  ;;  %v12215_v34 = vld [vmem:[%s13516_s1 + $0x600] sm:$0xff]  }
 0x2c1   : > { %v8896_v31 = vpop.f32.mrb[224].mxu0 }
 0x2c2   : > { %v8897_v43 = vpop.f32.mrb[225].mxu0 }
 0x2c3   : > { %v8898_v35 = vadd.f32 %v8897_v43, %v8896_v31  ;;  %v8899_v29 = vpop.f32.mrb[226].mxu0  ;;  %9147 = vmatpush3.bf16.msra.mxu0 %v11973_v51  ;;  %v10661_v31 = vld [vmem:[%s11095_s17 + $0x124] ss:$100 sps:$4 sm:$0xff]  }
 0x2c4   : > { %v8900_v18 = vpop.f32.mrb[227].mxu0  ;;  %9148 = vmatprep.subr.bf16.mxu0 %v11986_v57 }
 0x2c5   : > { %v12205_v7 = vadd.f32 %v8898_v35, %v12125_v45  ;;  %v8901_v28 = vadd.f32 %v8900_v18, %v8899_v29  ;;  %v10629_v45 = vld [vmem:[%s11095_s17 + $0x370] ss:$100 sps:$4 sm:$0xff]  }
 0x2c6   : > { %4174 = vmatmul.mubr.bf16.gmra.mrb[76].mxu0 %v10622_v24  ;;  %v10662_v29 = vld [vmem:[%s13516_s1 + $0x610] sm:$0xff]  }
 0x2c7   : > { %v12208_v38 = vadd.f32 %v8901_v28, %v12128_v46  ;;  %4181 = vmatprep.mubr.bf16.mxu0 %v10631_v36  ;;  %9149 = vmatpush3.bf16.msra.mxu0 %v11997_v63  ;;  %v10659_v28 = vld [vmem:[%s11095_s17 + $0x120] ss:$100 sps:$4 sm:$0xff]  }
 0x2c8   : > { %9150 = vmatprep.subr.bf16.mxu0 %v12008_v62 }
 0x2c9   : > { %v8902_v51 = vpop.f32.mrb[228].mxu0 }
 0x2ca   : > { %v8903_v57 = vpop.f32.mrb[229].mxu0 }
 0x2cb   : > { %v8904_v13 = vadd.f32 %v8903_v57, %v8902_v51  ;;  %v8905_v44 = vpop.f32.mrb[230].mxu0  ;;  %9151 = vmatpush3.bf16.msra.mxu0 %v12014_v9  ;;  %v10644_v9 = vld [vmem:[%s11095_s17 + $0x504] ss:$100 sps:$4 sm:$0xff]  }
 0x2cc   : > { %v8906_v46 = vpop.f32.mrb[231].mxu0  ;;  %9459 = vmatprep.subr.bf16.mxu0 %v12215_v34 }
 0x2cd   : > { %v12222_v63 = vadd.f32 %v8904_v13, %v12137_v5  ;;  %v8907_v62 = vadd.f32 %v8906_v46, %v8905_v44 }
 0x2ce   : > { %4182 = vmatmul.mubr.bf16.gmra.mrb[80].mxu0 %v10629_v45 }
 0x2cf   : > { %v12225_v40 = vadd.f32 %v8907_v62, %v12140_v1  ;;  %4189 = vmatprep.mubr.bf16.mxu0 %v10638_v37  ;;  %v10667_v37 = vld [vmem:[%s13516_s1 + $0x620] sm:$0xff]  }
 0x2d1   : > { %v8908_v41 = vpop.f32.mrb[232].mxu0 }
 0x2d2   : > { %v8909_v56 = vpop.f32.mrb[233].mxu0 }
 0x2d3   : > { %v8910_v50 = vadd.f32 %v8909_v56, %v8908_v41  ;;  %v8911_v55 = vpop.f32.mrb[234].mxu0  ;;  %v10664_v41 = vld [vmem:[%s11095_s17 + $0x1e8] ss:$100 sps:$4 sm:$0xff]  }
 0x2d4   : > { %v8912_v49 = vpop.f32.mrb[235].mxu0 }
 0x2d5   : > { %v12230_v52 = vadd.f32 %v8910_v50, %v12145_v54  ;;  %v8913_v5 = vadd.f32 %v8912_v49, %v8911_v55 }
 0x2d6   : > { %4190 = vmatmul.mubr.bf16.gmra.mrb[84].mxu0 %v10636_v27 }
 0x2d7   : > { %v12233_v8 = vadd.f32 %v8913_v5, %v12148_v22  ;;  %4197 = vmatprep.mubr.bf16.mxu0 %v10644_v9  ;;  %v10672_v5 = vld [vmem:[%s13516_s1 + $0x630] sm:$0xff]  }
 0x2d9   : > { %v8914_v1 = vpop.f32.mrb[236].mxu0 }
 0x2da   : > { %v8915_v53 = vpop.f32.mrb[237].mxu0 }
 0x2db   : > { %v8916_v58 = vadd.f32 %v8915_v53, %v8914_v1  ;;  %v8917_v10 = vpop.f32.mrb[238].mxu0 }
 0x2dc   : > { %v8918_v60 = vpop.f32.mrb[239].mxu0 }
 0x2dd   : > { %v12238_v20 = vadd.f32 %v8916_v58, %v12153_v30  ;;  %v8919_v54 = vadd.f32 %v8918_v60, %v8917_v10 }
 0x2de   : > { %4198 = vmatmul.mubr.bf16.gmra.mrb[88].mxu0 %v10642_v0  ;;  %v10669_v0 = vld [vmem:[%s11095_s17 + $0x2b0] ss:$100 sps:$4 sm:$0xff]  }
 0x2df   : > { %v12241_v12 = vadd.f32 %v8919_v54, %v12156_v33  ;;  %4205 = vmatprep.mubr.bf16.mxu0 %v10650_v14 }
 0x2e1   : > { %v8920_v22 = vpop.f32.mrb[240].mxu0 }
 0x2e2   : > { %v8921_v6 = vpop.f32.mrb[241].mxu0 }
 0x2e3   : > { %v8922_v47 = vadd.f32 %v8921_v6, %v8920_v22  ;;  %v8923_v2 = vpop.f32.mrb[242].mxu0 }
 0x2e4   : > { %v8924_v59 = vpop.f32.mrb[243].mxu0 }
 0x2e5   : > { %v12246_v15 = vadd.f32 %v8922_v47, %v12161_v42  ;;  %v8925_v30 = vadd.f32 %v8924_v59, %v8923_v2  ;;  %v10658_v42 = vld [vmem:[%s13516_s1 + $0x608] sm:$0xff]   ;;  %v10676_v59 = vld [vmem:[%s11095_s17 + $0x1f0] ss:$100 sps:$4 sm:$0xff]  }
 0x2e6   : > { %4206 = vmatmul.mubr.bf16.gmra.mrb[92].mxu0 %v10648_v32  ;;  %v10675_v47 = vld [vmem:[%s11095_s17 + $0x128] ss:$100 sps:$4 sm:$0xff]  }
 0x2e7   : > { %v12249_v17 = vadd.f32 %v8925_v30, %v12164_v48  ;;  %4246 = vmatprep.mubr.bf16.mxu0 %v10656_v16 }
 0x2e9   : > { %v8926_v33 = vpop.f32.mrb[244].mxu0 }
 0x2ea   : > { %v8927_v25 = vpop.f32.mrb[245].mxu0 }
 0x2eb   : > { %v8928_v11 = vadd.f32 %v8927_v25, %v8926_v33  ;;  %v8929_v26 = vpop.f32.mrb[246].mxu0 }
 0x2ec   : > { %v8930_v43 = vpop.f32.mrb[247].mxu0 }
 0x2ed   : > { %v12257_v24 = vadd.f32 %v8928_v11, %v12169_v39  ;;  %v8931_v35 = vadd.f32 %v8930_v43, %v8929_v26  ;;  %v10666_v39 = vld [vmem:[%s11095_s17 + $0x1ec] ss:$100 sps:$4 sm:$0xff]   ;;  %v10677_v11 = vld [vmem:[%s11095_s17 + $0x2b8] ss:$100 sps:$4 sm:$0xff]   ;;  %v10678_v43 = vld [vmem:[%s11095_s17 + $0x380] ss:$100 sps:$4 sm:$0xff]  }
 0x2ee   : > { %4247 = vmatmul.mubr.bf16.vlgmr.msra.gmra.mrb[96].mxu0 %v10654_v3 }
 0x2ef   : > { %v12260_v48 = vadd.f32 %v8931_v35, %v12172_v19  ;;  %9460 = vmatpush3.bf16.msra.mxu0 %v12215_v34  ;;  %4254 = vmatprep.mubr.bf16.mxu0 %v10661_v31  ;;  %v10663_v19 = vld [vmem:[%s13516_s1 + $0x618] sm:$0xff]  }
 0x2f0   : > { %9461 = vmatprep.subr.bf16.mxu0 %v10658_v42 }
 0x2f1   : > { %v8932_v36 = vpop.f32.mrb[248].mxu0 }
 0x2f2   : > { %v8933_v18 = vpop.f32.mrb[249].mxu0 }
 0x2f3   : > { %v8934_v51 = vadd.f32 %v8933_v18, %v8932_v36  ;;  %v8935_v57 = vpop.f32.mrb[250].mxu0  ;;  %9462 = vmatpush3.bf16.msra.mxu0 %v10658_v42  ;;  %v10679_v18 = vld [vmem:[%s11095_s17 + $0x448] ss:$100 sps:$4 sm:$0xff]  }
 0x2f4   : > { %v8936_v45 = vpop.f32.mrb[251].mxu0  ;;  %9463 = vmatprep.subr.bf16.mxu0 %v10662_v29 }
 0x2f5   : > { %v12272_v34 = vadd.f32 %v8934_v51, %v12181_v4  ;;  %v8937_v13 = vadd.f32 %v8936_v45, %v8935_v57  ;;  %v10671_v4 = vld [vmem:[%s11095_s17 + $0x2b4] ss:$100 sps:$4 sm:$0xff]  }
 0x2f6   : > { %4255 = vmatmul.mubr.bf16.gmra.mrb[100].mxu0 %v10659_v28  ;;  %v10680_v57 = vld [vmem:[%s11095_s17 + $0x510] ss:$100 sps:$4 sm:$0xff]  }
 0x2f7   : > { %v12275_v44 = vadd.f32 %v8937_v13, %v12184_v61  ;;  %9464 = vmatpush3.bf16.msra.mxu0 %v10662_v29  ;;  %4262 = vmatprep.mubr.bf16.mxu0 %v10666_v39  ;;  %v10668_v61 = vld [vmem:[%s13516_s1 + $0x628] sm:$0xff]  }
 0x2f8   : > { %9465 = vmatprep.subr.bf16.mxu0 %v10663_v19 }
 0x2f9   : > { %v8938_v46 = vpop.f32.mrb[252].mxu0 }
 0x2fa   : > { %v8939_v62 = vpop.f32.mrb[253].mxu0 }
 0x2fb   : > { %v8940_v56 = vadd.f32 %v8939_v62, %v8938_v46  ;;  %v8941_v27 = vpop.f32.mrb[254].mxu0  ;;  %9466 = vmatpush3.bf16.msra.mxu0 %v10663_v19 }
 0x2fc   : > { %v8942_v50 = vpop.f32.mrb[255].mxu0  ;;  %9467 = vmatprep.subr.bf16.mxu0 %v10667_v37 }
 0x2fd   : > { %v12286_v55 = vadd.f32 %v8940_v56, %v12193_v23  ;;  %v8943_v9 = vadd.f32 %v8942_v50, %v8941_v27  ;;  %v10674_v23 = vld [vmem:[%s11095_s17 + $0x60] ss:$100 sps:$4 sm:$0xff]  }
 0x2fe   : > { %4263 = vmatmul.mubr.bf16.gmra.mrb[104].mxu0 %v10664_v41 }
 0x2ff   : > { %v12289_v49 = vadd.f32 %v8943_v9, %v12196_v21  ;;  %9468 = vmatpush3.bf16.msra.mxu0 %v10667_v37  ;;  %4270 = vmatprep.mubr.bf16.mxu0 %v10671_v4  ;;  %v10673_v21 = vld [vmem:[%s13516_s1 + $0x638] sm:$0xff]  }
 0x300   : > { %9469 = vmatprep.subr.bf16.mxu0 %v10668_v61  ;;  %v10681_v37 = vld [vmem:[%s11095_s17 + $0x5d8] ss:$100 sps:$4 sm:$0xff]  }
 0x301   : > { %v8960_v1 = vpop.f32.mrb[0].mxu0 }
 0x302   : > { %v8961_v53 = vpop.f32.mrb[1].mxu0 }
 0x303   : > { %v8962_v58 = vadd.f32 %v8961_v53, %v8960_v1  ;;  %v8963_v10 = vpop.f32.mrb[2].mxu0  ;;  %9470 = vmatpush3.bf16.msra.mxu0 %v10668_v61 }
 0x304   : > { %v8964_v14 = vpop.f32.mrb[3].mxu0  ;;  %9471 = vmatprep.subr.bf16.mxu0 %v10672_v5 }
 0x305   : > { %v12300_v60 = vadd.f32 %v8962_v58, %v12205_v7  ;;  %v8965_v54 = vadd.f32 %v8964_v14, %v8963_v10 }
 0x306   : > { %4271 = vmatmul.mubr.bf16.gmra.mrb[108].mxu0 %v10669_v0 }
 0x307   : > { %v12303_v22 = vadd.f32 %v8965_v54, %v12208_v38  ;;  %9472 = vmatpush3.bf16.msra.mxu0 %v10672_v5  ;;  %9475 = vmatprep.mubr.bf16.mxu0 %v10674_v23 }
 0x308   : > { %9473 = vmatprep.subr.bf16.mxu0 %v10673_v21 }
 0x309   : > { %v8966_v6 = vpop.f32.mrb[4].mxu0 }
 0x30a   : > { %v8967_v32 = vpop.f32.mrb[5].mxu0 }
 0x30b   : > { %v8968_v2 = vadd.f32 %v8967_v32, %v8966_v6  ;;  %v8969_v16 = vpop.f32.mrb[6].mxu0  ;;  %9474 = vmatpush3.bf16.msra.mxu0 %v10673_v21 }
 0x30c   : > { %v8970_v30 = vpop.f32.mrb[7].mxu0 }
 0x30d   : > { %v12308_v7 = vadd.f32 %v8968_v2, %v12222_v63  ;;  %v8971_v33 = vadd.f32 %v8970_v30, %v8969_v16 }
 0x30e   : > { %9476 = vmatmul.mubr.bf16.vlgmr.msra.gmra.mrb[112].mxu0 %v10675_v47 }
 0x30f   : > { %v12311_v38 = vadd.f32 %v8971_v33, %v12225_v40  ;;  %9479 = vmatprep.mubr.bf16.mxu0 %v10676_v59 }
 0x311   : > { %v8972_v25 = vpop.f32.mrb[8].mxu0 }
 0x312   : > { %v8973_v3 = vpop.f32.mrb[9].mxu0 }
 0x313   : > { %v8974_v26 = vadd.f32 %v8973_v3, %v8972_v25  ;;  %v8975_v31 = vpop.f32.mrb[10].mxu0 }
 0x314   : > { %v8976_v42 = vpop.f32.mrb[11].mxu0 }
 0x315   : > { %v12316_v35 = vadd.f32 %v8974_v26, %v12230_v52  ;;  %v8977_v63 = vadd.f32 %v8976_v42, %v8975_v31 }
 0x316   : > { %9480 = vmatmul.mubr.bf16.gmra.mrb[116].mxu0 %v10677_v11 }
 0x317   : > { %v12319_v29 = vadd.f32 %v8977_v63, %v12233_v8  ;;  %9483 = vmatprep.mubr.bf16.mxu0 %v10678_v43 }
 0x319   : > { %v8978_v40 = vpop.f32.mrb[12].mxu0 }
 0x31a   : > { %v8979_v36 = vpop.f32.mrb[13].mxu0 }
 0x31b   : > { %v8980_v28 = vadd.f32 %v8979_v36, %v8978_v40  ;;  %v8981_v51 = vpop.f32.mrb[14].mxu0 }
 0x31c   : > { %v8982_v39 = vpop.f32.mrb[15].mxu0 }
 0x31d   : > { %v12324_v45 = vadd.f32 %v8980_v28, %v12238_v20  ;;  %v8983_v19 = vadd.f32 %v8982_v39, %v8981_v51 }
 0x31e   : > { %9484 = vmatmul.mubr.bf16.gmra.mrb[120].mxu0 %v10679_v18 }
 0x31f   : > { %v12327_v52 = vadd.f32 %v8983_v19, %v12241_v12  ;;  %9487 = vmatprep.mubr.bf16.mxu0 %v10680_v57 }
 0x320   : > { %v9176_v41 = vpop.f32.mrb[0].mxu1 }
 0x321   : > { %v8984_v8 = vpop.f32.mrb[16].mxu0  ;;  %v9177_v27 = vpop.f32.mrb[1].mxu1 }
 0x322   : > { %v8985_v13 = vpop.f32.mrb[17].mxu0  ;;  %v12333_v20 = vadd.f32 %v9177_v27, %v9176_v41  ;;  %v9179_v61 = vpop.f32.mrb[2].mxu1 }
 0x323   : > { %v8986_v46 = vadd.f32 %v8985_v13, %v8984_v8  ;;  %v8987_v62 = vpop.f32.mrb[18].mxu0  ;;  %v9180_v9 = vpop.f32.mrb[3].mxu1 }
 0x324   : > { %v8988_v56 = vpop.f32.mrb[19].mxu0  ;;  %v12338_v5 = vadd.f32 %v9180_v9, %v9179_v61 }
 0x325   : > { %v12331_v4 = vadd.f32 %v8986_v46, %v12246_v15  ;;  %v8989_v50 = vadd.f32 %v8988_v56, %v8987_v62 }
 0x326   : > { %9488 = vmatmul.mubr.bf16.gmra.mrb[124].mxu0 %v10681_v37 }
 0x327   : > { %v12336_v12 = vadd.f32 %v8989_v50, %v12249_v17 }
 0x328   : > { %v9182_v10 = vpop.f32.mrb[4].mxu1 }
 0x329   : > { %v8990_v1 = vpop.f32.mrb[20].mxu0  ;;  %v9183_v14 = vpop.f32.mrb[5].mxu1 }
 0x32a   : > { %v8991_v53 = vpop.f32.mrb[21].mxu0  ;;  %v12343_v54 = vadd.f32 %v9183_v14, %v9182_v10  ;;  %v9185_v6 = vpop.f32.mrb[6].mxu1 }
 0x32b   : > { %v8992_v0 = vadd.f32 %v8991_v53, %v8990_v1  ;;  %v8993_v58 = vpop.f32.mrb[22].mxu0  ;;  %v9186_v32 = vpop.f32.mrb[7].mxu1 }
 0x32c   : > { %v8994_v23 = vpop.f32.mrb[23].mxu0  ;;  %v12348_v47 = vadd.f32 %v9186_v32, %v9185_v6 }
 0x32d   : > { %v12341_v15 = vadd.f32 %v8992_v0, %v12257_v24  ;;  %v8995_v21 = vadd.f32 %v8994_v23, %v8993_v58 }
 0x32f   : > { %v12346_v17 = vadd.f32 %v8995_v21, %v12260_v48 }
 0x330   : > { %v9188_v33 = vpop.f32.mrb[8].mxu1 }
 0x331   : > { %v8996_v2 = vpop.f32.mrb[24].mxu0  ;;  %v9189_v3 = vpop.f32.mrb[9].mxu1 }
 0x332   : > { %v8997_v16 = vpop.f32.mrb[25].mxu0  ;;  %v12353_v26 = vadd.f32 %v9189_v3, %v9188_v33  ;;  %v9191_v31 = vpop.f32.mrb[10].mxu1 }
 0x333   : > { %v8998_v59 = vadd.f32 %v8997_v16, %v8996_v2  ;;  %v8999_v30 = vpop.f32.mrb[26].mxu0  ;;  %v9192_v43 = vpop.f32.mrb[11].mxu1 }
 0x334   : > { %v9000_v25 = vpop.f32.mrb[27].mxu0  ;;  %v12358_v42 = vadd.f32 %v9192_v43, %v9191_v31 }
 0x335   : > { %v12351_v24 = vadd.f32 %v8998_v59, %v12272_v34  ;;  %v9001_v11 = vadd.f32 %v9000_v25, %v8999_v30 }
 0x337   : > { %v12356_v48 = vadd.f32 %v9001_v11, %v12275_v44 }
 0x338   : > { %v9194_v28 = vpop.f32.mrb[12].mxu1 }
 0x339   : > { %v9002_v63 = vpop.f32.mrb[28].mxu0  ;;  %v9195_v57 = vpop.f32.mrb[13].mxu1 }
 0x33a   : > { %v9003_v40 = vpop.f32.mrb[29].mxu0  ;;  %v12363_v19 = vadd.f32 %v9195_v57, %v9194_v28  ;;  %v9197_v8 = vpop.f32.mrb[14].mxu1  ;;  %v10962_v28 = vmov 0.0  }
 0x33b   : > { %v9004_v36 = vadd.f32 %v9003_v40, %v9002_v63  ;;  %v9005_v18 = vpop.f32.mrb[30].mxu0  ;;  %v9198_v13 = vpop.f32.mrb[15].mxu1  ;;  %9491 = vmatprep.subr.bf16.mxu1 %v10962_v28  ;;  %9991 = vmatprep.subr.bf16.mxu0 %v10962_v28 }
 0x33c   : > { %v9006_v51 = vpop.f32.mrb[31].mxu0  ;;  %v12368_v37 = vadd.f32 %v9198_v13, %v9197_v8  ;;  %9507 = vmatprep.mubr.msk.bf16.mxu1 %vm10963_vm0, %v10962_v28  ;;  %10007 = vmatprep.mubr.msk.bf16.mxu0 %vm10963_vm0, %v10962_v28 }
 0x33d   : > { %v12361_v34 = vadd.f32 %v9004_v36, %v12286_v55  ;;  %v9007_v39 = vadd.f32 %v9006_v51, %v9005_v18  ;;  %v10682_v18 = vld [vmem:[%s13518_s3] sm:$0xff]  }
 0x33e   : > { %9492 = vmatpush3.bf16.msra.mxu1 %v10682_v18 }
 0x33f   : > { %v12366_v44 = vadd.f32 %v9007_v39, %v12289_v49  ;;  %9493 = vmatprep.subr.bf16.mxu1 %v10962_v28 }
 0x341   : > { %v9024_v46 = vpop.f32.mrb[32].mxu0 }
 0x342   : > { %v9025_v62 = vpop.f32.mrb[33].mxu0 }
 0x343   : > { %v9026_v41 = vadd.f32 %v9025_v62, %v9024_v46  ;;  %v9027_v56 = vpop.f32.mrb[34].mxu0  ;;  %v10684_v46 = vld [vmem:[%s13518_s3 + $0x10] sm:$0xff]  }
 0x344   : > { %v9028_v27 = vpop.f32.mrb[35].mxu0 }
 0x345   : > { %v12371_v50 = vadd.f32 %v9026_v41, %v12300_v60  ;;  %v9029_v55 = vadd.f32 %v9028_v27, %v9027_v56  ;;  %v10685_v56 = vld [vmem:[%s13518_s3 + $0x18] sm:$0xff]  }
 0x347   : > { %v12374_v61 = vadd.f32 %v9029_v55, %v12303_v22 }
 0x349   : > { %v9030_v9 = vpop.f32.mrb[36].mxu0 }
 0x34a   : > { %v9031_v1 = vpop.f32.mrb[37].mxu0 }
 0x34b   : > { %v9032_v53 = vadd.f32 %v9031_v1, %v9030_v9  ;;  %v9033_v0 = vpop.f32.mrb[38].mxu0 }
 0x34c   : > { %v9034_v49 = vpop.f32.mrb[39].mxu0 }
 0x34d   : > { %v12377_v58 = vadd.f32 %v9032_v53, %v12308_v7  ;;  %v9035_v10 = vadd.f32 %v9034_v49, %v9033_v0  ;;  %v10686_v53 = vld [vmem:[%s13518_s3 + $0x20] sm:$0xff]  }
 0x34f   : > { %v12380_v23 = vadd.f32 %v9035_v10, %v12311_v38  ;;  %v10687_v10 = vld [vmem:[%s13518_s3 + $0x28] sm:$0xff]  }
 0x351   : > { %v9036_v14 = vpop.f32.mrb[40].mxu0 }
 0x352   : > { %v9037_v21 = vpop.f32.mrb[41].mxu0 }
 0x353   : > { %v9038_v60 = vadd.f32 %v9037_v21, %v9036_v14  ;;  %v9039_v6 = vpop.f32.mrb[42].mxu0 }
 0x354   : > { %v9040_v32 = vpop.f32.mrb[43].mxu0 }
 0x355   : > { %v12383_v22 = vadd.f32 %v9038_v60, %v12316_v35  ;;  %v9041_v2 = vadd.f32 %v9040_v32, %v9039_v6  ;;  %v10688_v32 = vld [vmem:[%s13518_s3 + $0x30] sm:$0xff]  }
 0x357   : > { %v12386_v16 = vadd.f32 %v9041_v2, %v12319_v29 }
 0x359   : > { %v9042_v59 = vpop.f32.mrb[44].mxu0 }
 0x35a   : > { %v9043_v30 = vpop.f32.mrb[45].mxu0 }
 0x35b   : > { %v9044_v7 = vadd.f32 %v9043_v30, %v9042_v59  ;;  %v9045_v33 = vpop.f32.mrb[46].mxu0  ;;  %v10689_v30 = vld [vmem:[%s13518_s3 + $0x38] sm:$0xff]  }
 0x35c   : > { %v9046_v25 = vpop.f32.mrb[47].mxu0 }
 0x35d   : > { %v12389_v38 = vadd.f32 %v9044_v7, %v12324_v45  ;;  %v9047_v3 = vadd.f32 %v9046_v25, %v9045_v33 }
 0x35f   : > { %v12392_v11 = vadd.f32 %v9047_v3, %v12327_v52 }
 0x361   : > { %v9048_v31 = vpop.f32.mrb[48].mxu0 }
 0x362   : > { %v9049_v43 = vpop.f32.mrb[49].mxu0 }
 0x363   : > { %v9050_v35 = vadd.f32 %v9049_v43, %v9048_v31  ;;  %v9051_v63 = vpop.f32.mrb[50].mxu0 }
 0x364   : > { %v9052_v40 = vpop.f32.mrb[51].mxu0 }
 0x365   : > { %v12395_v29 = vadd.f32 %v9050_v35, %v12331_v4  ;;  %v9053_v36 = vadd.f32 %v9052_v40, %v9051_v63  ;;  %v10683_v4 = vld [vmem:[%s13518_s3 + $0x8] sm:$0xff]  }
 0x366   : > { %9494 = vmatpush3.bf16.msra.mxu1 %v10683_v4 }
 0x367   : > { %v12403_v45 = vadd.f32 %v9053_v36, %v12336_v12  ;;  %9495 = vmatprep.subr.bf16.mxu1 %v10962_v28 }
 0x369   : > { %v9054_v52 = vpop.f32.mrb[52].mxu0 }
 0x36a   : > { %v9055_v51 = vpop.f32.mrb[53].mxu0  ;;  %9496 = vmatpush3.bf16.msra.mxu1 %v10684_v46 }
 0x36b   : > { %v9056_v57 = vadd.f32 %v9055_v51, %v9054_v52  ;;  %v9057_v39 = vpop.f32.mrb[54].mxu0  ;;  %9497 = vmatprep.subr.bf16.mxu1 %v10962_v28 }
 0x36c   : > { %v9058_v8 = vpop.f32.mrb[55].mxu0 }
 0x36d   : > { %v12411_v13 = vadd.f32 %v9056_v57, %v12341_v15  ;;  %v9059_v12 = vadd.f32 %v9058_v8, %v9057_v39 }
 0x36e   : > { %9498 = vmatpush3.bf16.msra.mxu1 %v10685_v56 }
 0x36f   : > { %v12417_v62 = vadd.f32 %v9059_v12, %v12346_v17  ;;  %9499 = vmatprep.subr.bf16.mxu1 %v10962_v28 }
 0x371   : > { %v9060_v41 = vpop.f32.mrb[56].mxu0 }
 0x372   : > { %v9061_v27 = vpop.f32.mrb[57].mxu0  ;;  %9500 = vmatpush3.bf16.msra.mxu1 %v10686_v53 }
 0x373   : > { %v9062_v55 = vadd.f32 %v9061_v27, %v9060_v41  ;;  %v9063_v15 = vpop.f32.mrb[58].mxu0  ;;  %9501 = vmatprep.subr.bf16.mxu1 %v10962_v28 }
 0x374   : > { %v9064_v9 = vpop.f32.mrb[59].mxu0 }
 0x375   : > { %v12425_v1 = vadd.f32 %v9062_v55, %v12351_v24  ;;  %v9065_v17 = vadd.f32 %v9064_v9, %v9063_v15 }
 0x376   : > { %9502 = vmatpush3.bf16.msra.mxu1 %v10687_v10 }
 0x377   : > { %v12431_v0 = vadd.f32 %v9065_v17, %v12356_v48  ;;  %9503 = vmatprep.subr.bf16.mxu1 %v10962_v28 }
 0x379   : > { %v9066_v49 = vpop.f32.mrb[60].mxu0 }
 0x37a   : > { %v9067_v14 = vpop.f32.mrb[61].mxu0  ;;  %9504 = vmatpush3.bf16.msra.mxu1 %v10688_v32 }
 0x37b   : > { %v9068_v21 = vadd.f32 %v9067_v14, %v9066_v49  ;;  %v9069_v24 = vpop.f32.mrb[62].mxu0  ;;  %9505 = vmatprep.subr.bf16.mxu1 %v10962_v28 }
 0x37c   : > { %v9070_v60 = vpop.f32.mrb[63].mxu0 }
 0x37d   : > { %v12439_v6 = vadd.f32 %v9068_v21, %v12361_v34  ;;  %v9071_v48 = vadd.f32 %v9070_v60, %v9069_v24 }
 0x37e   : > { %9506 = vmatpush3.bf16.msra.mxu1 %v10689_v30 }
 0x37f   : > { %v12445_v2 = vadd.f32 %v9071_v48, %v12366_v44  ;;  %9511 = vmatprep.subr.bf16.mxu1 %v10962_v28 }
 0x381   : > { %v9088_v59 = vpop.f32.mrb[64].mxu0 }
 0x382   : > { %v9089_v7 = vpop.f32.mrb[65].mxu0 }
 0x383   : > { %v9090_v33 = vadd.f32 %v9089_v7, %v9088_v59  ;;  %v9091_v34 = vpop.f32.mrb[66].mxu0 }
 0x384   : > { %v9092_v25 = vpop.f32.mrb[67].mxu0 }
 0x385   : > { %v12453_v3 = vadd.f32 %v9090_v33, %v12371_v50  ;;  %v9093_v44 = vadd.f32 %v9092_v25, %v9091_v34 }
 0x387   : > { %v12460_v31 = vadd.f32 %v9093_v44, %v12374_v61 }
 0x389   : > { %v9094_v43 = vpop.f32.mrb[68].mxu0 }
 0x38a   : > { %v9095_v35 = vpop.f32.mrb[69].mxu0 }
 0x38b   : > { %v9096_v63 = vadd.f32 %v9095_v35, %v9094_v43  ;;  %v9097_v40 = vpop.f32.mrb[70].mxu0 }
 0x38c   : > { %v9098_v36 = vpop.f32.mrb[71].mxu0 }
 0x38d   : > { %v12463_v18 = vadd.f32 %v9096_v63, %v12377_v58  ;;  %v9099_v50 = vadd.f32 %v9098_v36, %v9097_v40 }
 0x38f   : > { %v12466_v52 = vadd.f32 %v9099_v50, %v12380_v23 }
 0x391   : > { %v9100_v4 = vpop.f32.mrb[72].mxu0 }
 0x392   : > { %v9101_v51 = vpop.f32.mrb[73].mxu0 }
 0x393   : > { %v9102_v57 = vadd.f32 %v9101_v51, %v9100_v4  ;;  %v9103_v39 = vpop.f32.mrb[74].mxu0 }
 0x394   : > { %v9104_v8 = vpop.f32.mrb[75].mxu0 }
 0x395   : > { %v12469_v61 = vadd.f32 %v9102_v57, %v12383_v22  ;;  %v9105_v12 = vadd.f32 %v9104_v8, %v9103_v39 }
 0x397   : > { %v12472_v46 = vadd.f32 %v9105_v12, %v12386_v16 }
 0x399   : > { %v9106_v41 = vpop.f32.mrb[76].mxu0 }
 0x39a   : > { %v9107_v56 = vpop.f32.mrb[77].mxu0 }
 0x39b   : > { %v9108_v58 = vadd.f32 %v9107_v56, %v9106_v41  ;;  %v9109_v27 = vpop.f32.mrb[78].mxu0 }
 0x39c   : > { %v9110_v55 = vpop.f32.mrb[79].mxu0 }
 0x39d   : > { %v12475_v23 = vadd.f32 %v9108_v58, %v12389_v38  ;;  %v9111_v15 = vadd.f32 %v9110_v55, %v9109_v27 }
 0x39f   : > { %v12478_v9 = vadd.f32 %v9111_v15, %v12392_v11 }
 0x3a1   : > { %v9112_v17 = vpop.f32.mrb[80].mxu0 }
 0x3a2   : > { %v9113_v53 = vpop.f32.mrb[81].mxu0 }
 0x3a3   : > { %v9114_v22 = vadd.f32 %v9113_v53, %v9112_v17  ;;  %v9115_v49 = vpop.f32.mrb[82].mxu0 }
 0x3a4   : > { %v9116_v10 = vpop.f32.mrb[83].mxu0 }
 0x3a5   : > { %v4184_v16 = vadd.f32 %v9114_v22, %v12395_v29  ;;  %v9117_v14 = vadd.f32 %v9116_v10, %v9115_v49 }
 0x3a7   : > { %v4187_v21 = vadd.f32 %v9117_v14, %v12403_v45  ;;  %v12483_v24 = vadd.f32 %v12333_v20, %v4184_v16 }
 0x3a9   : > { %v9118_v60 = vpop.f32.mrb[84].mxu0  ;;  %v12486_v38 = vadd.f32 %v12338_v5, %v4187_v21 }
 0x3aa   : > { %v9119_v48 = vpop.f32.mrb[85].mxu0 }
 0x3ab   : > { %v9120_v11 = vadd.f32 %v9119_v48, %v9118_v60  ;;  %v9121_v32 = vpop.f32.mrb[86].mxu0 }
 0x3ac   : > { %v9122_v59 = vpop.f32.mrb[87].mxu0 }
 0x3ad   : > { %v4192_v30 = vadd.f32 %v9120_v11, %v12411_v13  ;;  %v9123_v7 = vadd.f32 %v9122_v59, %v9121_v32 }
 0x3af   : > { %v4195_v33 = vadd.f32 %v9123_v7, %v12417_v62  ;;  %v12491_v29 = vadd.f32 %v12343_v54, %v4192_v30 }
 0x3b1   : > { %v9124_v45 = vpop.f32.mrb[88].mxu0  ;;  %v12494_v20 = vadd.f32 %v12348_v47, %v4195_v33 }
 0x3b2   : > { %v9125_v34 = vpop.f32.mrb[89].mxu0 }
 0x3b3   : > { %v9126_v25 = vadd.f32 %v9125_v34, %v9124_v45  ;;  %v9127_v5 = vpop.f32.mrb[90].mxu0 }
 0x3b4   : > { %v9128_v44 = vpop.f32.mrb[91].mxu0 }
 0x3b5   : > { %v4200_v43 = vadd.f32 %v9126_v25, %v12425_v1  ;;  %v9129_v35 = vadd.f32 %v9128_v44, %v9127_v5 }
 0x3b7   : > { %v4203_v63 = vadd.f32 %v9129_v35, %v12431_v0  ;;  %v12499_v13 = vadd.f32 %v12353_v26, %v4200_v43 }
 0x3b9   : > { %v9130_v62 = vpop.f32.mrb[92].mxu0  ;;  %v12502_v54 = vadd.f32 %v12358_v42, %v4203_v63 }
 0x3ba   : > { %v9131_v40 = vpop.f32.mrb[93].mxu0 }
 0x3bb   : > { %v9132_v36 = vadd.f32 %v9131_v40, %v9130_v62  ;;  %v9133_v47 = vpop.f32.mrb[94].mxu0 }
 0x3bc   : > { %v9134_v50 = vpop.f32.mrb[95].mxu0 }
 0x3bd   : > { %v4208_v4 = vadd.f32 %v9132_v36, %v12439_v6  ;;  %v9135_v51 = vadd.f32 %v9134_v50, %v9133_v47 }
 0x3bf   : > { %v4211_v57 = vadd.f32 %v9135_v51, %v12445_v2  ;;  %v12507_v1 = vadd.f32 %v12363_v19, %v4208_v4 }
 0x3c1   : > { %v9152_v0 = vpop.f32.mrb[96].mxu0  ;;  %v12510_v26 = vadd.f32 %v12368_v37, %v4211_v57 }
 0x3c2   : > { %v9153_v39 = vpop.f32.mrb[97].mxu0 }
 0x3c3   : > { %v9154_v8 = vadd.f32 %v9153_v39, %v9152_v0  ;;  %v9155_v42 = vpop.f32.mrb[98].mxu0 }
 0x3c4   : > { %v9156_v12 = vpop.f32.mrb[99].mxu0 }
 0x3c5   : > { %v9157_v41 = vadd.f32 %v9156_v12, %v9155_v42  ;;  %v4249_v56 = vadd.f32 %v9154_v8, %v12453_v3 }
 0x3c7   : > { %v4252_v58 = vadd.f32 %v9157_v41, %v12460_v31 }
 0x3c9   : > { %v9158_v6 = vpop.f32.mrb[100].mxu0 }
 0x3ca   : > { %v9159_v27 = vpop.f32.mrb[101].mxu0 }
 0x3cb   : > { %v9160_v55 = vadd.f32 %v9159_v27, %v9158_v6  ;;  %v9161_v2 = vpop.f32.mrb[102].mxu0 }
 0x3cc   : > { %v9162_v15 = vpop.f32.mrb[103].mxu0 }
 0x3cd   : > { %v9163_v19 = vadd.f32 %v9162_v15, %v9161_v2  ;;  %v4257_v17 = vadd.f32 %v9160_v55, %v12463_v18 }
 0x3cf   : > { %v4260_v37 = vadd.f32 %v9163_v19, %v12466_v52 }
 0x3d1   : > { %v9164_v53 = vpop.f32.mrb[104].mxu0 }
 0x3d2   : > { %v9165_v22 = vpop.f32.mrb[105].mxu0 }
 0x3d3   : > { %v9166_v49 = vadd.f32 %v9165_v22, %v9164_v53  ;;  %v9167_v10 = vpop.f32.mrb[106].mxu0 }
 0x3d4   : > { %v9168_v16 = vpop.f32.mrb[107].mxu0 }
 0x3d5   : > { %v9169_v14 = vadd.f32 %v9168_v16, %v9167_v10  ;;  %v4265_v3 = vadd.f32 %v9166_v49, %v12469_v61  ;;  %v10690_v16 = vld [vmem:[%s13518_s3 + $0x40] sm:$0xff]  }
 0x3d7   : > { %v4268_v31 = vadd.f32 %v9169_v14, %v12472_v46 }
 0x3d9   : > { %v9170_v21 = vpop.f32.mrb[108].mxu0 }
 0x3da   : > { %v9171_v60 = vpop.f32.mrb[109].mxu0 }
 0x3db   : > { %v9172_v48 = vadd.f32 %v9171_v60, %v9170_v21  ;;  %v9173_v11 = vpop.f32.mrb[110].mxu0  ;;  %v10694_v21 = vld [vmem:[%s13518_s3 + $0x60] sm:$0xff]   ;;  %v10695_v60 = vld [vmem:[%s13518_s3 + $0x68] sm:$0xff]  }
 0x3dc   : > { %v9174_v32 = vpop.f32.mrb[111].mxu0 }
 0x3dd   : > { %v9175_v59 = vadd.f32 %v9174_v32, %v9173_v11  ;;  %v4273_v18 = vadd.f32 %v9172_v48, %v12475_v23  ;;  %v10696_v48 = vld [vmem:[%s13518_s3 + $0x70] sm:$0xff]   ;;  %v10697_v11 = vld [vmem:[%s13518_s3 + $0x78] sm:$0xff]   ;;  %v10698_v32 = vld [vmem:[%s13518_s3 + $0x80] sm:$0xff]  }
 0x3df   : > { %v4276_v52 = vadd.f32 %v9175_v59, %v12478_v9 }
 0x3e1   : > { %v9477_v30 = vpop.f32.mrb[112].mxu0 }
 0x3e2   : > { %v4354_v7 = vadd.f32 %v9477_v30, %v4257_v17  ;;  %v4345_v33 = vpop.f32.mrb[113].mxu0  ;;  %v10701_v30 = vld [vmem:[%s13518_s3 + $0x98] sm:$0xff]  }
 0x3e3   : > { %v4346_v45 = vadd.f32 %v4345_v33, %v4249_v56  ;;  %v9478_v34 = vpop.f32.mrb[114].mxu0  ;;  %v10703_v33 = vld [vmem:[%s13518_s3 + $0xa8] sm:$0xff]  }
 0x3e4   : > { %v4357_v25 = vadd.f32 %v9478_v34, %v4260_v37  ;;  %v4348_v5 = vpop.f32.mrb[115].mxu0  ;;  %v10705_v34 = vld [vmem:[%s13518_s3 + $0xb8] sm:$0xff]  }
 0x3e5   : > { %v4349_v61 = vadd.f32 %v4348_v5, %v4252_v58 }
 0x3e9   : > { %v9481_v44 = vpop.f32.mrb[116].mxu0 }
 0x3ea   : > { %v4370_v46 = vadd.f32 %v9481_v44, %v4273_v18  ;;  %v4361_v43 = vpop.f32.mrb[117].mxu0  ;;  %v10699_v18 = vld [vmem:[%s13518_s3 + $0x88] sm:$0xff]   ;;  %v10708_v44 = vld [vmem:[%s13518_s3 + $0xd0] sm:$0xff]  }
 0x3eb   : > { %v4362_v35 = vadd.f32 %v4361_v43, %v4265_v3  ;;  %v9482_v63 = vpop.f32.mrb[118].mxu0  ;;  %v10692_v3 = vld [vmem:[%s13518_s3 + $0x50] sm:$0xff]   ;;  %v10710_v43 = vld [vmem:[%s13518_s3 + $0xe0] sm:$0xff]  }
 0x3ec   : > { %v4410_v62 = vmax.f32 %v4354_v7, %v4370_v46  ;;  %v4373_v40 = vadd.f32 %v9482_v63, %v4276_v52  ;;  %v4364_v36 = vpop.f32.mrb[119].mxu0  ;;  %v10700_v52 = vld [vmem:[%s13518_s3 + $0x90] sm:$0xff]   ;;  %v10702_v7 = vld [vmem:[%s13518_s3 + $0xa0] sm:$0xff]   ;;  %v10709_v46 = vld [vmem:[%s13518_s3 + $0xd8] sm:$0xff]  }
 0x3ed   : > { %v4408_v47 = vmax.f32 %v4346_v45, %v4362_v35  ;;  %v4365_v23 = vadd.f32 %v4364_v36, %v4268_v31  ;;  %v10693_v31 = vld [vmem:[%s13518_s3 + $0x58] sm:$0xff]   ;;  %v10704_v45 = vld [vmem:[%s13518_s3 + $0xb0] sm:$0xff]   ;;  %v10711_v35 = vld [vmem:[%s13518_s3 + $0xe8] sm:$0xff]  }
 0x3ee   : > { %v4411_v50 = vmax.f32 %v4357_v25, %v4373_v40  ;;  %v10706_v25 = vld [vmem:[%s13518_s3 + $0xc0] sm:$0xff]   ;;  %v10712_v63 = vld [vmem:[%s13518_s3 + $0xf0] sm:$0xff]  }
 0x3ef   : > { %v4409_v9 = vmax.f32 %v4349_v61, %v4365_v23  ;;  %v10707_v61 = vld [vmem:[%s13518_s3 + $0xc8] sm:$0xff]   ;;  %v10714_v40 = vld [vmem:[%s13518_s3 + $0x100] sm:$0xff]   ;;  %v10716_v23 = vld [vmem:[%s13518_s3 + $0x110] sm:$0xff]  }
 0x3f1   : > { %v9485_v4 = vpop.f32.mrb[120].mxu0 }
 0x3f2   : > { %v4386_v51 = vadd.f32 %v9485_v4, %v12491_v29  ;;  %v4377_v57 = vpop.f32.mrb[121].mxu0  ;;  %v10719_v4 = vld [vmem:[%s13518_s3 + $0x128] sm:$0xff]  }
 0x3f3   : > { %v4378_v0 = vadd.f32 %v4377_v57, %v12483_v24  ;;  %v9486_v39 = vpop.f32.mrb[122].mxu0  ;;  %v7828_v24 = vld [vmem:[%s13517_s2] ss:$0 sm:$0xff]  ;;  %v10721_v57 = vld [vmem:[%s13518_s3 + $0x138] sm:$0xff]  }
 0x3f4   : > { %v4389_v8 = vadd.f32 %v9486_v39, %v12494_v20  ;;  %v4380_v42 = vpop.f32.mrb[123].mxu0 }
 0x3f5   : > { %v4381_v12 = vadd.f32 %v4380_v42, %v12486_v38  ;;  %v10724_v42 = vld [vmem:[%s13518_s3 + $0x150] sm:$0xff]  }
 0x3f9   : > { %v9489_v41 = vpop.f32.mrb[124].mxu0 }
 0x3fa   : > { %v4402_v56 = vadd.f32 %v9489_v41, %v12507_v1  ;;  %v4393_v58 = vpop.f32.mrb[125].mxu0  ;;  %v10726_v41 = vld [vmem:[%s13518_s3 + $0x160] sm:$0xff]  }
 0x3fb   : > { %v4394_v6 = vadd.f32 %v4393_v58, %v12499_v13  ;;  %v9490_v27 = vpop.f32.mrb[126].mxu0  ;;  %v10728_v58 = vld [vmem:[%s13518_s3 + $0x170] sm:$0xff]  }
 0x3fc   : > { %v4414_v55 = vmax.f32 %v4386_v51, %v4402_v56  ;;  %v4405_v2 = vadd.f32 %v9490_v27, %v12510_v26  ;;  %v4396_v29 = vpop.f32.mrb[127].mxu0  ;;  %v10720_v51 = vld [vmem:[%s13518_s3 + $0x130] sm:$0xff]   ;;  %v10727_v56 = vld [vmem:[%s13518_s3 + $0x168] sm:$0xff]   ;;  %v10730_v27 = vld [vmem:[%s13518_s3 + $0x180] sm:$0xff]  }
 0x3fd   : > { %v4412_v15 = vmax.f32 %v4378_v0, %v4394_v6  ;;  %v4397_v20 = vadd.f32 %v4396_v29, %v12502_v54  ;;  %v10691_v54 = vld [vmem:[%s13518_s3 + $0x48] sm:$0xff]   ;;  %v10722_v0 = vld [vmem:[%s13518_s3 + $0x140] sm:$0xff]   ;;  %v10729_v6 = vld [vmem:[%s13518_s3 + $0x178] sm:$0xff]  }
 0x3fe   : > { %v4418_v19 = vmax.f32 %v4410_v62, %v4414_v55  ;;  %v4415_v38 = vmax.f32 %v4389_v8, %v4405_v2  ;;  %v10713_v62 = vld [vmem:[%s13518_s3 + $0xf8] sm:$0xff]   ;;  %v10723_v8 = vld [vmem:[%s13518_s3 + $0x148] sm:$0xff]   ;;  %v10732_v29 = vld [vmem:[%s13518_s3 + $0x190] sm:$0xff]  }
 0x3ff   : > { %v4416_v17 = vmax.f32 %v4408_v47, %v4412_v15  ;;  %v4413_v37 = vmax.f32 %v4381_v12, %v4397_v20  ;;  %v10715_v47 = vld [vmem:[%s13518_s3 + $0x108] sm:$0xff]   ;;  %v10725_v12 = vld [vmem:[%s13518_s3 + $0x158] sm:$0xff]   ;;  %v10734_v15 = vld [vmem:[%s13518_s3 + $0x1a0] sm:$0xff]  }
 0x400   : > { %v12531_v1 = vadd.f32 %v7828_v24, %v4418_v19  ;;  %v4419_v53 = vmax.f32 %v4411_v50, %v4415_v38  ;;  %v10717_v50 = vld [vmem:[%s13518_s3 + $0x118] sm:$0xff]   ;;  %v10731_v2 = vld [vmem:[%s13518_s3 + $0x188] sm:$0xff]   ;;  %v10736_v19 = vld [vmem:[%s13518_s3 + $0x1b0] sm:$0xff]  }
 0x401   : > { %v4427_v13 = vadd.f32 %v7828_v24, %v4416_v17  ;;  %v4417_v22 = vmax.f32 %v4409_v9, %v4413_v37  ;;  %v10718_v9 = vld [vmem:[%s13518_s3 + $0x120] sm:$0xff]   ;;  %v10735_v20 = vld [vmem:[%s13518_s3 + $0x1a8] sm:$0xff]   ;;  %v10737_v38 = vld [vmem:[%s13518_s3 + $0x1b8] sm:$0xff]  }
 0x402   : > { %v12533_v49 = vadd.f32 %v7828_v24, %v4419_v53  ;;  %v10738_v17 = vld [vmem:[%s13518_s3 + $0x1c0] sm:$0xff]   ;;  %v10739_v53 = vld [vmem:[%s13518_s3 + $0x1c8] sm:$0xff]  }
 0x403   : > { %v4431_v26 = vmax.f32 %v4427_v13, 0.0  ;;  %v12535_v10 = vadd.f32 %v7828_v24, %v4417_v22  ;;  %v10733_v24 = vld [vmem:[%s13518_s3 + $0x198] sm:$0xff]   ;;  %v10740_v13 = vld [vmem:[%s13518_s3 + $0x1d0] sm:$0xff]  }
 0x404   : > { %v10741_v22 = vld [vmem:[%s13518_s3 + $0x1d8] sm:$0xff]  }
 0x405   : > { %v12540_v14 = vpack.c.bf16 %v4431_v26, %v4431_v26  ;;  %v10742_v26 = vld [vmem:[%s13518_s3 + $0x1e0] sm:$0xff]  }
 0x407   : > { %9508 = vmatmul.mubr.bf16.vlgmr.msra.gmra.mrb[16].mxu1 %v12540_v14  ;;  %v12577_v59 = vshrl.u32 %v12540_v14, 16  ;;  %v4670_v5 = vrot.slane %v12540_v14, 1  ;;  %v4886_v39 = vrot.slane %v12540_v14, 2  ;;  %v5102_v37 = vrot.slane %v12540_v14, 3  ;;  %v10744_v14 = vld [vmem:[%s13518_s3 + $0x1f0] sm:$0xff]  }
 0x408   : > { %9512 = vmatpush3.bf16.msra.mxu1 %v10690_v16  ;;  %9527 = vmatprep.mubr.msk.bf16.mxu1 %vm10963_vm0, %v10962_v28  ;;  %v10743_v16 = vld [vmem:[%s13518_s3 + $0x1e8] sm:$0xff]  }
 0x409   : > { %9513 = vmatprep.subr.bf16.mxu1 %v10962_v28  ;;  %v4778_v36 = vrot.slane %v12577_v59, 1  ;;  %v4994_v55 = vrot.slane %v12577_v59, 2 }
 0x40c   : > { %9514 = vmatpush3.bf16.msra.mxu1 %v10691_v54  ;;  %v10745_v54 = vld [vmem:[%s13518_s3 + $0x1f8] sm:$0xff]  }
 0x40d   : > { %9515 = vmatprep.subr.bf16.mxu1 %v10962_v28 }
 0x410   : > { %9516 = vmatpush3.bf16.msra.mxu1 %v10692_v3  ;;  %v10746_v3 = vld [vmem:[%s13518_s3 + $0x200] sm:$0xff]  }
 0x411   : > { %9517 = vmatprep.subr.bf16.mxu1 %v10962_v28 }
 0x414   : > { %9518 = vmatpush3.bf16.msra.mxu1 %v10693_v31  ;;  %v5210_v31 = vrot.slane %v12577_v59, 3 }
 0x415   : > { %9519 = vmatprep.subr.bf16.mxu1 %v10962_v28 }
 0x418   : > { %9520 = vmatpush3.bf16.msra.mxu1 %v10694_v21  ;;  %v10747_v21 = vld [vmem:[%s13518_s3 + $0x208] sm:$0xff]  }
 0x419   : > { %9521 = vmatprep.subr.bf16.mxu1 %v10962_v28 }
 0x41c   : > { %9522 = vmatpush3.bf16.msra.mxu1 %v10695_v60  ;;  %v10748_v60 = vld [vmem:[%s13518_s3 + $0x210] sm:$0xff]  }
 0x41d   : > { %9523 = vmatprep.subr.bf16.mxu1 %v10962_v28 }
 0x420   : > { %9524 = vmatpush3.bf16.msra.mxu1 %v10696_v48  ;;  %v10749_v48 = vld [vmem:[%s13518_s3 + $0x218] sm:$0xff]  }
 0x421   : > { %9525 = vmatprep.subr.bf16.mxu1 %v10962_v28 }
 0x424   : > { %9526 = vmatpush3.bf16.msra.mxu1 %v10697_v11  ;;  %v10750_v11 = vld [vmem:[%s13518_s3 + $0x220] sm:$0xff]  }
 0x425   : > { %9531 = vmatprep.subr.bf16.mxu1 %v10962_v28 }
 0x427   : > { %9528 = vmatmul.mubr.bf16.vlgmr.msra.gmra.mrb[16].mxu1 %v12577_v59  ;;  %v10752_v59 = vld [vmem:[%s13518_s3 + $0x230] sm:$0xff]  }
 0x428   : > { %9532 = vmatpush3.bf16.msra.mxu1 %v10698_v32  ;;  %9547 = vmatprep.mubr.msk.bf16.mxu1 %vm10963_vm0, %v10962_v28  ;;  %v10751_v32 = vld [vmem:[%s13518_s3 + $0x228] sm:$0xff]  }
 0x429   : > { %9533 = vmatprep.subr.bf16.mxu1 %v10962_v28 }
 0x42c   : > { %9534 = vmatpush3.bf16.msra.mxu1 %v10699_v18  ;;  %v10753_v18 = vld [vmem:[%s13518_s3 + $0x238] sm:$0xff]  }
 0x42d   : > { %9535 = vmatprep.subr.bf16.mxu1 %v10962_v28 }
 0x430   : > { %9536 = vmatpush3.bf16.msra.mxu1 %v10700_v52  ;;  %v4432_v52 = vmax.f32 %v12535_v10, 0.0  ;;  %v10756_v10 = vld [vmem:[%s13518_s3 + $0x250] sm:$0xff]  }
 0x431   : > { %9537 = vmatprep.subr.bf16.mxu1 %v10962_v28 }
 0x434   : > { %9538 = vmatpush3.bf16.msra.mxu1 %v10701_v30  ;;  %v10754_v30 = vld [vmem:[%s13518_s3 + $0x240] sm:$0xff]  }
 0x435   : > { %9539 = vmatprep.subr.bf16.mxu1 %v10962_v28 }
 0x438   : > { %9540 = vmatpush3.bf16.msra.mxu1 %v10702_v7  ;;  %v12825_v7 = vpack.c.bf16 %v4432_v52, %v4432_v52  ;;  %v10807_v52 = vld [vmem:[%s13518_s3 + $0x3e8] sm:$0xff]  }
 0x439   : > { %9541 = vmatprep.subr.bf16.mxu1 %v10962_v28 }
 0x43c   : > { %9542 = vmatpush3.bf16.msra.mxu1 %v10703_v33  ;;  %v10755_v33 = vld [vmem:[%s13518_s3 + $0x248] sm:$0xff]  }
 0x43d   : > { %9543 = vmatprep.subr.bf16.mxu1 %v10962_v28 }
 0x440   : > { %9544 = vmatpush3.bf16.msra.mxu1 %v10704_v45  ;;  %v10757_v45 = vld [vmem:[%s13518_s3 + $0x258] sm:$0xff]  }
 0x441   : > { %9545 = vmatprep.subr.bf16.mxu1 %v10962_v28 }
 0x444   : > { %9546 = vmatpush3.bf16.msra.mxu1 %v10705_v34  ;;  %v10758_v34 = vld [vmem:[%s13518_s3 + $0x260] sm:$0xff]  }
 0x445   : > { %9551 = vmatprep.subr.bf16.mxu1 %v10962_v28 }
 0x447   : > { %9548 = vmatmul.mubr.bf16.vlgmr.msra.gmra.mrb[16].mxu1 %v4670_v5  ;;  %v10760_v5 = vld [vmem:[%s13518_s3 + $0x270] sm:$0xff]  }
 0x448   : > { %9552 = vmatpush3.bf16.msra.mxu1 %v10706_v25  ;;  %9567 = vmatprep.mubr.msk.bf16.mxu1 %vm10963_vm0, %v10962_v28  ;;  %v10759_v25 = vld [vmem:[%s13518_s3 + $0x268] sm:$0xff]  }
 0x449   : > { %9553 = vmatprep.subr.bf16.mxu1 %v10962_v28 }
 0x44c   : > { %9554 = vmatpush3.bf16.msra.mxu1 %v10707_v61  ;;  %v10761_v61 = vld [vmem:[%s13518_s3 + $0x278] sm:$0xff]  }
 0x44d   : > { %9555 = vmatprep.subr.bf16.mxu1 %v10962_v28 }
 0x450   : > { %9556 = vmatpush3.bf16.msra.mxu1 %v10708_v44  ;;  %v10762_v44 = vld [vmem:[%s13518_s3 + $0x280] sm:$0xff]  }
 0x451   : > { %9557 = vmatprep.subr.bf16.mxu1 %v10962_v28 }
 0x454   : > { %9558 = vmatpush3.bf16.msra.mxu1 %v10709_v46  ;;  %v12863_v46 = vshrl.u32 %v12825_v7, 16 }
 0x455   : > { %9559 = vmatprep.subr.bf16.mxu1 %v10962_v28 }
 0x458   : > { %9560 = vmatpush3.bf16.msra.mxu1 %v10710_v43  ;;  %v10763_v43 = vld [vmem:[%s13518_s3 + $0x288] sm:$0xff]  }
 0x459   : > { %9561 = vmatprep.subr.bf16.mxu1 %v10962_v28 }
 0x45c   : > { %9562 = vmatpush3.bf16.msra.mxu1 %v10711_v35  ;;  %v10764_v35 = vld [vmem:[%s13518_s3 + $0x290] sm:$0xff]  }
 0x45d   : > { %9563 = vmatprep.subr.bf16.mxu1 %v10962_v28 }
 0x460   : > { %9564 = vmatpush3.bf16.msra.mxu1 %v10712_v63  ;;  %v10765_v63 = vld [vmem:[%s13518_s3 + $0x298] sm:$0xff]  }
 0x461   : > { %9565 = vmatprep.subr.bf16.mxu1 %v10962_v28 }
 0x464   : > { %9566 = vmatpush3.bf16.msra.mxu1 %v10713_v62  ;;  %v10766_v62 = vld [vmem:[%s13518_s3 + $0x2a0] sm:$0xff]  }
 0x465   : > { %9571 = vmatprep.subr.bf16.mxu1 %v10962_v28 }
 0x467   : > { %9568 = vmatmul.mubr.bf16.vlgmr.msra.gmra.mrb[16].mxu1 %v4778_v36  ;;  %v10768_v36 = vld [vmem:[%s13518_s3 + $0x2b0] sm:$0xff]  }
 0x468   : > { %9572 = vmatpush3.bf16.msra.mxu1 %v10714_v40  ;;  %9587 = vmatprep.mubr.msk.bf16.mxu1 %vm10963_vm0, %v10962_v28  ;;  %v10767_v40 = vld [vmem:[%s13518_s3 + $0x2a8] sm:$0xff]  }
 0x469   : > { %9573 = vmatprep.subr.bf16.mxu1 %v10962_v28 }
 0x46c   : > { %9574 = vmatpush3.bf16.msra.mxu1 %v10715_v47  ;;  %v10769_v47 = vld [vmem:[%s13518_s3 + $0x2b8] sm:$0xff]  }
 0x46d   : > { %9575 = vmatprep.subr.bf16.mxu1 %v10962_v28 }
 0x470   : > { %9576 = vmatpush3.bf16.msra.mxu1 %v10716_v23  ;;  %v10770_v23 = vld [vmem:[%s13518_s3 + $0x2c0] sm:$0xff]  }
 0x471   : > { %9577 = vmatprep.subr.bf16.mxu1 %v10962_v28 }
 0x474   : > { %9578 = vmatpush3.bf16.msra.mxu1 %v10717_v50  ;;  %v5536_v50 = vrot.slane %v12825_v7, 1 }
 0x475   : > { %9579 = vmatprep.subr.bf16.mxu1 %v10962_v28 }
 0x478   : > { %9580 = vmatpush3.bf16.msra.mxu1 %v10718_v9  ;;  %v10771_v9 = vld [vmem:[%s13518_s3 + $0x2c8] sm:$0xff]  }
 0x479   : > { %9581 = vmatprep.subr.bf16.mxu1 %v10962_v28 }
 0x47c   : > { %9582 = vmatpush3.bf16.msra.mxu1 %v10719_v4  ;;  %v10772_v4 = vld [vmem:[%s13518_s3 + $0x2d0] sm:$0xff]  }
 0x47d   : > { %9583 = vmatprep.subr.bf16.mxu1 %v10962_v28 }
 0x480   : > { %9584 = vmatpush3.bf16.msra.mxu1 %v10720_v51  ;;  %v10773_v51 = vld [vmem:[%s13518_s3 + $0x2d8] sm:$0xff]  }
 0x481   : > { %9585 = vmatprep.subr.bf16.mxu1 %v10962_v28 }
 0x484   : > { %9586 = vmatpush3.bf16.msra.mxu1 %v10721_v57  ;;  %v10774_v57 = vld [vmem:[%s13518_s3 + $0x2e0] sm:$0xff]  }
 0x485   : > { %9591 = vmatprep.subr.bf16.mxu1 %v10962_v28 }
 0x487   : > { %9588 = vmatmul.mubr.bf16.vlgmr.msra.gmra.mrb[16].mxu1 %v4886_v39  ;;  %v10776_v39 = vld [vmem:[%s13518_s3 + $0x2f0] sm:$0xff]  }
 0x488   : > { %9592 = vmatpush3.bf16.msra.mxu1 %v10722_v0  ;;  %9607 = vmatprep.mubr.msk.bf16.mxu1 %vm10963_vm0, %v10962_v28  ;;  %v10775_v0 = vld [vmem:[%s13518_s3 + $0x2e8] sm:$0xff]  }
 0x489   : > { %9593 = vmatprep.subr.bf16.mxu1 %v10962_v28 }
 0x48c   : > { %9594 = vmatpush3.bf16.msra.mxu1 %v10723_v8  ;;  %v10777_v8 = vld [vmem:[%s13518_s3 + $0x2f8] sm:$0xff]  }
 0x48d   : > { %9595 = vmatprep.subr.bf16.mxu1 %v10962_v28 }
 0x490   : > { %9596 = vmatpush3.bf16.msra.mxu1 %v10724_v42  ;;  %v10778_v42 = vld [vmem:[%s13518_s3 + $0x300] sm:$0xff]  }
 0x491   : > { %9597 = vmatprep.subr.bf16.mxu1 %v10962_v28 }
 0x494   : > { %9598 = vmatpush3.bf16.msra.mxu1 %v10725_v12  ;;  %v5644_v12 = vrot.slane %v12863_v46, 1 }
 0x495   : > { %9599 = vmatprep.subr.bf16.mxu1 %v10962_v28 }
 0x498   : > { %9600 = vmatpush3.bf16.msra.mxu1 %v10726_v41  ;;  %v10779_v41 = vld [vmem:[%s13518_s3 + $0x308] sm:$0xff]  }
 0x499   : > { %9601 = vmatprep.subr.bf16.mxu1 %v10962_v28 }
 0x49c   : > { %9602 = vmatpush3.bf16.msra.mxu1 %v10727_v56  ;;  %v10780_v56 = vld [vmem:[%s13518_s3 + $0x310] sm:$0xff]  }
 0x49d   : > { %9603 = vmatprep.subr.bf16.mxu1 %v10962_v28 }
 0x4a0   : > { %9604 = vmatpush3.bf16.msra.mxu1 %v10728_v58  ;;  %v10781_v58 = vld [vmem:[%s13518_s3 + $0x318] sm:$0xff]  }
 0x4a1   : > { %9605 = vmatprep.subr.bf16.mxu1 %v10962_v28 }
 0x4a4   : > { %9606 = vmatpush3.bf16.msra.mxu1 %v10729_v6  ;;  %v10782_v6 = vld [vmem:[%s13518_s3 + $0x320] sm:$0xff]  }
 0x4a5   : > { %9611 = vmatprep.subr.bf16.mxu1 %v10962_v28 }
 0x4a7   : > { %9608 = vmatmul.mubr.bf16.vlgmr.msra.gmra.mrb[16].mxu1 %v4994_v55  ;;  %v10784_v55 = vld [vmem:[%s13518_s3 + $0x330] sm:$0xff]  }
 0x4a8   : > { %9612 = vmatpush3.bf16.msra.mxu1 %v10730_v27  ;;  %9627 = vmatprep.mubr.msk.bf16.mxu1 %vm10963_vm0, %v10962_v28  ;;  %v10783_v27 = vld [vmem:[%s13518_s3 + $0x328] sm:$0xff]  }
 0x4a9   : > { %9613 = vmatprep.subr.bf16.mxu1 %v10962_v28 }
 0x4ac   : > { %9614 = vmatpush3.bf16.msra.mxu1 %v10731_v2  ;;  %v10785_v2 = vld [vmem:[%s13518_s3 + $0x338] sm:$0xff]  }
 0x4ad   : > { %9615 = vmatprep.subr.bf16.mxu1 %v10962_v28 }
 0x4b0   : > { %9616 = vmatpush3.bf16.msra.mxu1 %v10732_v29  ;;  %v10786_v29 = vld [vmem:[%s13518_s3 + $0x340] sm:$0xff]  }
 0x4b1   : > { %9617 = vmatprep.subr.bf16.mxu1 %v10962_v28 }
 0x4b4   : > { %9618 = vmatpush3.bf16.msra.mxu1 %v10733_v24  ;;  %v5752_v24 = vrot.slane %v12825_v7, 2 }
 0x4b5   : > { %9619 = vmatprep.subr.bf16.mxu1 %v10962_v28 }
 0x4b8   : > { %9620 = vmatpush3.bf16.msra.mxu1 %v10734_v15  ;;  %v10787_v15 = vld [vmem:[%s13518_s3 + $0x348] sm:$0xff]  }
 0x4b9   : > { %9621 = vmatprep.subr.bf16.mxu1 %v10962_v28 }
 0x4bc   : > { %9622 = vmatpush3.bf16.msra.mxu1 %v10735_v20  ;;  %v10788_v20 = vld [vmem:[%s13518_s3 + $0x350] sm:$0xff]  }
 0x4bd   : > { %9623 = vmatprep.subr.bf16.mxu1 %v10962_v28 }
 0x4c0   : > { %9624 = vmatpush3.bf16.msra.mxu1 %v10736_v19  ;;  %v10789_v19 = vld [vmem:[%s13518_s3 + $0x358] sm:$0xff]  }
 0x4c1   : > { %9625 = vmatprep.subr.bf16.mxu1 %v10962_v28 }
 0x4c4   : > { %9626 = vmatpush3.bf16.msra.mxu1 %v10737_v38  ;;  %v10790_v38 = vld [vmem:[%s13518_s3 + $0x360] sm:$0xff]  }
 0x4c5   : > { %9631 = vmatprep.subr.bf16.mxu1 %v10962_v28 }
 0x4c7   : > { %9628 = vmatmul.mubr.bf16.vlgmr.msra.gmra.mrb[16].mxu1 %v5102_v37  ;;  %v10792_v37 = vld [vmem:[%s13518_s3 + $0x370] sm:$0xff]  }
 0x4c8   : > { %9632 = vmatpush3.bf16.msra.mxu1 %v10738_v17  ;;  %9647 = vmatprep.mubr.msk.bf16.mxu1 %vm10963_vm0, %v10962_v28  ;;  %v10791_v17 = vld [vmem:[%s13518_s3 + $0x368] sm:$0xff]  }
 0x4c9   : > { %9633 = vmatprep.subr.bf16.mxu1 %v10962_v28 }
 0x4cc   : > { %9634 = vmatpush3.bf16.msra.mxu1 %v10739_v53  ;;  %v10793_v53 = vld [vmem:[%s13518_s3 + $0x378] sm:$0xff]  }
 0x4cd   : > { %9635 = vmatprep.subr.bf16.mxu1 %v10962_v28 }
 0x4d0   : > { %9636 = vmatpush3.bf16.msra.mxu1 %v10740_v13  ;;  %v10794_v13 = vld [vmem:[%s13518_s3 + $0x380] sm:$0xff]  }
 0x4d1   : > { %9637 = vmatprep.subr.bf16.mxu1 %v10962_v28 }
 0x4d4   : > { %9638 = vmatpush3.bf16.msra.mxu1 %v10741_v22  ;;  %v5860_v22 = vrot.slane %v12863_v46, 2 }
 0x4d5   : > { %9639 = vmatprep.subr.bf16.mxu1 %v10962_v28 }
 0x4d8   : > { %9640 = vmatpush3.bf16.msra.mxu1 %v10742_v26  ;;  %v10795_v26 = vld [vmem:[%s13518_s3 + $0x388] sm:$0xff]  }
 0x4d9   : > { %9641 = vmatprep.subr.bf16.mxu1 %v10962_v28 }
 0x4dc   : > { %9642 = vmatpush3.bf16.msra.mxu1 %v10743_v16  ;;  %v10796_v16 = vld [vmem:[%s13518_s3 + $0x390] sm:$0xff]  }
 0x4dd   : > { %9643 = vmatprep.subr.bf16.mxu1 %v10962_v28 }
 0x4e0   : > { %9644 = vmatpush3.bf16.msra.mxu1 %v10744_v14  ;;  %v10797_v14 = vld [vmem:[%s13518_s3 + $0x398] sm:$0xff]  }
 0x4e1   : > { %9645 = vmatprep.subr.bf16.mxu1 %v10962_v28 }
 0x4e4   : > { %9646 = vmatpush3.bf16.msra.mxu1 %v10745_v54  ;;  %v10798_v54 = vld [vmem:[%s13518_s3 + $0x3a0] sm:$0xff]  }
 0x4e5   : > { %9651 = vmatprep.subr.bf16.mxu1 %v10962_v28 }
 0x4e7   : > { %9648 = vmatmul.mubr.bf16.vlgmr.msra.gmra.mrb[16].mxu1 %v5210_v31  ;;  %v10800_v31 = vld [vmem:[%s13518_s3 + $0x3b0] sm:$0xff]  }
 0x4e8   : > { %9652 = vmatpush3.bf16.msra.mxu1 %v10746_v3  ;;  %9667 = vmatprep.mubr.msk.bf16.mxu1 %vm10963_vm0, %v10962_v28  ;;  %v10799_v3 = vld [vmem:[%s13518_s3 + $0x3a8] sm:$0xff]  }
 0x4e9   : > { %9653 = vmatprep.subr.bf16.mxu1 %v10962_v28 }
 0x4ec   : > { %9654 = vmatpush3.bf16.msra.mxu1 %v10747_v21  ;;  %v10801_v21 = vld [vmem:[%s13518_s3 + $0x3b8] sm:$0xff]  }
 0x4ed   : > { %9655 = vmatprep.subr.bf16.mxu1 %v10962_v28 }
 0x4f0   : > { %9656 = vmatpush3.bf16.msra.mxu1 %v10748_v60  ;;  %v10802_v60 = vld [vmem:[%s13518_s3 + $0x3c0] sm:$0xff]  }
 0x4f1   : > { %9657 = vmatprep.subr.bf16.mxu1 %v10962_v28 }
 0x4f4   : > { %9658 = vmatpush3.bf16.msra.mxu1 %v10749_v48  ;;  %v5968_v48 = vrot.slane %v12825_v7, 3 }
 0x4f5   : > { %9659 = vmatprep.subr.bf16.mxu1 %v10962_v28 }
 0x4f8   : > { %9660 = vmatpush3.bf16.msra.mxu1 %v10750_v11  ;;  %v10803_v11 = vld [vmem:[%s13518_s3 + $0x3c8] sm:$0xff]  }
 0x4f9   : > { %9661 = vmatprep.subr.bf16.mxu1 %v10962_v28 }
 0x4fc   : > { %9662 = vmatpush3.bf16.msra.mxu1 %v10751_v32  ;;  %v10804_v32 = vld [vmem:[%s13518_s3 + $0x3d0] sm:$0xff]  }
 0x4fd   : > { %9663 = vmatprep.subr.bf16.mxu1 %v10962_v28 }
 0x500   : > { %9664 = vmatpush3.bf16.msra.mxu1 %v10752_v59  ;;  %v10805_v59 = vld [vmem:[%s13518_s3 + $0x3d8] sm:$0xff]  }
 0x501   : > { %9665 = vmatprep.subr.bf16.mxu1 %v10962_v28 }
 0x504   : > { %9666 = vmatpush3.bf16.msra.mxu1 %v10753_v18  ;;  %v10806_v18 = vld [vmem:[%s13518_s3 + $0x3e0] sm:$0xff]  }
 0x505   : > { %9671 = vmatprep.subr.bf16.mxu1 %v10962_v28 }
 0x507   : > { %9668 = vmatmul.mubr.bf16.vlgmr.msra.gmra.mrb[16].mxu1 %v12825_v7  ;;  %v10809_v7 = vld [vmem:[%s13518_s3 + $0x3f8] sm:$0xff]  }
 0x508   : > { %9672 = vmatpush3.bf16.msra.mxu1 %v10754_v30  ;;  %9687 = vmatprep.mubr.msk.bf16.mxu1 %vm10963_vm0, %v10962_v28  ;;  %v10808_v30 = vld [vmem:[%s13518_s3 + $0x3f0] sm:$0xff]  }
 0x509   : > { %9673 = vmatprep.subr.bf16.mxu1 %v10962_v28 }
 0x50c   : > { %9674 = vmatpush3.bf16.msra.mxu1 %v10755_v33  ;;  %v10810_v33 = vld [vmem:[%s13518_s3 + $0x400] sm:$0xff]  }
 0x50d   : > { %9675 = vmatprep.subr.bf16.mxu1 %v10962_v28 }
 0x510   : > { %9676 = vmatpush3.bf16.msra.mxu1 %v10756_v10  ;;  %v6076_v10 = vrot.slane %v12863_v46, 3 }
 0x511   : > { %9677 = vmatprep.subr.bf16.mxu1 %v10962_v28 }
 0x514   : > { %9678 = vmatpush3.bf16.msra.mxu1 %v10757_v45  ;;  %v10811_v45 = vld [vmem:[%s13518_s3 + $0x408] sm:$0xff]  }
 0x515   : > { %9679 = vmatprep.subr.bf16.mxu1 %v10962_v28 }
 0x518   : > { %9680 = vmatpush3.bf16.msra.mxu1 %v10758_v34  ;;  %v10812_v34 = vld [vmem:[%s13518_s3 + $0x410] sm:$0xff]  }
 0x519   : > { %9681 = vmatprep.subr.bf16.mxu1 %v10962_v28 }
 0x51c   : > { %9682 = vmatpush3.bf16.msra.mxu1 %v10759_v25  ;;  %v10813_v25 = vld [vmem:[%s13518_s3 + $0x418] sm:$0xff]  }
 0x51d   : > { %9683 = vmatprep.subr.bf16.mxu1 %v10962_v28 }
 0x520   : > { %9684 = vmatpush3.bf16.msra.mxu1 %v10760_v5  ;;  %v10814_v5 = vld [vmem:[%s13518_s3 + $0x420] sm:$0xff]  }
 0x521   : > { %9685 = vmatprep.subr.bf16.mxu1 %v10962_v28 }
 0x524   : > { %9686 = vmatpush3.bf16.msra.mxu1 %v10761_v61  ;;  %v10815_v61 = vld [vmem:[%s13518_s3 + $0x428] sm:$0xff]  }
 0x525   : > { %9691 = vmatprep.subr.bf16.mxu1 %v10962_v28 }
 0x527   : > { %9688 = vmatmul.mubr.bf16.vlgmr.msra.gmra.mrb[16].mxu1 %v12863_v46  ;;  %v10817_v46 = vld [vmem:[%s13518_s3 + $0x438] sm:$0xff]  }
 0x528   : > { %9692 = vmatpush3.bf16.msra.mxu1 %v10762_v44  ;;  %9707 = vmatprep.mubr.msk.bf16.mxu1 %vm10963_vm0, %v10962_v28  ;;  %v10816_v44 = vld [vmem:[%s13518_s3 + $0x430] sm:$0xff]  }
 0x529   : > { %9693 = vmatprep.subr.bf16.mxu1 %v10962_v28 }
 0x52c   : > { %9694 = vmatpush3.bf16.msra.mxu1 %v10763_v43  ;;  %v4433_v43 = vmax.f32 %v12531_v1, 0.0  ;;  %v10820_v1 = vld [vmem:[%s13518_s3 + $0x450] sm:$0xff]  }
 0x52d   : > { %9695 = vmatprep.subr.bf16.mxu1 %v10962_v28 }
 0x530   : > { %9696 = vmatpush3.bf16.msra.mxu1 %v10764_v35  ;;  %v10818_v35 = vld [vmem:[%s13518_s3 + $0x440] sm:$0xff]  }
 0x531   : > { %9697 = vmatprep.subr.bf16.mxu1 %v10962_v28 }
 0x534   : > { %9698 = vmatpush3.bf16.msra.mxu1 %v10765_v63  ;;  %v13111_v63 = vpack.c.bf16 %v4433_v43, %v4433_v43 }
 0x535   : > { %9699 = vmatprep.subr.bf16.mxu1 %v10962_v28 }
 0x536   : > { %v6834_v43 = vrot.slane %v13111_v63, 3 }
 0x538   : > { %9700 = vmatpush3.bf16.msra.mxu1 %v10766_v62  ;;  %v10819_v62 = vld [vmem:[%s13518_s3 + $0x448] sm:$0xff]  }
 0x539   : > { %9701 = vmatprep.subr.bf16.mxu1 %v10962_v28 }
 0x53c   : > { %9702 = vmatpush3.bf16.msra.mxu1 %v10767_v40  ;;  %v10821_v40 = vld [vmem:[%s13518_s3 + $0x458] sm:$0xff]  }
 0x53d   : > { %9703 = vmatprep.subr.bf16.mxu1 %v10962_v28 }
 0x540   : > { %9704 = vmatpush3.bf16.msra.mxu1 %v10768_v36  ;;  %v10822_v36 = vld [vmem:[%s13518_s3 + $0x460] sm:$0xff]  }
 0x541   : > { %9705 = vmatprep.subr.bf16.mxu1 %v10962_v28 }
 0x544   : > { %9706 = vmatpush3.bf16.msra.mxu1 %v10769_v47  ;;  %v10823_v47 = vld [vmem:[%s13518_s3 + $0x468] sm:$0xff]  }
 0x545   : > { %9711 = vmatprep.subr.bf16.mxu1 %v10962_v28 }
 0x547   : > { %9708 = vmatmul.mubr.bf16.vlgmr.msra.gmra.mrb[16].mxu1 %v5536_v50  ;;  %v10825_v50 = vld [vmem:[%s13518_s3 + $0x478] sm:$0xff]  }
 0x548   : > { %9712 = vmatpush3.bf16.msra.mxu1 %v10770_v23  ;;  %9727 = vmatprep.mubr.msk.bf16.mxu1 %vm10963_vm0, %v10962_v28  ;;  %v10824_v23 = vld [vmem:[%s13518_s3 + $0x470] sm:$0xff]  }
 0x549   : > { %9713 = vmatprep.subr.bf16.mxu1 %v10962_v28 }
 0x54c   : > { %9714 = vmatpush3.bf16.msra.mxu1 %v10771_v9  ;;  %v10826_v9 = vld [vmem:[%s13518_s3 + $0x480] sm:$0xff]  }
 0x54d   : > { %9715 = vmatprep.subr.bf16.mxu1 %v10962_v28 }
 0x550   : > { %9716 = vmatpush3.bf16.msra.mxu1 %v10772_v4  ;;  %v13149_v4 = vshrl.u32 %v13111_v63, 16 }
 0x551   : > { %9717 = vmatprep.subr.bf16.mxu1 %v10962_v28 }
 0x554   : > { %9718 = vmatpush3.bf16.msra.mxu1 %v10773_v51  ;;  %v10827_v51 = vld [vmem:[%s13518_s3 + $0x488] sm:$0xff]  }
 0x555   : > { %9719 = vmatprep.subr.bf16.mxu1 %v10962_v28 }
 0x558   : > { %9720 = vmatpush3.bf16.msra.mxu1 %v10774_v57  ;;  %v10828_v57 = vld [vmem:[%s13518_s3 + $0x490] sm:$0xff]  }
 0x559   : > { %9721 = vmatprep.subr.bf16.mxu1 %v10962_v28 }
 0x55c   : > { %9722 = vmatpush3.bf16.msra.mxu1 %v10775_v0  ;;  %v10829_v0 = vld [vmem:[%s13518_s3 + $0x498] sm:$0xff]  }
 0x55d   : > { %9723 = vmatprep.subr.bf16.mxu1 %v10962_v28 }
 0x560   : > { %9724 = vmatpush3.bf16.msra.mxu1 %v10776_v39  ;;  %v10830_v39 = vld [vmem:[%s13518_s3 + $0x4a0] sm:$0xff]  }
 0x561   : > { %9725 = vmatprep.subr.bf16.mxu1 %v10962_v28 }
 0x564   : > { %9726 = vmatpush3.bf16.msra.mxu1 %v10777_v8  ;;  %v10831_v8 = vld [vmem:[%s13518_s3 + $0x4a8] sm:$0xff]  }
 0x565   : > { %9731 = vmatprep.subr.bf16.mxu1 %v10962_v28 }
 0x567   : > { %9728 = vmatmul.mubr.bf16.vlgmr.msra.gmra.mrb[16].mxu1 %v5644_v12  ;;  %v10833_v12 = vld [vmem:[%s13518_s3 + $0x4b8] sm:$0xff]  }
 0x568   : > { %9732 = vmatpush3.bf16.msra.mxu1 %v10778_v42  ;;  %9747 = vmatprep.mubr.msk.bf16.mxu1 %vm10963_vm0, %v10962_v28  ;;  %v10832_v42 = vld [vmem:[%s13518_s3 + $0x4b0] sm:$0xff]  }
 0x569   : > { %9733 = vmatprep.subr.bf16.mxu1 %v10962_v28 }
 0x56c   : > { %9734 = vmatpush3.bf16.msra.mxu1 %v10779_v41  ;;  %v10834_v41 = vld [vmem:[%s13518_s3 + $0x4c0] sm:$0xff]  }
 0x56d   : > { %9735 = vmatprep.subr.bf16.mxu1 %v10962_v28 }
 0x570   : > { %9736 = vmatpush3.bf16.msra.mxu1 %v10780_v56  ;;  %v6402_v56 = vrot.slane %v13111_v63, 1 }
 0x571   : > { %9737 = vmatprep.subr.bf16.mxu1 %v10962_v28 }
 0x574   : > { %9738 = vmatpush3.bf16.msra.mxu1 %v10781_v58  ;;  %v10835_v58 = vld [vmem:[%s13518_s3 + $0x4c8] sm:$0xff]  }
 0x575   : > { %9739 = vmatprep.subr.bf16.mxu1 %v10962_v28 }
 0x578   : > { %9740 = vmatpush3.bf16.msra.mxu1 %v10782_v6  ;;  %v10836_v6 = vld [vmem:[%s13518_s3 + $0x4d0] sm:$0xff]  }
 0x579   : > { %9741 = vmatprep.subr.bf16.mxu1 %v10962_v28 }
 0x57c   : > { %9742 = vmatpush3.bf16.msra.mxu1 %v10783_v27  ;;  %v10837_v27 = vld [vmem:[%s13518_s3 + $0x4d8] sm:$0xff]  }
 0x57d   : > { %9743 = vmatprep.subr.bf16.mxu1 %v10962_v28 }
 0x580   : > { %9744 = vmatpush3.bf16.msra.mxu1 %v10784_v55  ;;  %v10838_v55 = vld [vmem:[%s13518_s3 + $0x4e0] sm:$0xff]  }
 0x581   : > { %9745 = vmatprep.subr.bf16.mxu1 %v10962_v28 }
 0x584   : > { %9746 = vmatpush3.bf16.msra.mxu1 %v10785_v2  ;;  %v10839_v2 = vld [vmem:[%s13518_s3 + $0x4e8] sm:$0xff]  }
 0x585   : > { %9751 = vmatprep.subr.bf16.mxu1 %v10962_v28 }
 0x587   : > { %9748 = vmatmul.mubr.bf16.vlgmr.msra.gmra.mrb[16].mxu1 %v5752_v24  ;;  %v10841_v24 = vld [vmem:[%s13518_s3 + $0x4f8] sm:$0xff]  }
 0x588   : > { %9752 = vmatpush3.bf16.msra.mxu1 %v10786_v29  ;;  %9767 = vmatprep.mubr.msk.bf16.mxu1 %vm10963_vm0, %v10962_v28  ;;  %v10840_v29 = vld [vmem:[%s13518_s3 + $0x4f0] sm:$0xff]  }
 0x589   : > { %9753 = vmatprep.subr.bf16.mxu1 %v10962_v28 }
 0x58c   : > { %9754 = vmatpush3.bf16.msra.mxu1 %v10787_v15  ;;  %v10842_v15 = vld [vmem:[%s13518_s3 + $0x500] sm:$0xff]  }
 0x58d   : > { %9755 = vmatprep.subr.bf16.mxu1 %v10962_v28 }
 0x590   : > { %9756 = vmatpush3.bf16.msra.mxu1 %v10788_v20  ;;  %v6510_v20 = vrot.slane %v13149_v4, 1 }
 0x591   : > { %9757 = vmatprep.subr.bf16.mxu1 %v10962_v28 }
 0x594   : > { %9758 = vmatpush3.bf16.msra.mxu1 %v10789_v19  ;;  %v10843_v19 = vld [vmem:[%s13518_s3 + $0x508] sm:$0xff]  }
 0x595   : > { %9759 = vmatprep.subr.bf16.mxu1 %v10962_v28 }
 0x598   : > { %9760 = vmatpush3.bf16.msra.mxu1 %v10790_v38  ;;  %v10844_v38 = vld [vmem:[%s13518_s3 + $0x510] sm:$0xff]  }
 0x599   : > { %9761 = vmatprep.subr.bf16.mxu1 %v10962_v28 }
 0x59c   : > { %9762 = vmatpush3.bf16.msra.mxu1 %v10791_v17  ;;  %v10845_v17 = vld [vmem:[%s13518_s3 + $0x518] sm:$0xff]  }
 0x59d   : > { %9763 = vmatprep.subr.bf16.mxu1 %v10962_v28 }
 0x5a0   : > { %9764 = vmatpush3.bf16.msra.mxu1 %v10792_v37  ;;  %v10846_v37 = vld [vmem:[%s13518_s3 + $0x520] sm:$0xff]  }
 0x5a1   : > { %9765 = vmatprep.subr.bf16.mxu1 %v10962_v28 }
 0x5a4   : > { %9766 = vmatpush3.bf16.msra.mxu1 %v10793_v53  ;;  %v10847_v53 = vld [vmem:[%s13518_s3 + $0x528] sm:$0xff]  }
 0x5a5   : > { %9771 = vmatprep.subr.bf16.mxu1 %v10962_v28 }
 0x5a7   : > { %9768 = vmatmul.mubr.bf16.vlgmr.msra.gmra.mrb[16].mxu1 %v5860_v22  ;;  %v10849_v22 = vld [vmem:[%s13518_s3 + $0x538] sm:$0xff]  }
 0x5a8   : > { %9772 = vmatpush3.bf16.msra.mxu1 %v10794_v13  ;;  %9787 = vmatprep.mubr.msk.bf16.mxu1 %vm10963_vm0, %v10962_v28  ;;  %v10848_v13 = vld [vmem:[%s13518_s3 + $0x530] sm:$0xff]  }
 0x5a9   : > { %9773 = vmatprep.subr.bf16.mxu1 %v10962_v28 }
 0x5ac   : > { %9774 = vmatpush3.bf16.msra.mxu1 %v10795_v26  ;;  %v10850_v26 = vld [vmem:[%s13518_s3 + $0x540] sm:$0xff]  }
 0x5ad   : > { %9775 = vmatprep.subr.bf16.mxu1 %v10962_v28 }
 0x5b0   : > { %9776 = vmatpush3.bf16.msra.mxu1 %v10796_v16  ;;  %v6618_v16 = vrot.slane %v13111_v63, 2 }
 0x5b1   : > { %9777 = vmatprep.subr.bf16.mxu1 %v10962_v28 }
 0x5b4   : > { %9778 = vmatpush3.bf16.msra.mxu1 %v10797_v14  ;;  %v10882_v14 = vld [vmem:[%s13520_s5] sm:$0xff]  }
 0x5b5   : > { %9779 = vmatprep.subr.bf16.mxu1 %v10962_v28  ;;  %9992 = vmatpush3.bf16.msra.mxu0 %v10882_v14 }
 0x5b6   : > { %9993 = vmatprep.subr.bf16.mxu0 %v10962_v28 }
 0x5b8   : > { %9780 = vmatpush3.bf16.msra.mxu1 %v10798_v54  ;;  %v10851_v54 = vld [vmem:[%s13518_s3 + $0x548] sm:$0xff]  }
 0x5b9   : > { %9781 = vmatprep.subr.bf16.mxu1 %v10962_v28 }
 0x5bc   : > { %9782 = vmatpush3.bf16.msra.mxu1 %v10799_v3  ;;  %v10883_v3 = vld [vmem:[%s13520_s5 + $0x8] sm:$0xff]  }
 0x5bd   : > { %9783 = vmatprep.subr.bf16.mxu1 %v10962_v28  ;;  %9994 = vmatpush3.bf16.msra.mxu0 %v10883_v3 }
 0x5be   : > { %9995 = vmatprep.subr.bf16.mxu0 %v10962_v28 }
 0x5c0   : > { %9784 = vmatpush3.bf16.msra.mxu1 %v10800_v31  ;;  %v10852_v31 = vld [vmem:[%s13518_s3 + $0x550] sm:$0xff]  }
 0x5c1   : > { %9785 = vmatprep.subr.bf16.mxu1 %v10962_v28 }
 0x5c4   : > { %9786 = vmatpush3.bf16.msra.mxu1 %v10801_v21  ;;  %v10884_v21 = vld [vmem:[%s13520_s5 + $0x10] sm:$0xff]  }
 0x5c5   : > { %9791 = vmatprep.subr.bf16.mxu1 %v10962_v28  ;;  %9996 = vmatpush3.bf16.msra.mxu0 %v10884_v21 }
 0x5c6   : > { %9997 = vmatprep.subr.bf16.mxu0 %v10962_v28 }
 0x5c7   : > { %9788 = vmatmul.mubr.bf16.vlgmr.msra.gmra.mrb[16].mxu1 %v5968_v48  ;;  %v10885_v48 = vld [vmem:[%s13520_s5 + $0x18] sm:$0xff]  }
 0x5c8   : > { %9792 = vmatpush3.bf16.msra.mxu1 %v10802_v60  ;;  %9807 = vmatprep.mubr.msk.bf16.mxu1 %vm10963_vm0, %v10962_v28  ;;  %v10853_v60 = vld [vmem:[%s13518_s3 + $0x558] sm:$0xff]  }
 0x5c9   : > { %9793 = vmatprep.subr.bf16.mxu1 %v10962_v28  ;;  %9998 = vmatpush3.bf16.msra.mxu0 %v10885_v48 }
 0x5ca   : > { %9999 = vmatprep.subr.bf16.mxu0 %v10962_v28 }
 0x5cc   : > { %9794 = vmatpush3.bf16.msra.mxu1 %v10803_v11  ;;  %v10854_v11 = vld [vmem:[%s13518_s3 + $0x560] sm:$0xff]  }
 0x5cd   : > { %9795 = vmatprep.subr.bf16.mxu1 %v10962_v28 }
 0x5d0   : > { %9796 = vmatpush3.bf16.msra.mxu1 %v10804_v32  ;;  %v10886_v32 = vld [vmem:[%s13520_s5 + $0x20] sm:$0xff]  }
 0x5d1   : > { %9797 = vmatprep.subr.bf16.mxu1 %v10962_v28  ;;  %10000 = vmatpush3.bf16.msra.mxu0 %v10886_v32 }
 0x5d2   : > { %10001 = vmatprep.subr.bf16.mxu0 %v10962_v28 }
 0x5d4   : > { %9798 = vmatpush3.bf16.msra.mxu1 %v10805_v59  ;;  %v10855_v59 = vld [vmem:[%s13518_s3 + $0x568] sm:$0xff]  }
 0x5d5   : > { %9799 = vmatprep.subr.bf16.mxu1 %v10962_v28 }
 0x5d8   : > { %9800 = vmatpush3.bf16.msra.mxu1 %v10806_v18  ;;  %v10887_v18 = vld [vmem:[%s13520_s5 + $0x28] sm:$0xff]  }
 0x5d9   : > { %9801 = vmatprep.subr.bf16.mxu1 %v10962_v28  ;;  %10002 = vmatpush3.bf16.msra.mxu0 %v10887_v18 }
 0x5da   : > { %10003 = vmatprep.subr.bf16.mxu0 %v10962_v28 }
 0x5dc   : > { %9802 = vmatpush3.bf16.msra.mxu1 %v10807_v52  ;;  %v10856_v52 = vld [vmem:[%s13518_s3 + $0x570] sm:$0xff]  }
 0x5dd   : > { %9803 = vmatprep.subr.bf16.mxu1 %v10962_v28 }
 0x5e0   : > { %9804 = vmatpush3.bf16.msra.mxu1 %v10808_v30  ;;  %v10857_v30 = vld [vmem:[%s13518_s3 + $0x578] sm:$0xff]  }
 0x5e1   : > { %9805 = vmatprep.subr.bf16.mxu1 %v10962_v28 }
 0x5e4   : > { %9806 = vmatpush3.bf16.msra.mxu1 %v10809_v7  ;;  %v10858_v7 = vld [vmem:[%s13518_s3 + $0x580] sm:$0xff]  }
 0x5e5   : > { %9811 = vmatprep.subr.bf16.mxu1 %v10962_v28 }
 0x5e7   : > { %9808 = vmatmul.mubr.bf16.vlgmr.msra.gmra.mrb[16].mxu1 %v6076_v10  ;;  %v10859_v10 = vld [vmem:[%s13518_s3 + $0x588] sm:$0xff]  }
 0x5e8   : > { %9812 = vmatpush3.bf16.msra.mxu1 %v10810_v33  ;;  %9827 = vmatprep.mubr.msk.bf16.mxu1 %vm10963_vm0, %v10962_v28  ;;  %v6726_v33 = vrot.slane %v13149_v4, 2 }
 0x5e9   : > { %9813 = vmatprep.subr.bf16.mxu1 %v10962_v28 }
 0x5ec   : > { %9814 = vmatpush3.bf16.msra.mxu1 %v10811_v45  ;;  %v10860_v45 = vld [vmem:[%s13518_s3 + $0x590] sm:$0xff]  }
 0x5ed   : > { %9815 = vmatprep.subr.bf16.mxu1 %v10962_v28 }
 0x5f0   : > { %9816 = vmatpush3.bf16.msra.mxu1 %v10812_v34  ;;  %v10861_v34 = vld [vmem:[%s13518_s3 + $0x598] sm:$0xff]  }
 0x5f1   : > { %9817 = vmatprep.subr.bf16.mxu1 %v10962_v28 }
 0x5f4   : > { %9818 = vmatpush3.bf16.msra.mxu1 %v10813_v25  ;;  %v10862_v25 = vld [vmem:[%s13518_s3 + $0x5a0] sm:$0xff]  }
 0x5f5   : > { %9819 = vmatprep.subr.bf16.mxu1 %v10962_v28 }
 0x5f8   : > { %9820 = vmatpush3.bf16.msra.mxu1 %v10814_v5  ;;  %v10863_v5 = vld [vmem:[%s13518_s3 + $0x5a8] sm:$0xff]  }
 0x5f9   : > { %9821 = vmatprep.subr.bf16.mxu1 %v10962_v28 }
 0x5fc   : > { %9822 = vmatpush3.bf16.msra.mxu1 %v10815_v61  ;;  %v10864_v61 = vld [vmem:[%s13518_s3 + $0x5b0] sm:$0xff]  }
 0x5fd   : > { %9823 = vmatprep.subr.bf16.mxu1 %v10962_v28 }
 0x600   : > { %9824 = vmatpush3.bf16.msra.mxu1 %v10816_v44  ;;  %v10865_v44 = vld [vmem:[%s13518_s3 + $0x5b8] sm:$0xff]  }
 0x601   : > { %9825 = vmatprep.subr.bf16.mxu1 %v10962_v28 }
 0x604   : > { %9826 = vmatpush3.bf16.msra.mxu1 %v10817_v46  ;;  %v10866_v46 = vld [vmem:[%s13518_s3 + $0x5c0] sm:$0xff]  }
 0x605   : > { %9831 = vmatprep.subr.bf16.mxu1 %v10962_v28 }
 0x607   : > { %9828 = vmatmul.mubr.bf16.vlgmr.msra.gmra.mrb[16].mxu1 %v13111_v63  ;;  %v10869_v63 = vld [vmem:[%s13518_s3 + $0x5d8] sm:$0xff]  }
 0x608   : > { %9832 = vmatpush3.bf16.msra.mxu1 %v10818_v35  ;;  %9847 = vmatprep.mubr.msk.bf16.mxu1 %vm10963_vm0, %v10962_v28  ;;  %v10867_v35 = vld [vmem:[%s13518_s3 + $0x5c8] sm:$0xff]  }
 0x609   : > { %9833 = vmatprep.subr.bf16.mxu1 %v10962_v28 }
 0x60c   : > { %9834 = vmatpush3.bf16.msra.mxu1 %v10819_v62  ;;  %v10868_v62 = vld [vmem:[%s13518_s3 + $0x5d0] sm:$0xff]  }
 0x60d   : > { %9835 = vmatprep.subr.bf16.mxu1 %v10962_v28 }
 0x610   : > { %9836 = vmatpush3.bf16.msra.mxu1 %v10820_v1  ;;  %v10870_v1 = vld [vmem:[%s13518_s3 + $0x5e0] sm:$0xff]  }
 0x611   : > { %9837 = vmatprep.subr.bf16.mxu1 %v10962_v28 }
 0x614   : > { %9838 = vmatpush3.bf16.msra.mxu1 %v10821_v40  ;;  %v10871_v40 = vld [vmem:[%s13518_s3 + $0x5e8] sm:$0xff]  }
 0x615   : > { %9839 = vmatprep.subr.bf16.mxu1 %v10962_v28 }
 0x618   : > { %9840 = vmatpush3.bf16.msra.mxu1 %v10822_v36  ;;  %v10872_v36 = vld [vmem:[%s13518_s3 + $0x5f0] sm:$0xff]  }
 0x619   : > { %9841 = vmatprep.subr.bf16.mxu1 %v10962_v28 }
 0x61c   : > { %9842 = vmatpush3.bf16.msra.mxu1 %v10823_v47  ;;  %v10873_v47 = vld [vmem:[%s13518_s3 + $0x5f8] sm:$0xff]  }
 0x61d   : > { %9843 = vmatprep.subr.bf16.mxu1 %v10962_v28 }
 0x620   : > { %9844 = vmatpush3.bf16.msra.mxu1 %v10824_v23  ;;  %v10874_v23 = vld [vmem:[%s13518_s3 + $0x600] sm:$0xff]  }
 0x621   : > { %9845 = vmatprep.subr.bf16.mxu1 %v10962_v28 }
 0x624   : > { %9846 = vmatpush3.bf16.msra.mxu1 %v10825_v50  ;;  %v6942_v50 = vrot.slane %v13149_v4, 3 }
 0x625   : > { %9851 = vmatprep.subr.bf16.mxu1 %v10962_v28 }
 0x627   : > { %9848 = vmatmul.mubr.bf16.vlgmr.msra.gmra.mrb[16].mxu1 %v13149_v4  ;;  %v10877_v4 = vld [vmem:[%s13518_s3 + $0x618] sm:$0xff]  }
 0x628   : > { %9852 = vmatpush3.bf16.msra.mxu1 %v10826_v9  ;;  %9867 = vmatprep.mubr.msk.bf16.mxu1 %vm10963_vm0, %v10962_v28  ;;  %v10875_v9 = vld [vmem:[%s13518_s3 + $0x608] sm:$0xff]  }
 0x629   : > { %9853 = vmatprep.subr.bf16.mxu1 %v10962_v28 }
 0x62c   : > { %9854 = vmatpush3.bf16.msra.mxu1 %v10827_v51  ;;  %v10876_v51 = vld [vmem:[%s13518_s3 + $0x610] sm:$0xff]  }
 0x62d   : > { %9855 = vmatprep.subr.bf16.mxu1 %v10962_v28 }
 0x630   : > { %9856 = vmatpush3.bf16.msra.mxu1 %v10828_v57  ;;  %v10878_v57 = vld [vmem:[%s13518_s3 + $0x620] sm:$0xff]  }
 0x631   : > { %9857 = vmatprep.subr.bf16.mxu1 %v10962_v28 }
 0x634   : > { %9858 = vmatpush3.bf16.msra.mxu1 %v10829_v0  ;;  %v10879_v0 = vld [vmem:[%s13518_s3 + $0x628] sm:$0xff]  }
 0x635   : > { %9859 = vmatprep.subr.bf16.mxu1 %v10962_v28 }
 0x638   : > { %9860 = vmatpush3.bf16.msra.mxu1 %v10830_v39  ;;  %v10880_v39 = vld [vmem:[%s13518_s3 + $0x630] sm:$0xff]  }
 0x639   : > { %9861 = vmatprep.subr.bf16.mxu1 %v10962_v28 }
 0x63c   : > { %9862 = vmatpush3.bf16.msra.mxu1 %v10831_v8  ;;  %v10881_v8 = vld [vmem:[%s13518_s3 + $0x638] sm:$0xff]  }
 0x63d   : > { %9863 = vmatprep.subr.bf16.mxu1 %v10962_v28 }
 0x640   : > { %9864 = vmatpush3.bf16.msra.mxu1 %v10832_v42  ;;  %v4434_v42 = vmax.f32 %v12533_v49, 0.0  ;;  %v4435_v49 = vld [vmem:[%s13519_s4] sm:$0x1] }
 0x641   : > { %9865 = vmatprep.subr.bf16.mxu1 %v10962_v28 }
 0x644   : > { %9866 = vmatpush3.bf16.msra.mxu1 %v10833_v12  ;;  %v7033_v12 = vpack.c.bf16 %v4434_v42, %v4434_v42 }
 0x645   : > { %9871 = vmatprep.subr.bf16.mxu1 %v10962_v28 }
 0x647   : > { %9868 = vmatmul.mubr.bf16.vlgmr.msra.gmra.mrb[16].mxu1 %v6402_v56  ;;  %v10889_v56 = vld [vmem:[%s13520_s5 + $0x38] sm:$0xff]  }
 0x648   : > { %9872 = vmatpush3.bf16.msra.mxu1 %v10834_v41  ;;  %9887 = vmatprep.mubr.msk.bf16.mxu1 %vm10963_vm0, %v10962_v28  ;;  %v10888_v41 = vld [vmem:[%s13520_s5 + $0x30] sm:$0xff]  }
 0x649   : > { %9873 = vmatprep.subr.bf16.mxu1 %v10962_v28  ;;  %10004 = vmatpush3.bf16.msra.mxu0 %v10888_v41 }
 0x64a   : > { %10005 = vmatprep.subr.bf16.mxu0 %v10962_v28 }
 0x64c   : > { %9874 = vmatpush3.bf16.msra.mxu1 %v10835_v58 }
 0x64d   : > { %9875 = vmatprep.subr.bf16.mxu1 %v10962_v28  ;;  %10006 = vmatpush3.bf16.msra.mxu0 %v10889_v56 }
 0x64e   : > { %10011 = vmatprep.subr.bf16.mxu0 %v10962_v28 }
 0x650   : > { %9876 = vmatpush3.bf16.msra.mxu1 %v10836_v6 }
 0x651   : > { %9877 = vmatprep.subr.bf16.mxu1 %v10962_v28 }
 0x654   : > { %9878 = vmatpush3.bf16.msra.mxu1 %v10837_v27 }
 0x655   : > { %9879 = vmatprep.subr.bf16.mxu1 %v10962_v28 }
 0x658   : > { %9880 = vmatpush3.bf16.msra.mxu1 %v10838_v55 }
 0x659   : > { %9881 = vmatprep.subr.bf16.mxu1 %v10962_v28 }
 0x65c   : > { %9882 = vmatpush3.bf16.msra.mxu1 %v10839_v2 }
 0x65d   : > { %9883 = vmatprep.subr.bf16.mxu1 %v10962_v28 }
 0x660   : > { %9884 = vmatpush3.bf16.msra.mxu1 %v10840_v29 }
 0x661   : > { %9885 = vmatprep.subr.bf16.mxu1 %v10962_v28 }
 0x664   : > { %9886 = vmatpush3.bf16.msra.mxu1 %v10841_v24  ;;  %v10890_v24 = vld [vmem:[%s13522_s7] sm:$0xff]  }
 0x665   : > { %9891 = vmatprep.subr.bf16.mxu1 %v10962_v28 }
 0x667   : > { %9888 = vmatmul.mubr.bf16.vlgmr.msra.gmra.mrb[16].mxu1 %v6510_v20  ;;  %v10891_v20 = vld [vmem:[%s13522_s7 + $0x8] sm:$0xff]  }
 0x668   : > { %9892 = vmatpush3.bf16.msra.mxu1 %v10842_v15  ;;  %9907 = vmatprep.mubr.msk.bf16.mxu1 %vm10963_vm0, %v10962_v28 }
 0x669   : > { %9893 = vmatprep.subr.bf16.mxu1 %v10962_v28 }
 0x66c   : > { %9894 = vmatpush3.bf16.msra.mxu1 %v10843_v19  ;;  %v10892_v19 = vld [vmem:[%s13522_s7 + $0x10] sm:$0xff]  }
 0x66d   : > { %9895 = vmatprep.subr.bf16.mxu1 %v10962_v28 }
 0x670   : > { %9896 = vmatpush3.bf16.msra.mxu1 %v10844_v38  ;;  %v10893_v38 = vld [vmem:[%s13522_s7 + $0x18] sm:$0xff]  }
 0x671   : > { %9897 = vmatprep.subr.bf16.mxu1 %v10962_v28 }
 0x674   : > { %9898 = vmatpush3.bf16.msra.mxu1 %v10845_v17  ;;  %v10894_v17 = vld [vmem:[%s13522_s7 + $0x20] sm:$0xff]  }
 0x675   : > { %9899 = vmatprep.subr.bf16.mxu1 %v10962_v28 }
 0x678   : > { %9900 = vmatpush3.bf16.msra.mxu1 %v10846_v37  ;;  %v10895_v37 = vld [vmem:[%s13522_s7 + $0x28] sm:$0xff]  }
 0x679   : > { %9901 = vmatprep.subr.bf16.mxu1 %v10962_v28 }
 0x67c   : > { %9902 = vmatpush3.bf16.msra.mxu1 %v10847_v53  ;;  %v10896_v53 = vld [vmem:[%s13522_s7 + $0x30] sm:$0xff]  }
 0x67d   : > { %9903 = vmatprep.subr.bf16.mxu1 %v10962_v28 }
 0x680   : > { %9904 = vmatpush3.bf16.msra.mxu1 %v10848_v13  ;;  %v10897_v13 = vld [vmem:[%s13522_s7 + $0x38] sm:$0xff]  }
 0x681   : > { %9905 = vmatprep.subr.bf16.mxu1 %v10962_v28 }
 0x684   : > { %9906 = vmatpush3.bf16.msra.mxu1 %v10849_v22  ;;  %v7158_v22 = vld [vmem:[%s13521_s6] sm:$0x1] }
 0x685   : > { %9911 = vmatprep.subr.bf16.mxu1 %v10962_v28 }
 0x687   : > { %9908 = vmatmul.mubr.bf16.vlgmr.msra.gmra.mrb[16].mxu1 %v6618_v16 }
 0x688   : > { %9912 = vmatpush3.bf16.msra.mxu1 %v10850_v26  ;;  %9927 = vmatprep.mubr.msk.bf16.mxu1 %vm10963_vm0, %v10962_v28 }
 0x689   : > { %9913 = vmatprep.subr.bf16.mxu1 %v10962_v28 }
 0x68c   : > { %9914 = vmatpush3.bf16.msra.mxu1 %v10851_v54 }
 0x68d   : > { %9915 = vmatprep.subr.bf16.mxu1 %v10962_v28 }
 0x690   : > { %9916 = vmatpush3.bf16.msra.mxu1 %v10852_v31 }
 0x691   : > { %9917 = vmatprep.subr.bf16.mxu1 %v10962_v28 }
 0x694   : > { %9918 = vmatpush3.bf16.msra.mxu1 %v10853_v60 }
 0x695   : > { %9919 = vmatprep.subr.bf16.mxu1 %v10962_v28 }
 0x698   : > { %9920 = vmatpush3.bf16.msra.mxu1 %v10854_v11 }
 0x699   : > { %9921 = vmatprep.subr.bf16.mxu1 %v10962_v28 }
 0x69c   : > { %9922 = vmatpush3.bf16.msra.mxu1 %v10855_v59 }
 0x69d   : > { %9923 = vmatprep.subr.bf16.mxu1 %v10962_v28 }
 0x6a0   : > { %9924 = vmatpush3.bf16.msra.mxu1 %v10856_v52 }
 0x6a1   : > { %9925 = vmatprep.subr.bf16.mxu1 %v10962_v28 }
 0x6a4   : > { %9926 = vmatpush3.bf16.msra.mxu1 %v10857_v30 }
 0x6a5   : > { %9931 = vmatprep.subr.bf16.mxu1 %v10962_v28 }
 0x6a7   : > { %9928 = vmatmul.mubr.bf16.vlgmr.msra.gmra.mrb[16].mxu1 %v6726_v33 }
 0x6a8   : > { %9932 = vmatpush3.bf16.msra.mxu1 %v10858_v7  ;;  %9947 = vmatprep.mubr.msk.bf16.mxu1 %vm10963_vm0, %v10962_v28 }
 0x6a9   : > { %9933 = vmatprep.subr.bf16.mxu1 %v10962_v28 }
 0x6ac   : > { %9934 = vmatpush3.bf16.msra.mxu1 %v10859_v10 }
 0x6ad   : > { %9935 = vmatprep.subr.bf16.mxu1 %v10962_v28 }
 0x6b0   : > { %9936 = vmatpush3.bf16.msra.mxu1 %v10860_v45 }
 0x6b1   : > { %9937 = vmatprep.subr.bf16.mxu1 %v10962_v28 }
 0x6b4   : > { %9938 = vmatpush3.bf16.msra.mxu1 %v10861_v34 }
 0x6b5   : > { %9939 = vmatprep.subr.bf16.mxu1 %v10962_v28 }
 0x6b8   : > { %9940 = vmatpush3.bf16.msra.mxu1 %v10862_v25 }
 0x6b9   : > { %9941 = vmatprep.subr.bf16.mxu1 %v10962_v28 }
 0x6bc   : > { %9942 = vmatpush3.bf16.msra.mxu1 %v10863_v5 }
 0x6bd   : > { %9943 = vmatprep.subr.bf16.mxu1 %v10962_v28 }
 0x6c0   : > { %9944 = vmatpush3.bf16.msra.mxu1 %v10864_v61 }
 0x6c1   : > { %9945 = vmatprep.subr.bf16.mxu1 %v10962_v28 }
 0x6c4   : > { %9946 = vmatpush3.bf16.msra.mxu1 %v10865_v44 }
 0x6c5   : > { %9951 = vmatprep.subr.bf16.mxu1 %v10962_v28 }
 0x6c7   : > { %9948 = vmatmul.mubr.bf16.vlgmr.msra.gmra.mrb[16].mxu1 %v6834_v43 }
 0x6c8   : > { %9952 = vmatpush3.bf16.msra.mxu1 %v10866_v46  ;;  %9967 = vmatprep.mubr.msk.bf16.mxu1 %vm10963_vm0, %v10962_v28 }
 0x6c9   : > { %9953 = vmatprep.subr.bf16.mxu1 %v10962_v28 }
 0x6cc   : > { %9954 = vmatpush3.bf16.msra.mxu1 %v10867_v35 }
 0x6cd   : > { %9955 = vmatprep.subr.bf16.mxu1 %v10962_v28 }
 0x6d0   : > { %9956 = vmatpush3.bf16.msra.mxu1 %v10868_v62 }
 0x6d1   : > { %9957 = vmatprep.subr.bf16.mxu1 %v10962_v28 }
 0x6d4   : > { %9958 = vmatpush3.bf16.msra.mxu1 %v10869_v63 }
 0x6d5   : > { %9959 = vmatprep.subr.bf16.mxu1 %v10962_v28 }
 0x6d8   : > { %9960 = vmatpush3.bf16.msra.mxu1 %v10870_v1 }
 0x6d9   : > { %9961 = vmatprep.subr.bf16.mxu1 %v10962_v28 }
 0x6dc   : > { %9962 = vmatpush3.bf16.msra.mxu1 %v10871_v40 }
 0x6dd   : > { %9963 = vmatprep.subr.bf16.mxu1 %v10962_v28 }
 0x6e0   : > { %9964 = vmatpush3.bf16.msra.mxu1 %v10872_v36 }
 0x6e1   : > { %9965 = vmatprep.subr.bf16.mxu1 %v10962_v28 }
 0x6e4   : > { %9966 = vmatpush3.bf16.msra.mxu1 %v10873_v47 }
 0x6e5   : > { %9971 = vmatprep.subr.bf16.mxu1 %v10962_v28 }
 0x6e7   : > { %9968 = vmatmul.mubr.bf16.vlgmr.msra.gmra.mrb[16].mxu1 %v6942_v50 }
 0x6e8   : > { %9972 = vmatpush3.bf16.msra.mxu1 %v10874_v23  ;;  %9987 = vmatprep.mubr.msk.bf16.mxu1 %vm10963_vm0, %v10962_v28 }
 0x6e9   : > { %9973 = vmatprep.subr.bf16.mxu1 %v10962_v28 }
 0x6ec   : > { %9974 = vmatpush3.bf16.msra.mxu1 %v10875_v9 }
 0x6ed   : > { %9975 = vmatprep.subr.bf16.mxu1 %v10962_v28 }
 0x6f0   : > { %9976 = vmatpush3.bf16.msra.mxu1 %v10876_v51 }
 0x6f1   : > { %9977 = vmatprep.subr.bf16.mxu1 %v10962_v28 }
 0x6f4   : > { %9978 = vmatpush3.bf16.msra.mxu1 %v10877_v4 }
 0x6f5   : > { %9979 = vmatprep.subr.bf16.mxu1 %v10962_v28 }
 0x6f8   : > { %9980 = vmatpush3.bf16.msra.mxu1 %v10878_v57 }
 0x6f9   : > { %9981 = vmatprep.subr.bf16.mxu1 %v10962_v28 }
 0x6fc   : > { %9982 = vmatpush3.bf16.msra.mxu1 %v10879_v0 }
 0x6fd   : > { %9983 = vmatprep.subr.bf16.mxu1 %v10962_v28 }
 0x700   : > { %9984 = vmatpush3.bf16.msra.mxu1 %v10880_v39 }
 0x701   : > { %9985 = vmatprep.subr.bf16.mxu1 %v10962_v28 }
 0x704   : > { %9986 = vmatpush3.bf16.msra.mxu1 %v10881_v8 }
 0x707   : > { %9988 = vmatmul.mubr.bf16.vlgmr.msra.gmra.mrb[16].mxu1 %v7033_v12 }
 0x7da   : > { %v7133_v58 = vpop.f32.mrb[16].mxu1 }
 0x7db   : > { %v10047_v6 = vadd.f32 %v7133_v58, %v4435_v49  ;;  %v9989_v27 = vpop.f32.mrb[17].mxu1 }
 0x7dc   : > { %v7136_v55 = vpop.f32.mrb[18].mxu1 }
 0x7dd   : > { %v7140_v2 = vmax.f32 %v10047_v6, 0.0  ;;  %v9990_v29 = vpop.f32.mrb[19].mxu1 }
 0x7df   : > { %v7141_v15 = vpack.c.bf16 %v7140_v2, %v7140_v2 }
 0x7e1   : > { %10008 = vmatmul.mubr.bf16.vlgmr.msra.gmra.mrb[128].mxu0 %v7141_v15 }
 0x7e2   : > { %10012 = vmatpush3.bf16.msra.mxu0 %v10890_v24  ;;  %10027 = vmatprep.mubr.msk.bf16.mxu0 %vm10963_vm0, %v10962_v28 }
 0x7e3   : > { %10013 = vmatprep.subr.bf16.mxu0 %v10962_v28 }
 0x7e6   : > { %10014 = vmatpush3.bf16.msra.mxu0 %v10891_v20 }
 0x7e7   : > { %10015 = vmatprep.subr.bf16.mxu0 %v10962_v28 }
 0x7ea   : > { %10016 = vmatpush3.bf16.msra.mxu0 %v10892_v19 }
 0x7eb   : > { %10017 = vmatprep.subr.bf16.mxu0 %v10962_v28 }
 0x7ee   : > { %10018 = vmatpush3.bf16.msra.mxu0 %v10893_v38 }
 0x7ef   : > { %10019 = vmatprep.subr.bf16.mxu0 %v10962_v28 }
 0x7f2   : > { %10020 = vmatpush3.bf16.msra.mxu0 %v10894_v17 }
 0x7f3   : > { %10021 = vmatprep.subr.bf16.mxu0 %v10962_v28 }
 0x7f6   : > { %10022 = vmatpush3.bf16.msra.mxu0 %v10895_v37 }
 0x7f7   : > { %10023 = vmatprep.subr.bf16.mxu0 %v10962_v28 }
 0x7fa   : > { %10024 = vmatpush3.bf16.msra.mxu0 %v10896_v53 }
 0x7fb   : > { %10025 = vmatprep.subr.bf16.mxu0 %v10962_v28  ;;  %v7265_v28 = vld [vmem:[%s13523_s8] sm:$0x1] }
 0x7fe   : > { %10026 = vmatpush3.bf16.msra.mxu0 %v10897_v13 }
 0x8b4   : > { %v7241_v26 = vpop.f32.mrb[128].mxu0 }
 0x8b5   : > { %v7242_v16 = vadd.f32 %v7241_v26, %v7158_v22  ;;  %v10009_v14 = vpop.f32.mrb[129].mxu0 }
 0x8b6   : > { %v7244_v54 = vpop.f32.mrb[130].mxu0 }
 0x8b7   : > { %v7247_v3 = vmax.f32 %v7242_v16, 0.0  ;;  %v10010_v31 = vpop.f32.mrb[131].mxu0 }
 0x8b9   : > { %v7248_v21 = vpack.c.bf16 %v7247_v3, %v7247_v3 }
 0x8bb   : > { %10028 = vmatmul.mubr.bf16.vlgmr.msra.gmra.mrb[132].mxu0 %v7248_v21 }
 0x98e   : > { %v7348_v60 = vpop.f32.mrb[132].mxu0 }
 0x98f   : > { %v7349_v48 = vadd.f32 %v7348_v60, %v7265_v28  ;;  %v10029_v11 = vpop.f32.mrb[133].mxu0 }
 0x990   : > { %v7351_v32 = vpop.f32.mrb[134].mxu0 }
 0x991   : > { %7354 = vst [vmem:[%s324_s24] sm:$0x1] %v7349_v48  ;;  %v10030_v59 = vpop.f32.mrb[135].mxu0 }
 0x992   : > { %10911 = shalt.err (!%p10908_p3)
}
 0x993   : > { %s10912_s16 = scalar_lea.hbm %s13473_s29, 16  ;;  %s10916_s24 = scalar_lea.hbm %s13524_s9, 32 }
 0x994   : > { %p10913_p4 = scmp.ne.s32.totalorder %s13473_s29, %s10912_s16  ;;  %p10917_p9 = scmp.lt.u32.totalorder %s13473_s29, %s13524_s9 }
 0x995   : > { %p10918_p10 = scmp.lt.u32.totalorder %s10916_s24, %s10912_s16  ;;  %p10920_p12 = scmp.lt.u32.totalorder %s10912_s16, %s13473_s29 }
 0x996   : > { %p10914_p7 = pnand %p10913_p4, %p11053_p5 }
 0x997   : > { %p10919_p11 = por %p10918_p10, %p10917_p9 }
 0x998   : > { %p10915_p8 = pneg %p10914_p7 }
 0x999   : > { %p10921_p13 = por %p10920_p12, %p10919_p11 }
 0x99b   : > { %p10922_p0 = pnand %p10921_p13, %p10915_p8 }
 0x99d   : > { %10925 = shalt.err (!%p10922_p0)
}
 0x99e   : > { %10145 = dma.vmem_to_hbm [thread:$0]  (%p11053_p5), %s13475_s27, 16, %s13473_s29, %s7356_s14  }
 0x99f PF: > { %p10151_p1 = scmp.ge.s32.totalorder %s10960_s12, 2  ;;  %s7380_s13 = sand.u32 1, %s10948_s30  }
 0x9a0   : > { %s7381_s21 = scalar_lea.sflag [#allocation3], %s7380_s13 }
 0x9a1   : > { %p10148_p2 = pnand %p10151_p1, %p11057_p6 }
 0x9a3   : > { %10943 = dma.done.wait (!%p10148_p2), %s7381_s21, 16  }
 0x9a4   : > { %10945 = vsyncadd (!%p10148_p2), %s7381_s21, 4294967280  ;;  %p19_p3 = scmp.ge.s32.totalorder %s11040_s15, 4   ;;  %s13527_s30 = smov %s10952_s10 }
 0x9a5   : > { %s13528_s10 = smov %s10956_s11  ;;  %s13529_s11 = smov %s11051_s18 }
 0x9a6   : > { %s13530_s12 = smov %s11040_s15  ;;  %21 = sbr.rel (!%p19_p3) target bundleno = 3 (0x3), region = 115 }
 0x9ad   :  { %7385 = vsyncpa [#allocation3], 1 }
 0x9ae   :  { %7387 = vsyncpa [#allocation3 + $0x1], 1 }

</bundles_post_ra>
